<compile_context>
chip_gen: v7x
topology: tpu7x:2x2x1
jax: 0.10.0
libtpu: 0.0.40
codegen_flags: <defaults>
</compile_context>

<pallas_src>
import math
from functools import partial

import jax
import jax.numpy as jnp
from jax import lax
from jax.experimental import pallas as pl
from jax.experimental.pallas import tpu as pltpu

# ----------------------------- model config ---------------------------------
VOCAB = 256          # synthetic vocab (real T5 is 32128)
D_MODEL = 64
H = 4                # heads
DH = D_MODEL // H    # head dim
D_FF = 128
NUM_BUCKETS = 32
MAX_DISTANCE = 128
LN_EPS = 1e-6
NEG = -1e9           # additive mask value (stand-in for finfo.min)
COMPUTE_DTYPE = jnp.bfloat16   # MXU operand dtype (f32 accumulation everywhere)
N_CUR = 3            # matches the reference's literal logits[:, :3, :] slice

ARGS = dict(prev_turn_loss=True, d=0.5, prev_turn=1.0, label=["a", "b", "c"])


# ----------------------------- fused Pallas kernel ---------------------------
def _fused_t5_kernel(Le, Ld,
                     # inputs ------------------------------------------------
                     in_ids_ref, dec_ids_ref, labels_ref, mask_add_ref,
                     shared_ref, shared_t_ref, enc_bias_ref, dec_bias_ref,
                     e_ln1_ref, e_ln2_ref, e_lnf_ref,
                     e_wqkv_ref, e_wo_ref, e_wi_ref, e_wff_ref,
                     d_ln1_ref, d_ln2_ref, d_ln3_ref, d_lnf_ref,
                     d_wqkv_ref, d_so_ref, d_cq_ref, d_wckv_ref, d_co_ref,
                     d_wi_ref, d_wff_ref,
                     # outputs -----------------------------------------------
                     logits_ref, stats_ref):
    shared = shared_ref[...]                       # (VOCAB, D) f32
    mask_add = mask_add_ref[...]                   # (1, 1, Le) f32 additive pad mask

    # ---- helpers (bf16 MXU operands / f32 accumulation, f32 VPU math) -------
    def mm(a, b):
        return jnp.dot(a.astype(COMPUTE_DTYPE), b.astype(COMPUTE_DTYPE),
                       preferred_element_type=jnp.float32)

    def rmsnorm(x, w_ref):
        # T5LayerNorm: no mean subtraction, no bias; stats in f32
        var = jnp.mean(x * x, axis=-1, keepdims=True)
        return x * lax.rsqrt(var + LN_EPS) * w_ref[...]

    def embed(ids_ref, L):
        # exact f32 embedding lookup as a one-hot matmul on the MXU
        ids = ids_ref[...].reshape(L, 1)
        iota = lax.broadcasted_iota(jnp.int32, (L, VOCAB), 1)
        onehot = (iota == ids).astype(jnp.float32)
        return jnp.dot(onehot, shared, preferred_element_type=jnp.float32)

    def attend(q2d, k2d, v2d, wo_ref, bias, Lq, Lk):
        # Heads batched in single einsums (no per-head loop / lane slicing).
        # T5 attention: NO 1/sqrt(dh) scaling; additive bias (f32, hoisted).
        q3 = q2d.reshape(Lq, H, DH).astype(COMPUTE_DTYPE)
        k3 = k2d.reshape(Lk, H, DH).astype(COMPUTE_DTYPE)
        v3 = v2d.reshape(Lk, H, DH).astype(COMPUTE_DTYPE)
        s = jnp.einsum('qhd,khd->hqk', q3, k3,
                       preferred_element_type=jnp.float32) + bias   # (H,Lq,Lk)
        m = jnp.max(s, axis=-1, keepdims=True)
        p = jnp.exp(s - m)
        p = p * pl.reciprocal(jnp.sum(p, axis=-1, keepdims=True), approx=True)
        ctx = jnp.einsum('hqk,khd->hqd', p.astype(COMPUTE_DTYPE), v3,
                         preferred_element_type=jnp.float32)        # (H,Lq,DH)
        ctx2d = ctx.transpose(1, 0, 2).reshape(Lq, D_MODEL)
        return mm(ctx2d, wo_ref[...])                               # ONE (Lq,D)@(D,D)

    # ------------------------------ encoder ----------------------------------
    x = embed(in_ids_ref, Le)                                       # (Le, D)
    h = rmsnorm(x, e_ln1_ref)
    qkv = mm(h, e_wqkv_ref[...])                                    # (Le, 3D)
    enc_bias = enc_bias_ref[...] + mask_add                         # (H,Le,Le) hoisted once
    x = x + attend(qkv[:, :D_MODEL], qkv[:, D_MODEL:2 * D_MODEL],
                   qkv[:, 2 * D_MODEL:], e_wo_ref, enc_bias, Le, Le)
    h = rmsnorm(x, e_ln2_ref)
    x = x + mm(jnp.maximum(mm(h, e_wi_ref[...]), 0.0), e_wff_ref[...])
    enc_out = rmsnorm(x, e_lnf_ref)                                 # (Le, D)

    # ------------------------------ decoder ----------------------------------
    y = embed(dec_ids_ref, Ld)                                      # (Ld, D)
    h = rmsnorm(y, d_ln1_ref)
    qkv = mm(h, d_wqkv_ref[...])                                    # (Ld, 3D)
    y = y + attend(qkv[:, :D_MODEL], qkv[:, D_MODEL:2 * D_MODEL],
                   qkv[:, 2 * D_MODEL:], d_so_ref, dec_bias_ref[...], Ld, Ld)
    h = rmsnorm(y, d_ln2_ref)
    q = mm(h, d_cq_ref[...])                                        # (Ld, D)
    kv = mm(enc_out, d_wckv_ref[...])                               # (Le, 2D)
    y = y + attend(q, kv[:, :D_MODEL], kv[:, D_MODEL:],
                   d_co_ref, mask_add, Ld, Le)                      # cross: pad mask only
    h = rmsnorm(y, d_ln3_ref)
    y = y + mm(jnp.maximum(mm(h, d_wi_ref[...]), 0.0), d_wff_ref[...])
    dec_out = rmsnorm(y, d_lnf_ref)                                 # (Ld, D)

    # -------------------- tied LM head (pre-transposed table) ----------------
    seq = dec_out * (D_MODEL ** -0.5)
    logits = mm(seq, shared_t_ref[...])                             # (Ld, VOCAB) lane-dense
    logits_ref[...] = logits.reshape(1, Ld, VOCAB)

    # --------------- cur / prev turn cross-entropy (ignore=-100) --------------
    labels = labels_ref[...].reshape(Ld, 1)                         # (Ld, 1) i32
    m = jnp.max(logits, axis=-1, keepdims=True)
    lse = jnp.log(jnp.sum(jnp.exp(logits - m), axis=-1, keepdims=True)) + m
    iota = lax.broadcasted_iota(jnp.int32, (Ld, VOCAB), 1)
    onehot = (iota == labels).astype(jnp.float32)
    tgt = jnp.sum(logits * onehot, axis=-1, keepdims=True)
    valid = (labels != -100).astype(jnp.float32)
    per = (lse - tgt) * valid                                       # (Ld, 1)

    pos = lax.broadcasted_iota(jnp.int32, (Ld, 1), 0)
    cur = (pos < N_CUR).astype(jnp.float32)                         # cur-turn positions
    prev = 1.0 - cur
    sum_cur = jnp.sum(per * cur, axis=0, keepdims=True)             # (1, 1)
    cnt_cur = jnp.sum(valid * cur, axis=0, keepdims=True)
    sum_prev = jnp.sum(per * prev, axis=0, keepdims=True)
    cnt_prev = jnp.sum(valid * prev, axis=0, keepdims=True)

    # pack the 4 per-batch statistics into one tiny lane row (no concat)
    lane = lax.broadcasted_iota(jnp.int32, (1, 4), 1)
    stats = (jnp.where(lane == 0, sum_cur, 0.0)
             + jnp.where(lane == 1, cnt_cur, 0.0)
             + jnp.where(lane == 2, sum_prev, 0.0)
             + jnp.where(lane == 3, cnt_prev, 0.0))
    stats_ref[...] = stats.reshape(1, 1, 4)


def _bspec(shape, batched):
    if batched:
        rest = (0,) * (len(shape) - 1)
        return pl.BlockSpec((1,) + tuple(shape[1:]),
                            lambda b, _r=rest: (b,) + _r)
    zeros = (0,) * len(shape)
    return pl.BlockSpec(tuple(shape), lambda b, _z=zeros: _z)


# ----------------------------- T5 glue (tiny, param/shape-only) ---------------
def _relative_position_bucket(relative_position, bidirectional,
                              num_buckets=NUM_BUCKETS, max_distance=MAX_DISTANCE):
    relative_buckets = jnp.zeros_like(relative_position)
    if bidirectional:
        num_buckets //= 2
        relative_buckets = relative_buckets + (relative_position > 0).astype(jnp.int32) * num_buckets
        relative_position = jnp.abs(relative_position)
    else:
        relative_position = -jnp.minimum(relative_position, 0)
    max_exact = num_buckets // 2
    is_small = relative_position < max_exact
    rp_f = jnp.maximum(relative_position, 1).astype(jnp.float32)
    rp_large = max_exact + (
        jnp.log(rp_f / max_exact) / math.log(max_distance / max_exact)
        * (num_buckets - max_exact)
    ).astype(jnp.int32)
    rp_large = jnp.minimum(rp_large, num_buckets - 1)
    return relative_buckets + jnp.where(is_small, relative_position, rp_large)


def compute_bias(qlen, klen, rel_emb, bidirectional):
    ctx = jnp.arange(qlen, dtype=jnp.int32)[:, None]
    mem = jnp.arange(klen, dtype=jnp.int32)[None, :]
    buckets = _relative_position_bucket(mem - ctx, bidirectional)
    vals = jnp.take(rel_emb, buckets, axis=0)          # (q, k, H)
    return jnp.transpose(vals, (2, 0, 1))              # (H, q, k)


def shift_right(ids, decoder_start_token_id=0, pad_token_id=0):
    shifted = jnp.concatenate(
        [jnp.full((ids.shape[0], 1), decoder_start_token_id, ids.dtype), ids[:, :-1]],
        axis=1)
    return jnp.where(shifted == -100, pad_token_id, shifted)


# ----------------------------- forward ---------------------------------------
def t5_text_model_forward(params, input_ids, attention_masks, images,
                          label_input_ids, label_attention_mask, args=ARGS):
    # `images` and `label_attention_mask` are accepted but unused, exactly as
    # in the reference forward().
    del images, label_attention_mask
    B, Le = input_ids.shape
    Ld = label_input_ids.shape[1]

    decoder_input_ids = shift_right(label_input_ids)   # T5._shift_right

    # tiny, param/shape-dependent precomputation (NOT broadcast over B*H)
    enc_bias = compute_bias(Le, Le, params["enc_rel"], bidirectional=True)      # (H, Le, Le)
    causal_add = jnp.where(jnp.arange(Ld)[None, :] <= jnp.arange(Ld)[:, None],
                           0.0, NEG).astype(jnp.float32)
    dec_bias = (compute_bias(Ld, Ld, params["dec_rel"], bidirectional=False)
                + causal_add[None])                                              # (H, Ld, Ld)
    mask_add = (1.0 - attention_masks.astype(jnp.float32))[:, None, :] * NEG     # (B, 1, Le)

    shared = params["shared"]                        # (VOCAB, D) for embedding lookup
    shared_t = shared.T                              # (D, VOCAB) transposed ONCE, for LM head

    e, d = params["enc"], params["dec"]
    inputs = (
        input_ids.reshape(B, Le, 1).astype(jnp.int32),
        decoder_input_ids.reshape(B, Ld, 1).astype(jnp.int32),
        label_input_ids.reshape(B, Ld, 1).astype(jnp.int32),
        mask_add,
        shared, shared_t,
        enc_bias, dec_bias,
        e["ln1"], e["ln2"], params["enc_final_ln"],
        e["wqkv"], e["wo"], e["wi"], e["wo_ff"],
        d["ln1"], d["ln2"], d["ln3"], params["dec_final_ln"],
        d["wqkv"], d["so"], d["cq"], d["wckv"], d["co"], d["wi"], d["wo_ff"],
    )
    batched = (True, True, True, True) + (False,) * (len(inputs) - 4)

    logits, stats = pl.pallas_call(
        partial(_fused_t5_kernel, Le, Ld),
        out_shape=(jax.ShapeDtypeStruct((B, Ld, VOCAB), jnp.float32),
                   jax.ShapeDtypeStruct((B, 1, 4), jnp.float32)),
        grid=(B,),
        in_specs=[_bspec(x.shape, bt) for x, bt in zip(inputs, batched)],
        out_specs=(pl.BlockSpec((1, Ld, VOCAB), lambda b: (b, 0, 0)),
                   pl.BlockSpec((1, 1, 4), lambda b: (b, 0, 0))),
        compiler_params=pltpu.CompilerParams(
            dimension_semantics=("parallel",),          # shards across both TCs on v7x
            vmem_limit_bytes=64 * 1024 * 1024),
    )(*inputs)

    # combine the per-batch CE statistics (exactly reproduces the flattened
    # mean over valid targets of the PyTorch CrossEntropyLoss calls).
    s = jnp.sum(stats.reshape(B, 4), axis=0)
    # clamp denominator (PyTorch would give NaN if every target is ignored --
    # here all targets are valid so identical)
    loss_cur = s[0] / jnp.maximum(s[1], 1.0)
    loss_prev = s[2] / jnp.maximum(s[3], 1.0)
    if args.get("prev_turn_loss", True):
        prev_coef = float(args["d"]) * float(args["prev_turn"])
        loss = loss_cur + prev_coef * loss_prev
    else:
        loss = (s[0] + s[2]) / jnp.maximum(s[1] + s[3], 1.0)
    return loss, logits


# ----------------------------- params ----------------------------------------
def init_params(key):
    keys = iter(jax.random.split(key, 32))

    def nrm(shape, std=0.02):
        return (std * jax.random.normal(next(keys), shape)).astype(jnp.float32)

    ones = lambda: jnp.ones((1, D_MODEL), jnp.float32)
    return {
        "shared": nrm((VOCAB, D_MODEL)),
        "enc_rel": nrm((NUM_BUCKETS, H)),
        "dec_rel": nrm((NUM_BUCKETS, H)),
        "enc_final_ln": ones(),
        "dec_final_ln": ones(),
        "enc": {
            "ln1": ones(), "ln2": ones(),
            "wqkv": nrm((D_MODEL, 3 * D_MODEL)),   # packed [q | k | v]
            "wo": nrm((D_MODEL, D_MODEL)),
            "wi": nrm((D_MODEL, D_FF)), "wo_ff": nrm((D_FF, D_MODEL)),
        },
        "dec": {
            "ln1": ones(), "ln2": ones(), "ln3": ones(),
            "wqkv": nrm((D_MODEL, 3 * D_MODEL)),   # packed self-attn [q | k | v]
            "so": nrm((D_MODEL, D_MODEL)),
            "cq": nrm((D_MODEL, D_MODEL)),
            "wckv": nrm((D_MODEL, 2 * D_MODEL)),   # packed cross-attn [k | v]
            "co": nrm((D_MODEL, D_MODEL)),
            "wi": nrm((D_MODEL, D_FF)), "wo_ff": nrm((D_FF, D_MODEL)),
        },
    }


# ----------------------------- main -------------------------------------------
if __name__ == "__main__":
    key = jax.random.PRNGKey(0)
    kp, ki, kl = jax.random.split(key, 3)

    B, Le, Ld = 2, 8, 8
    params = init_params(kp)

    input_ids = jax.random.randint(ki, (B, Le), 2, VOCAB, dtype=jnp.int32)
    attention_masks = jnp.ones((B, Le), jnp.int32).at[1, -2:].set(0)   # some padding
    images = jnp.zeros((B, 3, 16, 16), jnp.float32)                    # unused by forward
    label_input_ids = jax.random.randint(kl, (B, Ld), 2, VOCAB, dtype=jnp.int32)
    label_attention_mask = jnp.ones((B, Ld), jnp.int32)                # unused by forward

    fwd = jax.jit(partial(t5_text_model_forward, args=ARGS))
    loss, logits = fwd(params, input_ids, attention_masks, images,
                       label_input_ids, label_attention_mask)
    jax.block_until_ready((loss, logits))

    assert logits.shape == (B, Ld, VOCAB)
    assert bool(jnp.isfinite(loss))
    print("KERNEL_OK")
</pallas_src>

<mosaic_0001>
module attributes {stable_mosaic.version = 11 : i64} {
  func.func @_fused_t5_kernel(%arg0: i32, %arg1: memref<1x8x1xi32, #tpu.memory_space<vmem>>, %arg2: memref<1x8x1xi32, #tpu.memory_space<vmem>>, %arg3: memref<1x8x1xi32, #tpu.memory_space<vmem>>, %arg4: memref<1x1x8xf32, #tpu.memory_space<vmem>>, %arg5: memref<256x64xf32, #tpu.memory_space<vmem>>, %arg6: memref<64x256xf32, #tpu.memory_space<vmem>>, %arg7: memref<4x8x8xf32, #tpu.memory_space<vmem>>, %arg8: memref<4x8x8xf32, #tpu.memory_space<vmem>>, %arg9: memref<1x64xf32, #tpu.memory_space<vmem>>, %arg10: memref<1x64xf32, #tpu.memory_space<vmem>>, %arg11: memref<1x64xf32, #tpu.memory_space<vmem>>, %arg12: memref<64x192xf32, #tpu.memory_space<vmem>>, %arg13: memref<64x64xf32, #tpu.memory_space<vmem>>, %arg14: memref<64x128xf32, #tpu.memory_space<vmem>>, %arg15: memref<128x64xf32, #tpu.memory_space<vmem>>, %arg16: memref<1x64xf32, #tpu.memory_space<vmem>>, %arg17: memref<1x64xf32, #tpu.memory_space<vmem>>, %arg18: memref<1x64xf32, #tpu.memory_space<vmem>>, %arg19: memref<1x64xf32, #tpu.memory_space<vmem>>, %arg20: memref<64x192xf32, #tpu.memory_space<vmem>>, %arg21: memref<64x64xf32, #tpu.memory_space<vmem>>, %arg22: memref<64x64xf32, #tpu.memory_space<vmem>>, %arg23: memref<64x128xf32, #tpu.memory_space<vmem>>, %arg24: memref<64x64xf32, #tpu.memory_space<vmem>>, %arg25: memref<64x128xf32, #tpu.memory_space<vmem>>, %arg26: memref<128x64xf32, #tpu.memory_space<vmem>>, %arg27: memref<1x8x256xf32, #tpu.memory_space<vmem>>, %arg28: memref<1x1x4xf32, #tpu.memory_space<vmem>>) attributes {dimension_semantics = [#tpu.dimension_semantics<parallel>], iteration_bounds = array<i64: 2>, scalar_prefetch = 0 : i64, scratch_operands = 0 : i64, tpu.core_type = #tpu.core_type<tc>, window_params = [{transform_indices = @transform_0, window_bounds = array<i64: 1, 8, 1>}, {transform_indices = @transform_1, window_bounds = array<i64: 1, 8, 1>}, {transform_indices = @transform_2, window_bounds = array<i64: 1, 8, 1>}, {transform_indices = @transform_3, window_bounds = array<i64: 1, 1, 8>}, {pipeline_mode = #tpu.pipeline_mode<synchronous>, transform_indices = @transform_4, window_bounds = array<i64: 256, 64>}, {pipeline_mode = #tpu.pipeline_mode<synchronous>, transform_indices = @transform_5, window_bounds = array<i64: 64, 256>}, {pipeline_mode = #tpu.pipeline_mode<synchronous>, transform_indices = @transform_6, window_bounds = array<i64: 4, 8, 8>}, {pipeline_mode = #tpu.pipeline_mode<synchronous>, transform_indices = @transform_7, window_bounds = array<i64: 4, 8, 8>}, {pipeline_mode = #tpu.pipeline_mode<synchronous>, transform_indices = @transform_8, window_bounds = array<i64: 1, 64>}, {pipeline_mode = #tpu.pipeline_mode<synchronous>, transform_indices = @transform_9, window_bounds = array<i64: 1, 64>}, {pipeline_mode = #tpu.pipeline_mode<synchronous>, transform_indices = @transform_10, window_bounds = array<i64: 1, 64>}, {pipeline_mode = #tpu.pipeline_mode<synchronous>, transform_indices = @transform_11, window_bounds = array<i64: 64, 192>}, {pipeline_mode = #tpu.pipeline_mode<synchronous>, transform_indices = @transform_12, window_bounds = array<i64: 64, 64>}, {pipeline_mode = #tpu.pipeline_mode<synchronous>, transform_indices = @transform_13, window_bounds = array<i64: 64, 128>}, {pipeline_mode = #tpu.pipeline_mode<synchronous>, transform_indices = @transform_14, window_bounds = array<i64: 128, 64>}, {pipeline_mode = #tpu.pipeline_mode<synchronous>, transform_indices = @transform_15, window_bounds = array<i64: 1, 64>}, {pipeline_mode = #tpu.pipeline_mode<synchronous>, transform_indices = @transform_16, window_bounds = array<i64: 1, 64>}, {pipeline_mode = #tpu.pipeline_mode<synchronous>, transform_indices = @transform_17, window_bounds = array<i64: 1, 64>}, {pipeline_mode = #tpu.pipeline_mode<synchronous>, transform_indices = @transform_18, window_bounds = array<i64: 1, 64>}, {pipeline_mode = #tpu.pipeline_mode<synchronous>, transform_indices = @transform_19, window_bounds = array<i64: 64, 192>}, {pipeline_mode = #tpu.pipeline_mode<synchronous>, transform_indices = @transform_20, window_bounds = array<i64: 64, 64>}, {pipeline_mode = #tpu.pipeline_mode<synchronous>, transform_indices = @transform_21, window_bounds = array<i64: 64, 64>}, {pipeline_mode = #tpu.pipeline_mode<synchronous>, transform_indices = @transform_22, window_bounds = array<i64: 64, 128>}, {pipeline_mode = #tpu.pipeline_mode<synchronous>, transform_indices = @transform_23, window_bounds = array<i64: 64, 64>}, {pipeline_mode = #tpu.pipeline_mode<synchronous>, transform_indices = @transform_24, window_bounds = array<i64: 64, 128>}, {pipeline_mode = #tpu.pipeline_mode<synchronous>, transform_indices = @transform_25, window_bounds = array<i64: 128, 64>}, {transform_indices = @transform_26, window_bounds = array<i64: 1, 8, 256>}, {transform_indices = @transform_27, window_bounds = array<i64: 1, 1, 4>}]} {
    %c0 = arith.constant 0 : index
    %c0_0 = arith.constant 0 : index
    %0 = vector.load %arg5[%c0, %c0_0] : memref<256x64xf32, #tpu.memory_space<vmem>>, vector<256x64xf32>
    %c0_1 = arith.constant 0 : index
    %c0_2 = arith.constant 0 : index
    %c0_3 = arith.constant 0 : index
    %1 = vector.load %arg4[%c0_1, %c0_2, %c0_3] : memref<1x1x8xf32, #tpu.memory_space<vmem>>, vector<1x1x8xf32>
    %c0_4 = arith.constant 0 : index
    %c0_5 = arith.constant 0 : index
    %c0_6 = arith.constant 0 : index
    %2 = vector.load %arg1[%c0_4, %c0_5, %c0_6] : memref<1x8x1xi32, #tpu.memory_space<vmem>>, vector<1x8x1xi32>
    %3 = vector.shape_cast %2 : vector<1x8x1xi32> to vector<8x1xi32>
    %4 = tpu.iota {dimensions = array<i32: 1>} : vector<8x256xi32>
    %5 = vector.broadcast %3 : vector<8x1xi32> to vector<8x256xi32>
    %6 = arith.cmpi eq, %4, %5 : vector<8x256xi32>
    %7 = arith.extui %6 : vector<8x256xi1> to vector<8x256xi32>
    %8 = arith.sitofp %7 : vector<8x256xi32> to vector<8x256xf32>
    %cst = arith.constant dense<0.000000e+00> : vector<8x64xf32>
    %9 = tpu.matmul %8, %0, %cst {dimension_numbers = #tpu.dot_dimension_numbers<[1], [0], [0], [1], [0, 0, 1, 1], [], []>} : vector<8x256xf32>, vector<256x64xf32>, vector<8x64xf32> -> vector<8x64xf32>
    %10 = arith.mulf %9, %9 : vector<8x64xf32>
    %cst_7 = arith.constant dense<0.000000e+00> : vector<8xf32>
    %11 = vector.multi_reduction <add>, %10, %cst_7 [1] : vector<8x64xf32> to vector<8xf32>
    %12 = vector.shape_cast %11 : vector<8xf32> to vector<8x1xf32>
    %cst_8 = arith.constant 6.400000e+01 : f32
    %13 = vector.broadcast %cst_8 : f32 to vector<8x1xf32>
    %14 = arith.divf %12, %13 : vector<8x1xf32>
    %cst_9 = arith.constant 9.99999997E-7 : f32
    %15 = vector.broadcast %cst_9 : f32 to vector<8x1xf32>
    %16 = arith.addf %14, %15 : vector<8x1xf32>
    %17 = math.rsqrt %16 : vector<8x1xf32>
    %18 = vector.broadcast %17 : vector<8x1xf32> to vector<8x64xf32>
    %19 = arith.mulf %9, %18 : vector<8x64xf32>
    %c0_10 = arith.constant 0 : index
    %c0_11 = arith.constant 0 : index
    %20 = vector.load %arg9[%c0_10, %c0_11] : memref<1x64xf32, #tpu.memory_space<vmem>>, vector<1x64xf32>
    %21 = vector.broadcast %20 : vector<1x64xf32> to vector<8x64xf32>
    %22 = arith.mulf %19, %21 : vector<8x64xf32>
    %c0_12 = arith.constant 0 : index
    %c0_13 = arith.constant 0 : index
    %23 = vector.load %arg12[%c0_12, %c0_13] : memref<64x192xf32, #tpu.memory_space<vmem>>, vector<64x192xf32>
    %24 = arith.truncf %22 : vector<8x64xf32> to vector<8x64xbf16>
    %25 = arith.truncf %23 : vector<64x192xf32> to vector<64x192xbf16>
    %cst_14 = arith.constant dense<0.000000e+00> : vector<8x192xf32>
    %26 = tpu.matmul %24, %25, %cst_14 {dimension_numbers = #tpu.dot_dimension_numbers<[1], [0], [0], [1], [0, 0, 1, 1], [], []>} : vector<8x64xbf16>, vector<64x192xbf16>, vector<8x192xf32> -> vector<8x192xf32>
    %c0_15 = arith.constant 0 : index
    %c0_16 = arith.constant 0 : index
    %c0_17 = arith.constant 0 : index
    %27 = vector.load %arg7[%c0_15, %c0_16, %c0_17] : memref<4x8x8xf32, #tpu.memory_space<vmem>>, vector<4x8x8xf32>
    %28 = vector.broadcast %1 : vector<1x1x8xf32> to vector<4x8x8xf32>
    %29 = arith.addf %27, %28 : vector<4x8x8xf32>
    %30 = vector.extract_strided_slice %26 {offsets = [0, 0], sizes = [8, 64], strides = [1, 1]} : vector<8x192xf32> to vector<8x64xf32>
    %31 = vector.extract_strided_slice %26 {offsets = [0, 64], sizes = [8, 64], strides = [1, 1]} : vector<8x192xf32> to vector<8x64xf32>
    %32 = vector.extract_strided_slice %26 {offsets = [0, 128], sizes = [8, 64], strides = [1, 1]} : vector<8x192xf32> to vector<8x64xf32>
    %33 = vector.shape_cast %30 : vector<8x64xf32> to vector<8x4x16xf32>
    %34 = arith.truncf %33 : vector<8x4x16xf32> to vector<8x4x16xbf16>
    %35 = vector.shape_cast %31 : vector<8x64xf32> to vector<8x4x16xf32>
    %36 = arith.truncf %35 : vector<8x4x16xf32> to vector<8x4x16xbf16>
    %37 = vector.shape_cast %32 : vector<8x64xf32> to vector<8x4x16xf32>
    %38 = arith.truncf %37 : vector<8x4x16xf32> to vector<8x4x16xbf16>
    "tpu.trace_start"() <{level = 10 : i32, message = "qhd,khd->hqk"}> : () -> ()
    %cst_18 = arith.constant dense<0.000000e+00> : vector<4x8x8xf32>
    %39 = tpu.matmul %34, %36, %cst_18 {dimension_numbers = #tpu.dot_dimension_numbers<[2], [2], [0], [0], [0, 1, 0, 0, 1, 0], [1], [1]>} : vector<8x4x16xbf16>, vector<8x4x16xbf16>, vector<4x8x8xf32> -> vector<4x8x8xf32>
    "tpu.trace_stop"() : () -> ()
    %40 = arith.addf %39, %29 : vector<4x8x8xf32>
    %cst_19 = arith.constant dense<0xFF800000> : vector<4x8xf32>
    %41 = vector.multi_reduction <maximumf>, %40, %cst_19 [2] : vector<4x8x8xf32> to vector<4x8xf32>
    %42 = vector.shape_cast %41 : vector<4x8xf32> to vector<4x8x1xf32>
    %43 = vector.broadcast %42 : vector<4x8x1xf32> to vector<4x8x8xf32>
    %44 = arith.subf %40, %43 : vector<4x8x8xf32>
    %45 = math.exp %44 : vector<4x8x8xf32>
    %cst_20 = arith.constant dense<0.000000e+00> : vector<4x8xf32>
    %46 = vector.multi_reduction <add>, %45, %cst_20 [2] : vector<4x8x8xf32> to vector<4x8xf32>
    %47 = vector.shape_cast %46 : vector<4x8xf32> to vector<4x8x1xf32>
    %48 = tpu.reciprocal %47 {approx = true} : vector<4x8x1xf32> -> vector<4x8x1xf32>
    %49 = vector.broadcast %48 : vector<4x8x1xf32> to vector<4x8x8xf32>
    %50 = arith.mulf %45, %49 : vector<4x8x8xf32>
    %51 = arith.truncf %50 : vector<4x8x8xf32> to vector<4x8x8xbf16>
    "tpu.trace_start"() <{level = 10 : i32, message = "hqk,khd->hqd"}> : () -> ()
    %cst_21 = arith.constant dense<0.000000e+00> : vector<4x8x16xf32>
    %52 = tpu.matmul %51, %38, %cst_21 {dimension_numbers = #tpu.dot_dimension_numbers<[2], [0], [1], [2], [0, 0, 0, 1, 1, 2], [0], [1]>} : vector<4x8x8xbf16>, vector<8x4x16xbf16>, vector<4x8x16xf32> -> vector<4x8x16xf32>
    "tpu.trace_stop"() : () -> ()
    %53 = tpu.transpose %52, [1, 0, 2] : vector<4x8x16xf32> -> vector<8x4x16xf32>
    %54 = vector.shape_cast %53 : vector<8x4x16xf32> to vector<8x64xf32>
    %c0_22 = arith.constant 0 : index
    %c0_23 = arith.constant 0 : index
    %55 = vector.load %arg13[%c0_22, %c0_23] : memref<64x64xf32, #tpu.memory_space<vmem>>, vector<64x64xf32>
    %56 = arith.truncf %54 : vector<8x64xf32> to vector<8x64xbf16>
    %57 = arith.truncf %55 : vector<64x64xf32> to vector<64x64xbf16>
    %cst_24 = arith.constant dense<0.000000e+00> : vector<8x64xf32>
    %58 = tpu.matmul %56, %57, %cst_24 {dimension_numbers = #tpu.dot_dimension_numbers<[1], [0], [0], [1], [0, 0, 1, 1], [], []>} : vector<8x64xbf16>, vector<64x64xbf16>, vector<8x64xf32> -> vector<8x64xf32>
    %59 = arith.addf %9, %58 : vector<8x64xf32>
    %60 = arith.mulf %59, %59 : vector<8x64xf32>
    %cst_25 = arith.constant dense<0.000000e+00> : vector<8xf32>
    %61 = vector.multi_reduction <add>, %60, %cst_25 [1] : vector<8x64xf32> to vector<8xf32>
    %62 = vector.shape_cast %61 : vector<8xf32> to vector<8x1xf32>
    %cst_26 = arith.constant 6.400000e+01 : f32
    %63 = vector.broadcast %cst_26 : f32 to vector<8x1xf32>
    %64 = arith.divf %62, %63 : vector<8x1xf32>
    %cst_27 = arith.constant 9.99999997E-7 : f32
    %65 = vector.broadcast %cst_27 : f32 to vector<8x1xf32>
    %66 = arith.addf %64, %65 : vector<8x1xf32>
    %67 = math.rsqrt %66 : vector<8x1xf32>
    %68 = vector.broadcast %67 : vector<8x1xf32> to vector<8x64xf32>
    %69 = arith.mulf %59, %68 : vector<8x64xf32>
    %c0_28 = arith.constant 0 : index
    %c0_29 = arith.constant 0 : index
    %70 = vector.load %arg10[%c0_28, %c0_29] : memref<1x64xf32, #tpu.memory_space<vmem>>, vector<1x64xf32>
    %71 = vector.broadcast %70 : vector<1x64xf32> to vector<8x64xf32>
    %72 = arith.mulf %69, %71 : vector<8x64xf32>
    %c0_30 = arith.constant 0 : index
    %c0_31 = arith.constant 0 : index
    %73 = vector.load %arg14[%c0_30, %c0_31] : memref<64x128xf32, #tpu.memory_space<vmem>>, vector<64x128xf32>
    %74 = arith.truncf %72 : vector<8x64xf32> to vector<8x64xbf16>
    %75 = arith.truncf %73 : vector<64x128xf32> to vector<64x128xbf16>
    %cst_32 = arith.constant dense<0.000000e+00> : vector<8x128xf32>
    %76 = tpu.matmul %74, %75, %cst_32 {dimension_numbers = #tpu.dot_dimension_numbers<[1], [0], [0], [1], [0, 0, 1, 1], [], []>} : vector<8x64xbf16>, vector<64x128xbf16>, vector<8x128xf32> -> vector<8x128xf32>
    %cst_33 = arith.constant 0.000000e+00 : f32
    %77 = vector.broadcast %cst_33 : f32 to vector<8x128xf32>
    %78 = arith.maximumf %76, %77 : vector<8x128xf32>
    %c0_34 = arith.constant 0 : index
    %c0_35 = arith.constant 0 : index
    %79 = vector.load %arg15[%c0_34, %c0_35] : memref<128x64xf32, #tpu.memory_space<vmem>>, vector<128x64xf32>
    %80 = arith.truncf %78 : vector<8x128xf32> to vector<8x128xbf16>
    %81 = arith.truncf %79 : vector<128x64xf32> to vector<128x64xbf16>
    %cst_36 = arith.constant dense<0.000000e+00> : vector<8x64xf32>
    %82 = tpu.matmul %80, %81, %cst_36 {dimension_numbers = #tpu.dot_dimension_numbers<[1], [0], [0], [1], [0, 0, 1, 1], [], []>} : vector<8x128xbf16>, vector<128x64xbf16>, vector<8x64xf32> -> vector<8x64xf32>
    %83 = arith.addf %59, %82 : vector<8x64xf32>
    %84 = arith.mulf %83, %83 : vector<8x64xf32>
    %cst_37 = arith.constant dense<0.000000e+00> : vector<8xf32>
    %85 = vector.multi_reduction <add>, %84, %cst_37 [1] : vector<8x64xf32> to vector<8xf32>
    %86 = vector.shape_cast %85 : vector<8xf32> to vector<8x1xf32>
    %cst_38 = arith.constant 6.400000e+01 : f32
    %87 = vector.broadcast %cst_38 : f32 to vector<8x1xf32>
    %88 = arith.divf %86, %87 : vector<8x1xf32>
    %cst_39 = arith.constant 9.99999997E-7 : f32
    %89 = vector.broadcast %cst_39 : f32 to vector<8x1xf32>
    %90 = arith.addf %88, %89 : vector<8x1xf32>
    %91 = math.rsqrt %90 : vector<8x1xf32>
    %92 = vector.broadcast %91 : vector<8x1xf32> to vector<8x64xf32>
    %93 = arith.mulf %83, %92 : vector<8x64xf32>
    %c0_40 = arith.constant 0 : index
    %c0_41 = arith.constant 0 : index
    %94 = vector.load %arg11[%c0_40, %c0_41] : memref<1x64xf32, #tpu.memory_space<vmem>>, vector<1x64xf32>
    %95 = vector.broadcast %94 : vector<1x64xf32> to vector<8x64xf32>
    %96 = arith.mulf %93, %95 : vector<8x64xf32>
    %c0_42 = arith.constant 0 : index
    %c0_43 = arith.constant 0 : index
    %c0_44 = arith.constant 0 : index
    %97 = vector.load %arg2[%c0_42, %c0_43, %c0_44] : memref<1x8x1xi32, #tpu.memory_space<vmem>>, vector<1x8x1xi32>
    %98 = vector.shape_cast %97 : vector<1x8x1xi32> to vector<8x1xi32>
    %99 = tpu.iota {dimensions = array<i32: 1>} : vector<8x256xi32>
    %100 = vector.broadcast %98 : vector<8x1xi32> to vector<8x256xi32>
    %101 = arith.cmpi eq, %99, %100 : vector<8x256xi32>
    %102 = arith.extui %101 : vector<8x256xi1> to vector<8x256xi32>
    %103 = arith.sitofp %102 : vector<8x256xi32> to vector<8x256xf32>
    %cst_45 = arith.constant dense<0.000000e+00> : vector<8x64xf32>
    %104 = tpu.matmul %103, %0, %cst_45 {dimension_numbers = #tpu.dot_dimension_numbers<[1], [0], [0], [1], [0, 0, 1, 1], [], []>} : vector<8x256xf32>, vector<256x64xf32>, vector<8x64xf32> -> vector<8x64xf32>
    %105 = arith.mulf %104, %104 : vector<8x64xf32>
    %cst_46 = arith.constant dense<0.000000e+00> : vector<8xf32>
    %106 = vector.multi_reduction <add>, %105, %cst_46 [1] : vector<8x64xf32> to vector<8xf32>
    %107 = vector.shape_cast %106 : vector<8xf32> to vector<8x1xf32>
    %cst_47 = arith.constant 6.400000e+01 : f32
    %108 = vector.broadcast %cst_47 : f32 to vector<8x1xf32>
    %109 = arith.divf %107, %108 : vector<8x1xf32>
    %cst_48 = arith.constant 9.99999997E-7 : f32
    %110 = vector.broadcast %cst_48 : f32 to vector<8x1xf32>
    %111 = arith.addf %109, %110 : vector<8x1xf32>
    %112 = math.rsqrt %111 : vector<8x1xf32>
    %113 = vector.broadcast %112 : vector<8x1xf32> to vector<8x64xf32>
    %114 = arith.mulf %104, %113 : vector<8x64xf32>
    %c0_49 = arith.constant 0 : index
    %c0_50 = arith.constant 0 : index
    %115 = vector.load %arg16[%c0_49, %c0_50] : memref<1x64xf32, #tpu.memory_space<vmem>>, vector<1x64xf32>
    %116 = vector.broadcast %115 : vector<1x64xf32> to vector<8x64xf32>
    %117 = arith.mulf %114, %116 : vector<8x64xf32>
    %c0_51 = arith.constant 0 : index
    %c0_52 = arith.constant 0 : index
    %118 = vector.load %arg20[%c0_51, %c0_52] : memref<64x192xf32, #tpu.memory_space<vmem>>, vector<64x192xf32>
    %119 = arith.truncf %117 : vector<8x64xf32> to vector<8x64xbf16>
    %120 = arith.truncf %118 : vector<64x192xf32> to vector<64x192xbf16>
    %cst_53 = arith.constant dense<0.000000e+00> : vector<8x192xf32>
    %121 = tpu.matmul %119, %120, %cst_53 {dimension_numbers = #tpu.dot_dimension_numbers<[1], [0], [0], [1], [0, 0, 1, 1], [], []>} : vector<8x64xbf16>, vector<64x192xbf16>, vector<8x192xf32> -> vector<8x192xf32>
    %122 = vector.extract_strided_slice %121 {offsets = [0, 0], sizes = [8, 64], strides = [1, 1]} : vector<8x192xf32> to vector<8x64xf32>
    %123 = vector.extract_strided_slice %121 {offsets = [0, 64], sizes = [8, 64], strides = [1, 1]} : vector<8x192xf32> to vector<8x64xf32>
    %124 = vector.extract_strided_slice %121 {offsets = [0, 128], sizes = [8, 64], strides = [1, 1]} : vector<8x192xf32> to vector<8x64xf32>
    %c0_54 = arith.constant 0 : index
    %c0_55 = arith.constant 0 : index
    %c0_56 = arith.constant 0 : index
    %125 = vector.load %arg8[%c0_54, %c0_55, %c0_56] : memref<4x8x8xf32, #tpu.memory_space<vmem>>, vector<4x8x8xf32>
    %126 = vector.shape_cast %122 : vector<8x64xf32> to vector<8x4x16xf32>
    %127 = arith.truncf %126 : vector<8x4x16xf32> to vector<8x4x16xbf16>
    %128 = vector.shape_cast %123 : vector<8x64xf32> to vector<8x4x16xf32>
    %129 = arith.truncf %128 : vector<8x4x16xf32> to vector<8x4x16xbf16>
    %130 = vector.shape_cast %124 : vector<8x64xf32> to vector<8x4x16xf32>
    %131 = arith.truncf %130 : vector<8x4x16xf32> to vector<8x4x16xbf16>
    "tpu.trace_start"() <{level = 10 : i32, message = "qhd,khd->hqk"}> : () -> ()
    %cst_57 = arith.constant dense<0.000000e+00> : vector<4x8x8xf32>
    %132 = tpu.matmul %127, %129, %cst_57 {dimension_numbers = #tpu.dot_dimension_numbers<[2], [2], [0], [0], [0, 1, 0, 0, 1, 0], [1], [1]>} : vector<8x4x16xbf16>, vector<8x4x16xbf16>, vector<4x8x8xf32> -> vector<4x8x8xf32>
    "tpu.trace_stop"() : () -> ()
    %133 = arith.addf %132, %125 : vector<4x8x8xf32>
    %cst_58 = arith.constant dense<0xFF800000> : vector<4x8xf32>
    %134 = vector.multi_reduction <maximumf>, %133, %cst_58 [2] : vector<4x8x8xf32> to vector<4x8xf32>
    %135 = vector.shape_cast %134 : vector<4x8xf32> to vector<4x8x1xf32>
    %136 = vector.broadcast %135 : vector<4x8x1xf32> to vector<4x8x8xf32>
    %137 = arith.subf %133, %136 : vector<4x8x8xf32>
    %138 = math.exp %137 : vector<4x8x8xf32>
    %cst_59 = arith.constant dense<0.000000e+00> : vector<4x8xf32>
    %139 = vector.multi_reduction <add>, %138, %cst_59 [2] : vector<4x8x8xf32> to vector<4x8xf32>
    %140 = vector.shape_cast %139 : vector<4x8xf32> to vector<4x8x1xf32>
    %141 = tpu.reciprocal %140 {approx = true} : vector<4x8x1xf32> -> vector<4x8x1xf32>
    %142 = vector.broadcast %141 : vector<4x8x1xf32> to vector<4x8x8xf32>
    %143 = arith.mulf %138, %142 : vector<4x8x8xf32>
    %144 = arith.truncf %143 : vector<4x8x8xf32> to vector<4x8x8xbf16>
    "tpu.trace_start"() <{level = 10 : i32, message = "hqk,khd->hqd"}> : () -> ()
    %cst_60 = arith.constant dense<0.000000e+00> : vector<4x8x16xf32>
    %145 = tpu.matmul %144, %131, %cst_60 {dimension_numbers = #tpu.dot_dimension_numbers<[2], [0], [1], [2], [0, 0, 0, 1, 1, 2], [0], [1]>} : vector<4x8x8xbf16>, vector<8x4x16xbf16>, vector<4x8x16xf32> -> vector<4x8x16xf32>
    "tpu.trace_stop"() : () -> ()
    %146 = tpu.transpose %145, [1, 0, 2] : vector<4x8x16xf32> -> vector<8x4x16xf32>
    %147 = vector.shape_cast %146 : vector<8x4x16xf32> to vector<8x64xf32>
    %c0_61 = arith.constant 0 : index
    %c0_62 = arith.constant 0 : index
    %148 = vector.load %arg21[%c0_61, %c0_62] : memref<64x64xf32, #tpu.memory_space<vmem>>, vector<64x64xf32>
    %149 = arith.truncf %147 : vector<8x64xf32> to vector<8x64xbf16>
    %150 = arith.truncf %148 : vector<64x64xf32> to vector<64x64xbf16>
    %cst_63 = arith.constant dense<0.000000e+00> : vector<8x64xf32>
    %151 = tpu.matmul %149, %150, %cst_63 {dimension_numbers = #tpu.dot_dimension_numbers<[1], [0], [0], [1], [0, 0, 1, 1], [], []>} : vector<8x64xbf16>, vector<64x64xbf16>, vector<8x64xf32> -> vector<8x64xf32>
    %152 = arith.addf %104, %151 : vector<8x64xf32>
    %153 = arith.mulf %152, %152 : vector<8x64xf32>
    %cst_64 = arith.constant dense<0.000000e+00> : vector<8xf32>
    %154 = vector.multi_reduction <add>, %153, %cst_64 [1] : vector<8x64xf32> to vector<8xf32>
    %155 = vector.shape_cast %154 : vector<8xf32> to vector<8x1xf32>
    %cst_65 = arith.constant 6.400000e+01 : f32
    %156 = vector.broadcast %cst_65 : f32 to vector<8x1xf32>
    %157 = arith.divf %155, %156 : vector<8x1xf32>
    %cst_66 = arith.constant 9.99999997E-7 : f32
    %158 = vector.broadcast %cst_66 : f32 to vector<8x1xf32>
    %159 = arith.addf %157, %158 : vector<8x1xf32>
    %160 = math.rsqrt %159 : vector<8x1xf32>
    %161 = vector.broadcast %160 : vector<8x1xf32> to vector<8x64xf32>
    %162 = arith.mulf %152, %161 : vector<8x64xf32>
    %c0_67 = arith.constant 0 : index
    %c0_68 = arith.constant 0 : index
    %163 = vector.load %arg17[%c0_67, %c0_68] : memref<1x64xf32, #tpu.memory_space<vmem>>, vector<1x64xf32>
    %164 = vector.broadcast %163 : vector<1x64xf32> to vector<8x64xf32>
    %165 = arith.mulf %162, %164 : vector<8x64xf32>
    %c0_69 = arith.constant 0 : index
    %c0_70 = arith.constant 0 : index
    %166 = vector.load %arg22[%c0_69, %c0_70] : memref<64x64xf32, #tpu.memory_space<vmem>>, vector<64x64xf32>
    %167 = arith.truncf %165 : vector<8x64xf32> to vector<8x64xbf16>
    %168 = arith.truncf %166 : vector<64x64xf32> to vector<64x64xbf16>
    %cst_71 = arith.constant dense<0.000000e+00> : vector<8x64xf32>
    %169 = tpu.matmul %167, %168, %cst_71 {dimension_numbers = #tpu.dot_dimension_numbers<[1], [0], [0], [1], [0, 0, 1, 1], [], []>} : vector<8x64xbf16>, vector<64x64xbf16>, vector<8x64xf32> -> vector<8x64xf32>
    %c0_72 = arith.constant 0 : index
    %c0_73 = arith.constant 0 : index
    %170 = vector.load %arg23[%c0_72, %c0_73] : memref<64x128xf32, #tpu.memory_space<vmem>>, vector<64x128xf32>
    %171 = arith.truncf %96 : vector<8x64xf32> to vector<8x64xbf16>
    %172 = arith.truncf %170 : vector<64x128xf32> to vector<64x128xbf16>
    %cst_74 = arith.constant dense<0.000000e+00> : vector<8x128xf32>
    %173 = tpu.matmul %171, %172, %cst_74 {dimension_numbers = #tpu.dot_dimension_numbers<[1], [0], [0], [1], [0, 0, 1, 1], [], []>} : vector<8x64xbf16>, vector<64x128xbf16>, vector<8x128xf32> -> vector<8x128xf32>
    %174 = vector.extract_strided_slice %173 {offsets = [0, 0], sizes = [8, 64], strides = [1, 1]} : vector<8x128xf32> to vector<8x64xf32>
    %175 = vector.extract_strided_slice %173 {offsets = [0, 64], sizes = [8, 64], strides = [1, 1]} : vector<8x128xf32> to vector<8x64xf32>
    %176 = vector.shape_cast %169 : vector<8x64xf32> to vector<8x4x16xf32>
    %177 = arith.truncf %176 : vector<8x4x16xf32> to vector<8x4x16xbf16>
    %178 = vector.shape_cast %174 : vector<8x64xf32> to vector<8x4x16xf32>
    %179 = arith.truncf %178 : vector<8x4x16xf32> to vector<8x4x16xbf16>
    %180 = vector.shape_cast %175 : vector<8x64xf32> to vector<8x4x16xf32>
    %181 = arith.truncf %180 : vector<8x4x16xf32> to vector<8x4x16xbf16>
    "tpu.trace_start"() <{level = 10 : i32, message = "qhd,khd->hqk"}> : () -> ()
    %cst_75 = arith.constant dense<0.000000e+00> : vector<4x8x8xf32>
    %182 = tpu.matmul %177, %179, %cst_75 {dimension_numbers = #tpu.dot_dimension_numbers<[2], [2], [0], [0], [0, 1, 0, 0, 1, 0], [1], [1]>} : vector<8x4x16xbf16>, vector<8x4x16xbf16>, vector<4x8x8xf32> -> vector<4x8x8xf32>
    "tpu.trace_stop"() : () -> ()
    %183 = vector.broadcast %1 : vector<1x1x8xf32> to vector<4x8x8xf32>
    %184 = arith.addf %182, %183 : vector<4x8x8xf32>
    %cst_76 = arith.constant dense<0xFF800000> : vector<4x8xf32>
    %185 = vector.multi_reduction <maximumf>, %184, %cst_76 [2] : vector<4x8x8xf32> to vector<4x8xf32>
    %186 = vector.shape_cast %185 : vector<4x8xf32> to vector<4x8x1xf32>
    %187 = vector.broadcast %186 : vector<4x8x1xf32> to vector<4x8x8xf32>
    %188 = arith.subf %184, %187 : vector<4x8x8xf32>
    %189 = math.exp %188 : vector<4x8x8xf32>
    %cst_77 = arith.constant dense<0.000000e+00> : vector<4x8xf32>
    %190 = vector.multi_reduction <add>, %189, %cst_77 [2] : vector<4x8x8xf32> to vector<4x8xf32>
    %191 = vector.shape_cast %190 : vector<4x8xf32> to vector<4x8x1xf32>
    %192 = tpu.reciprocal %191 {approx = true} : vector<4x8x1xf32> -> vector<4x8x1xf32>
    %193 = vector.broadcast %192 : vector<4x8x1xf32> to vector<4x8x8xf32>
    %194 = arith.mulf %189, %193 : vector<4x8x8xf32>
    %195 = arith.truncf %194 : vector<4x8x8xf32> to vector<4x8x8xbf16>
    "tpu.trace_start"() <{level = 10 : i32, message = "hqk,khd->hqd"}> : () -> ()
    %cst_78 = arith.constant dense<0.000000e+00> : vector<4x8x16xf32>
    %196 = tpu.matmul %195, %181, %cst_78 {dimension_numbers = #tpu.dot_dimension_numbers<[2], [0], [1], [2], [0, 0, 0, 1, 1, 2], [0], [1]>} : vector<4x8x8xbf16>, vector<8x4x16xbf16>, vector<4x8x16xf32> -> vector<4x8x16xf32>
    "tpu.trace_stop"() : () -> ()
    %197 = tpu.transpose %196, [1, 0, 2] : vector<4x8x16xf32> -> vector<8x4x16xf32>
    %198 = vector.shape_cast %197 : vector<8x4x16xf32> to vector<8x64xf32>
    %c0_79 = arith.constant 0 : index
    %c0_80 = arith.constant 0 : index
    %199 = vector.load %arg24[%c0_79, %c0_80] : memref<64x64xf32, #tpu.memory_space<vmem>>, vector<64x64xf32>
    %200 = arith.truncf %198 : vector<8x64xf32> to vector<8x64xbf16>
    %201 = arith.truncf %199 : vector<64x64xf32> to vector<64x64xbf16>
    %cst_81 = arith.constant dense<0.000000e+00> : vector<8x64xf32>
    %202 = tpu.matmul %200, %201, %cst_81 {dimension_numbers = #tpu.dot_dimension_numbers<[1], [0], [0], [1], [0, 0, 1, 1], [], []>} : vector<8x64xbf16>, vector<64x64xbf16>, vector<8x64xf32> -> vector<8x64xf32>
    %203 = arith.addf %152, %202 : vector<8x64xf32>
    %204 = arith.mulf %203, %203 : vector<8x64xf32>
    %cst_82 = arith.constant dense<0.000000e+00> : vector<8xf32>
    %205 = vector.multi_reduction <add>, %204, %cst_82 [1] : vector<8x64xf32> to vector<8xf32>
    %206 = vector.shape_cast %205 : vector<8xf32> to vector<8x1xf32>
    %cst_83 = arith.constant 6.400000e+01 : f32
    %207 = vector.broadcast %cst_83 : f32 to vector<8x1xf32>
    %208 = arith.divf %206, %207 : vector<8x1xf32>
    %cst_84 = arith.constant 9.99999997E-7 : f32
    %209 = vector.broadcast %cst_84 : f32 to vector<8x1xf32>
    %210 = arith.addf %208, %209 : vector<8x1xf32>
    %211 = math.rsqrt %210 : vector<8x1xf32>
    %212 = vector.broadcast %211 : vector<8x1xf32> to vector<8x64xf32>
    %213 = arith.mulf %203, %212 : vector<8x64xf32>
    %c0_85 = arith.constant 0 : index
    %c0_86 = arith.constant 0 : index
    %214 = vector.load %arg18[%c0_85, %c0_86] : memref<1x64xf32, #tpu.memory_space<vmem>>, vector<1x64xf32>
    %215 = vector.broadcast %214 : vector<1x64xf32> to vector<8x64xf32>
    %216 = arith.mulf %213, %215 : vector<8x64xf32>
    %c0_87 = arith.constant 0 : index
    %c0_88 = arith.constant 0 : index
    %217 = vector.load %arg25[%c0_87, %c0_88] : memref<64x128xf32, #tpu.memory_space<vmem>>, vector<64x128xf32>
    %218 = arith.truncf %216 : vector<8x64xf32> to vector<8x64xbf16>
    %219 = arith.truncf %217 : vector<64x128xf32> to vector<64x128xbf16>
    %cst_89 = arith.constant dense<0.000000e+00> : vector<8x128xf32>
    %220 = tpu.matmul %218, %219, %cst_89 {dimension_numbers = #tpu.dot_dimension_numbers<[1], [0], [0], [1], [0, 0, 1, 1], [], []>} : vector<8x64xbf16>, vector<64x128xbf16>, vector<8x128xf32> -> vector<8x128xf32>
    %cst_90 = arith.constant 0.000000e+00 : f32
    %221 = vector.broadcast %cst_90 : f32 to vector<8x128xf32>
    %222 = arith.maximumf %220, %221 : vector<8x128xf32>
    %c0_91 = arith.constant 0 : index
    %c0_92 = arith.constant 0 : index
    %223 = vector.load %arg26[%c0_91, %c0_92] : memref<128x64xf32, #tpu.memory_space<vmem>>, vector<128x64xf32>
    %224 = arith.truncf %222 : vector<8x128xf32> to vector<8x128xbf16>
    %225 = arith.truncf %223 : vector<128x64xf32> to vector<128x64xbf16>
    %cst_93 = arith.constant dense<0.000000e+00> : vector<8x64xf32>
    %226 = tpu.matmul %224, %225, %cst_93 {dimension_numbers = #tpu.dot_dimension_numbers<[1], [0], [0], [1], [0, 0, 1, 1], [], []>} : vector<8x128xbf16>, vector<128x64xbf16>, vector<8x64xf32> -> vector<8x64xf32>
    %227 = arith.addf %203, %226 : vector<8x64xf32>
    %228 = arith.mulf %227, %227 : vector<8x64xf32>
    %cst_94 = arith.constant dense<0.000000e+00> : vector<8xf32>
    %229 = vector.multi_reduction <add>, %228, %cst_94 [1] : vector<8x64xf32> to vector<8xf32>
    %230 = vector.shape_cast %229 : vector<8xf32> to vector<8x1xf32>
    %cst_95 = arith.constant 6.400000e+01 : f32
    %231 = vector.broadcast %cst_95 : f32 to vector<8x1xf32>
    %232 = arith.divf %230, %231 : vector<8x1xf32>
    %cst_96 = arith.constant 9.99999997E-7 : f32
    %233 = vector.broadcast %cst_96 : f32 to vector<8x1xf32>
    %234 = arith.addf %232, %233 : vector<8x1xf32>
    %235 = math.rsqrt %234 : vector<8x1xf32>
    %236 = vector.broadcast %235 : vector<8x1xf32> to vector<8x64xf32>
    %237 = arith.mulf %227, %236 : vector<8x64xf32>
    %c0_97 = arith.constant 0 : index
    %c0_98 = arith.constant 0 : index
    %238 = vector.load %arg19[%c0_97, %c0_98] : memref<1x64xf32, #tpu.memory_space<vmem>>, vector<1x64xf32>
    %239 = vector.broadcast %238 : vector<1x64xf32> to vector<8x64xf32>
    %240 = arith.mulf %237, %239 : vector<8x64xf32>
    %cst_99 = arith.constant 1.250000e-01 : f32
    %241 = vector.broadcast %cst_99 : f32 to vector<8x64xf32>
    %242 = arith.mulf %240, %241 : vector<8x64xf32>
    %c0_100 = arith.constant 0 : index
    %c0_101 = arith.constant 0 : index
    %243 = vector.load %arg6[%c0_100, %c0_101] : memref<64x256xf32, #tpu.memory_space<vmem>>, vector<64x256xf32>
    %244 = arith.truncf %242 : vector<8x64xf32> to vector<8x64xbf16>
    %245 = arith.truncf %243 : vector<64x256xf32> to vector<64x256xbf16>
    %cst_102 = arith.constant dense<0.000000e+00> : vector<8x256xf32>
    %246 = tpu.matmul %244, %245, %cst_102 {dimension_numbers = #tpu.dot_dimension_numbers<[1], [0], [0], [1], [0, 0, 1, 1], [], []>} : vector<8x64xbf16>, vector<64x256xbf16>, vector<8x256xf32> -> vector<8x256xf32>
    %247 = vector.shape_cast %246 : vector<8x256xf32> to vector<1x8x256xf32>
    %c0_103 = arith.constant 0 : index
    %c0_104 = arith.constant 0 : index
    %c0_105 = arith.constant 0 : index
    %248 = vector.load %arg27[%c0_103, %c0_104, %c0_105] : memref<1x8x256xf32, #tpu.memory_space<vmem>>, vector<1x8x256xf32>
    tpu.vector_store %arg27[%c0_103, %c0_104, %c0_105], %247 {strides = array<i32>} : memref<1x8x256xf32, #tpu.memory_space<vmem>>, vector<1x8x256xf32>,
    %c0_106 = arith.constant 0 : index
    %c0_107 = arith.constant 0 : index
    %c0_108 = arith.constant 0 : index
    %249 = vector.load %arg3[%c0_106, %c0_107, %c0_108] : memref<1x8x1xi32, #tpu.memory_space<vmem>>, vector<1x8x1xi32>
    %250 = vector.shape_cast %249 : vector<1x8x1xi32> to vector<8x1xi32>
    %cst_109 = arith.constant dense<0xFF800000> : vector<8xf32>
    %251 = vector.multi_reduction <maximumf>, %246, %cst_109 [1] : vector<8x256xf32> to vector<8xf32>
    %252 = vector.shape_cast %251 : vector<8xf32> to vector<8x1xf32>
    %253 = vector.broadcast %252 : vector<8x1xf32> to vector<8x256xf32>
    %254 = arith.subf %246, %253 : vector<8x256xf32>
    %255 = math.exp %254 : vector<8x256xf32>
    %cst_110 = arith.constant dense<0.000000e+00> : vector<8xf32>
    %256 = vector.multi_reduction <add>, %255, %cst_110 [1] : vector<8x256xf32> to vector<8xf32>
    %257 = vector.shape_cast %256 : vector<8xf32> to vector<8x1xf32>
    %258 = math.log %257 : vector<8x1xf32>
    %259 = arith.addf %258, %252 : vector<8x1xf32>
    %260 = tpu.iota {dimensions = array<i32: 1>} : vector<8x256xi32>
    %261 = vector.broadcast %250 : vector<8x1xi32> to vector<8x256xi32>
    %262 = arith.cmpi eq, %260, %261 : vector<8x256xi32>
    %263 = arith.extui %262 : vector<8x256xi1> to vector<8x256xi32>
    %264 = arith.sitofp %263 : vector<8x256xi32> to vector<8x256xf32>
    %265 = arith.mulf %246, %264 : vector<8x256xf32>
    %cst_111 = arith.constant dense<0.000000e+00> : vector<8xf32>
    %266 = vector.multi_reduction <add>, %265, %cst_111 [1] : vector<8x256xf32> to vector<8xf32>
    %267 = vector.shape_cast %266 : vector<8xf32> to vector<8x1xf32>
    %c-100_i32 = arith.constant -100 : i32
    %268 = vector.broadcast %c-100_i32 : i32 to vector<8x1xi32>
    %269 = arith.cmpi ne, %250, %268 : vector<8x1xi32>
    %270 = arith.extui %269 : vector<8x1xi1> to vector<8x1xi32>
    %271 = arith.sitofp %270 : vector<8x1xi32> to vector<8x1xf32>
    %272 = arith.subf %259, %267 : vector<8x1xf32>
    %273 = arith.mulf %272, %271 : vector<8x1xf32>
    %274 = tpu.iota {dimensions = array<i32: 0>} : vector<8x1xi32>
    %c3_i32 = arith.constant 3 : i32
    %275 = vector.broadcast %c3_i32 : i32 to vector<8x1xi32>
    %276 = arith.cmpi slt, %274, %275 : vector<8x1xi32>
    %277 = arith.extui %276 : vector<8x1xi1> to vector<8x1xi32>
    %278 = arith.sitofp %277 : vector<8x1xi32> to vector<8x1xf32>
    %cst_112 = arith.constant 1.000000e+00 : f32
    %279 = vector.broadcast %cst_112 : f32 to vector<8x1xf32>
    %280 = arith.subf %279, %278 : vector<8x1xf32>
    %281 = arith.mulf %273, %278 : vector<8x1xf32>
    %cst_113 = arith.constant dense<0.000000e+00> : vector<1xf32>
    %282 = vector.multi_reduction <add>, %281, %cst_113 [0] : vector<8x1xf32> to vector<1xf32>
    %283 = vector.shape_cast %282 : vector<1xf32> to vector<1x1xf32>
    %284 = arith.mulf %271, %278 : vector<8x1xf32>
    %cst_114 = arith.constant dense<0.000000e+00> : vector<1xf32>
    %285 = vector.multi_reduction <add>, %284, %cst_114 [0] : vector<8x1xf32> to vector<1xf32>
    %286 = vector.shape_cast %285 : vector<1xf32> to vector<1x1xf32>
    %287 = arith.mulf %273, %280 : vector<8x1xf32>
    %cst_115 = arith.constant dense<0.000000e+00> : vector<1xf32>
    %288 = vector.multi_reduction <add>, %287, %cst_115 [0] : vector<8x1xf32> to vector<1xf32>
    %289 = vector.shape_cast %288 : vector<1xf32> to vector<1x1xf32>
    %290 = arith.mulf %271, %280 : vector<8x1xf32>
    %cst_116 = arith.constant dense<0.000000e+00> : vector<1xf32>
    %291 = vector.multi_reduction <add>, %290, %cst_116 [0] : vector<8x1xf32> to vector<1xf32>
    %292 = vector.shape_cast %291 : vector<1xf32> to vector<1x1xf32>
    %293 = tpu.iota {dimensions = array<i32: 1>} : vector<1x4xi32>
    %c0_i32 = arith.constant 0 : i32
    %294 = vector.broadcast %c0_i32 : i32 to vector<1x4xi32>
    %295 = arith.cmpi eq, %293, %294 : vector<1x4xi32>
    %cst_117 = arith.constant 0.000000e+00 : f32
    %296 = vector.shape_cast %283 : vector<1x1xf32> to vector<1x1xf32>
    %297 = vector.broadcast %296 : vector<1x1xf32> to vector<1x4xf32>
    %298 = vector.broadcast %cst_117 : f32 to vector<1x4xf32>
    %299 = arith.select %295, %297, %298 : vector<1x4xi1>, vector<1x4xf32>
    %c1_i32 = arith.constant 1 : i32
    %300 = vector.broadcast %c1_i32 : i32 to vector<1x4xi32>
    %301 = arith.cmpi eq, %293, %300 : vector<1x4xi32>
    %cst_118 = arith.constant 0.000000e+00 : f32
    %302 = vector.shape_cast %286 : vector<1x1xf32> to vector<1x1xf32>
    %303 = vector.broadcast %302 : vector<1x1xf32> to vector<1x4xf32>
    %304 = vector.broadcast %cst_118 : f32 to vector<1x4xf32>
    %305 = arith.select %301, %303, %304 : vector<1x4xi1>, vector<1x4xf32>
    %306 = arith.addf %299, %305 : vector<1x4xf32>
    %c2_i32 = arith.constant 2 : i32
    %307 = vector.broadcast %c2_i32 : i32 to vector<1x4xi32>
    %308 = arith.cmpi eq, %293, %307 : vector<1x4xi32>
    %cst_119 = arith.constant 0.000000e+00 : f32
    %309 = vector.shape_cast %289 : vector<1x1xf32> to vector<1x1xf32>
    %310 = vector.broadcast %309 : vector<1x1xf32> to vector<1x4xf32>
    %311 = vector.broadcast %cst_119 : f32 to vector<1x4xf32>
    %312 = arith.select %308, %310, %311 : vector<1x4xi1>, vector<1x4xf32>
    %313 = arith.addf %306, %312 : vector<1x4xf32>
    %c3_i32_120 = arith.constant 3 : i32
    %314 = vector.broadcast %c3_i32_120 : i32 to vector<1x4xi32>
    %315 = arith.cmpi eq, %293, %314 : vector<1x4xi32>
    %cst_121 = arith.constant 0.000000e+00 : f32
    %316 = vector.shape_cast %292 : vector<1x1xf32> to vector<1x1xf32>
    %317 = vector.broadcast %316 : vector<1x1xf32> to vector<1x4xf32>
    %318 = vector.broadcast %cst_121 : f32 to vector<1x4xf32>
    %319 = arith.select %315, %317, %318 : vector<1x4xi1>, vector<1x4xf32>
    %320 = arith.addf %313, %319 : vector<1x4xf32>
    %321 = vector.shape_cast %320 : vector<1x4xf32> to vector<1x1x4xf32>
    %c0_122 = arith.constant 0 : index
    %c0_123 = arith.constant 0 : index
    %c0_124 = arith.constant 0 : index
    %322 = vector.load %arg28[%c0_122, %c0_123, %c0_124] : memref<1x1x4xf32, #tpu.memory_space<vmem>>, vector<1x1x4xf32>
    tpu.vector_store %arg28[%c0_122, %c0_123, %c0_124], %321 {strides = array<i32>} : memref<1x1x4xf32, #tpu.memory_space<vmem>>, vector<1x1x4xf32>,
    return
  }
  func.func @transform_0(%arg0: i32) -> (i32, i32, i32) {
    %c0_i32 = arith.constant 0 : i32
    %c0_i32_0 = arith.constant 0 : i32
    %c0_i32_1 = arith.constant 0 : i32
    return %arg0, %c0_i32, %c0_i32_0 : i32, i32, i32
  }
  func.func @transform_1(%arg0: i32) -> (i32, i32, i32) {
    %c0_i32 = arith.constant 0 : i32
    %c0_i32_0 = arith.constant 0 : i32
    %c0_i32_1 = arith.constant 0 : i32
    return %arg0, %c0_i32, %c0_i32_0 : i32, i32, i32
  }
  func.func @transform_2(%arg0: i32) -> (i32, i32, i32) {
    %c0_i32 = arith.constant 0 : i32
    %c0_i32_0 = arith.constant 0 : i32
    %c0_i32_1 = arith.constant 0 : i32
    return %arg0, %c0_i32, %c0_i32_0 : i32, i32, i32
  }
  func.func @transform_3(%arg0: i32) -> (i32, i32, i32) {
    %c0_i32 = arith.constant 0 : i32
    %c0_i32_0 = arith.constant 0 : i32
    %c0_i32_1 = arith.constant 0 : i32
    return %arg0, %c0_i32, %c0_i32_0 : i32, i32, i32
  }
  func.func @transform_4(%arg0: i32) -> (i32, i32) {
    %c0_i32 = arith.constant 0 : i32
    %c0_i32_0 = arith.constant 0 : i32
    %c0_i32_1 = arith.constant 0 : i32
    return %c0_i32, %c0_i32_0 : i32, i32
  }
  func.func @transform_5(%arg0: i32) -> (i32, i32) {
    %c0_i32 = arith.constant 0 : i32
    %c0_i32_0 = arith.constant 0 : i32
    %c0_i32_1 = arith.constant 0 : i32
    return %c0_i32, %c0_i32_0 : i32, i32
  }
  func.func @transform_6(%arg0: i32) -> (i32, i32, i32) {
    %c0_i32 = arith.constant 0 : i32
    %c0_i32_0 = arith.constant 0 : i32
    %c0_i32_1 = arith.constant 0 : i32
    %c0_i32_2 = arith.constant 0 : i32
    return %c0_i32, %c0_i32_0, %c0_i32_1 : i32, i32, i32
  }
  func.func @transform_7(%arg0: i32) -> (i32, i32, i32) {
    %c0_i32 = arith.constant 0 : i32
    %c0_i32_0 = arith.constant 0 : i32
    %c0_i32_1 = arith.constant 0 : i32
    %c0_i32_2 = arith.constant 0 : i32
    return %c0_i32, %c0_i32_0, %c0_i32_1 : i32, i32, i32
  }
  func.func @transform_8(%arg0: i32) -> (i32, i32) {
    %c0_i32 = arith.constant 0 : i32
    %c0_i32_0 = arith.constant 0 : i32
    %c0_i32_1 = arith.constant 0 : i32
    return %c0_i32, %c0_i32_0 : i32, i32
  }
  func.func @transform_9(%arg0: i32) -> (i32, i32) {
    %c0_i32 = arith.constant 0 : i32
    %c0_i32_0 = arith.constant 0 : i32
    %c0_i32_1 = arith.constant 0 : i32
    return %c0_i32, %c0_i32_0 : i32, i32
  }
  func.func @transform_10(%arg0: i32) -> (i32, i32) {
    %c0_i32 = arith.constant 0 : i32
    %c0_i32_0 = arith.constant 0 : i32
    %c0_i32_1 = arith.constant 0 : i32
    return %c0_i32, %c0_i32_0 : i32, i32
  }
  func.func @transform_11(%arg0: i32) -> (i32, i32) {
    %c0_i32 = arith.constant 0 : i32
    %c0_i32_0 = arith.constant 0 : i32
    %c0_i32_1 = arith.constant 0 : i32
    return %c0_i32, %c0_i32_0 : i32, i32
  }
  func.func @transform_12(%arg0: i32) -> (i32, i32) {
    %c0_i32 = arith.constant 0 : i32
    %c0_i32_0 = arith.constant 0 : i32
    %c0_i32_1 = arith.constant 0 : i32
    return %c0_i32, %c0_i32_0 : i32, i32
  }
  func.func @transform_13(%arg0: i32) -> (i32, i32) {
    %c0_i32 = arith.constant 0 : i32
    %c0_i32_0 = arith.constant 0 : i32
    %c0_i32_1 = arith.constant 0 : i32
    return %c0_i32, %c0_i32_0 : i32, i32
  }
  func.func @transform_14(%arg0: i32) -> (i32, i32) {
    %c0_i32 = arith.constant 0 : i32
    %c0_i32_0 = arith.constant 0 : i32
    %c0_i32_1 = arith.constant 0 : i32
    return %c0_i32, %c0_i32_0 : i32, i32
  }
  func.func @transform_15(%arg0: i32) -> (i32, i32) {
    %c0_i32 = arith.constant 0 : i32
    %c0_i32_0 = arith.constant 0 : i32
    %c0_i32_1 = arith.constant 0 : i32
    return %c0_i32, %c0_i32_0 : i32, i32
  }
  func.func @transform_16(%arg0: i32) -> (i32, i32) {
    %c0_i32 = arith.constant 0 : i32
    %c0_i32_0 = arith.constant 0 : i32
    %c0_i32_1 = arith.constant 0 : i32
    return %c0_i32, %c0_i32_0 : i32, i32
  }
  func.func @transform_17(%arg0: i32) -> (i32, i32) {
    %c0_i32 = arith.constant 0 : i32
    %c0_i32_0 = arith.constant 0 : i32
    %c0_i32_1 = arith.constant 0 : i32
    return %c0_i32, %c0_i32_0 : i32, i32
  }
  func.func @transform_18(%arg0: i32) -> (i32, i32) {
    %c0_i32 = arith.constant 0 : i32
    %c0_i32_0 = arith.constant 0 : i32
    %c0_i32_1 = arith.constant 0 : i32
    return %c0_i32, %c0_i32_0 : i32, i32
  }
  func.func @transform_19(%arg0: i32) -> (i32, i32) {
    %c0_i32 = arith.constant 0 : i32
    %c0_i32_0 = arith.constant 0 : i32
    %c0_i32_1 = arith.constant 0 : i32
    return %c0_i32, %c0_i32_0 : i32, i32
  }
  func.func @transform_20(%arg0: i32) -> (i32, i32) {
    %c0_i32 = arith.constant 0 : i32
    %c0_i32_0 = arith.constant 0 : i32
    %c0_i32_1 = arith.constant 0 : i32
    return %c0_i32, %c0_i32_0 : i32, i32
  }
  func.func @transform_21(%arg0: i32) -> (i32, i32) {
    %c0_i32 = arith.constant 0 : i32
    %c0_i32_0 = arith.constant 0 : i32
    %c0_i32_1 = arith.constant 0 : i32
    return %c0_i32, %c0_i32_0 : i32, i32
  }
  func.func @transform_22(%arg0: i32) -> (i32, i32) {
    %c0_i32 = arith.constant 0 : i32
    %c0_i32_0 = arith.constant 0 : i32
    %c0_i32_1 = arith.constant 0 : i32
    return %c0_i32, %c0_i32_0 : i32, i32
  }
  func.func @transform_23(%arg0: i32) -> (i32, i32) {
    %c0_i32 = arith.constant 0 : i32
    %c0_i32_0 = arith.constant 0 : i32
    %c0_i32_1 = arith.constant 0 : i32
    return %c0_i32, %c0_i32_0 : i32, i32
  }
  func.func @transform_24(%arg0: i32) -> (i32, i32) {
    %c0_i32 = arith.constant 0 : i32
    %c0_i32_0 = arith.constant 0 : i32
    %c0_i32_1 = arith.constant 0 : i32
    return %c0_i32, %c0_i32_0 : i32, i32
  }
  func.func @transform_25(%arg0: i32) -> (i32, i32) {
    %c0_i32 = arith.constant 0 : i32
    %c0_i32_0 = arith.constant 0 : i32
    %c0_i32_1 = arith.constant 0 : i32
    return %c0_i32, %c0_i32_0 : i32, i32
  }
  func.func @transform_26(%arg0: i32) -> (i32, i32, i32) {
    %c0_i32 = arith.constant 0 : i32
    %c0_i32_0 = arith.constant 0 : i32
    %c0_i32_1 = arith.constant 0 : i32
    return %arg0, %c0_i32, %c0_i32_0 : i32, i32, i32
  }
  func.func @transform_27(%arg0: i32) -> (i32, i32, i32) {
    %c0_i32 = arith.constant 0 : i32
    %c0_i32_0 = arith.constant 0 : i32
    %c0_i32_1 = arith.constant 0 : i32
    return %arg0, %c0_i32, %c0_i32_0 : i32, i32, i32
  }
}

</mosaic_0001>

<bundles_post_ra>
// kernel: t5_text_model_forward.1
= control target key start
LH: loop header
LB: loop body
LE: loop exit
PB: predicated region body
PF: predicated region fallthrough
CT: control target
= control target key end

     0   :  { %s11485_s0 = inlined_call_operand.hbm [shape: s32[2,8,1], index: 0, kind: input, shape index: {}]   ;;  %s11486_s1 = inlined_call_operand.hbm [shape: s32[2,8,1], index: 1, kind: input, shape index: {}]   ;;  %s11487_s2 = inlined_call_operand.hbm [shape: s32[2,8,1], index: 2, kind: input, shape index: {}]   ;;  %s11488_s3 = inlined_call_operand.hbm [shape: f32[2,1,8], index: 3, kind: input, shape index: {}]   ;;  %s11489_s4 = inlined_call_operand.hbm [shape: f32[256,64], index: 4, kind: input, shape index: {}]   ;;  %s11490_s5 = inlined_call_operand.hbm [shape: f32[64,256], index: 5, kind: input, shape index: {}]   ;;  %s11491_s6 = inlined_call_operand.hbm [shape: f32[4,8,8], index: 6, kind: input, shape index: {}]   ;;  %s11492_s7 = inlined_call_operand.hbm [shape: f32[4,8,8], index: 7, kind: input, shape index: {}]   ;;  %s11493_s8 = inlined_call_operand.hbm [shape: f32[1,64], index: 8, kind: input, shape index: {}]   ;;  %s11494_s9 = inlined_call_operand.hbm [shape: f32[1,64], index: 9, kind: input, shape index: {}]   ;;  %s11495_s10 = inlined_call_operand.hbm [shape: f32[1,64], index: 10, kind: input, shape index: {}]   ;;  %s11496_s11 = inlined_call_operand.hbm [shape: f32[64,192], index: 11, kind: input, shape index: {}]   ;;  %s11497_s12 = inlined_call_operand.hbm [shape: f32[64,64], index: 12, kind: input, shape index: {}]   ;;  %s11498_s13 = inlined_call_operand.hbm [shape: f32[64,128], index: 13, kind: input, shape index: {}]   ;;  %s11499_s14 = inlined_call_operand.hbm [shape: f32[128,64], index: 14, kind: input, shape index: {}]   ;;  %s11500_s15 = inlined_call_operand.hbm [shape: f32[1,64], index: 15, kind: input, shape index: {}]   ;;  %s11501_s16 = inlined_call_operand.hbm [shape: f32[1,64], index: 16, kind: input, shape index: {}]   ;;  %s11502_s17 = inlined_call_operand.hbm [shape: f32[1,64], index: 17, kind: input, shape index: {}]   ;;  %s11503_s18 = inlined_call_operand.hbm [shape: f32[1,64], index: 18, kind: input, shape index: {}]   ;;  %s11504_s19 = inlined_call_operand.hbm [shape: f32[64,192], index: 19, kind: input, shape index: {}]   ;;  %s11505_s20 = inlined_call_operand.hbm [shape: f32[64,64], index: 20, kind: input, shape index: {}]   ;;  %s11506_s21 = inlined_call_operand.hbm [shape: f32[64,64], index: 21, kind: input, shape index: {}]   ;;  %s11507_s22 = inlined_call_operand.hbm [shape: f32[64,128], index: 22, kind: input, shape index: {}]   ;;  %s11508_s23 = inlined_call_operand.hbm [shape: f32[64,64], index: 23, kind: input, shape index: {}]   ;;  %s11509_s24 = inlined_call_operand.hbm [shape: f32[64,128], index: 24, kind: input, shape index: {}]   ;;  %s11510_s25 = inlined_call_operand.hbm [shape: f32[128,64], index: 25, kind: input, shape index: {}]   ;;  %s11511_s26 = inlined_call_operand.hbm [shape: f32[2,8,256], index: 26, kind: output, shape index: {0}]   ;;  %s11512_s27 = inlined_call_operand.hbm [shape: f32[2,1,4], index: 27, kind: output, shape index: {1}]  }
   0x1   :  { %11577 = sst [smem:[#allocation69_spill]] %s11485_s0 }
   0x2   :  { %11578 = sst [smem:[#allocation70_spill]] %s11486_s1 }
   0x3   :  { %11579 = sst [smem:[#allocation71_spill]] %s11487_s2 }
   0x4   :  { %11580 = sst [smem:[#allocation72_spill]] %s11488_s3 }
   0x5   :  { %11581 = sst [smem:[#allocation73_spill]] %s11489_s4 }
   0x6   :  { %11582 = sst [smem:[#allocation74_spill]] %s11490_s5 }
   0x7   :  { %11583 = sst [smem:[#allocation75_spill]] %s11491_s6 }
   0x8   :  { %11584 = sst [smem:[#allocation76_spill]] %s11492_s7 }
   0x9   :  { %11585 = sst [smem:[#allocation77_spill]] %s11493_s8 }
   0xa   :  { %11586 = sst [smem:[#allocation78_spill]] %s11494_s9 }
   0xb   :  { %11587 = sst [smem:[#allocation79_spill]] %s11495_s10 }
   0xc   :  { %11588 = sst [smem:[#allocation80_spill]] %s11496_s11 }
   0xd   :  { %11589 = sst [smem:[#allocation81_spill]] %s11497_s12 }
   0xe   :  { %11590 = sst [smem:[#allocation82_spill]] %s11498_s13 }
   0xf   :  { %11591 = sst [smem:[#allocation83_spill]] %s11499_s14 }
  0x10   :  { %11592 = sst [smem:[#allocation84_spill]] %s11500_s15 }
  0x11   :  { %11593 = sst [smem:[#allocation85_spill]] %s11501_s16 }
  0x12   :  { %11594 = sst [smem:[#allocation86_spill]] %s11502_s17 }
  0x13   :  { %11595 = sst [smem:[#allocation87_spill]] %s11503_s18 }
  0x14   :  { %11596 = sst [smem:[#allocation88_spill]] %s11504_s19 }
  0x15   :  { %11597 = sst [smem:[#allocation89_spill]] %s11505_s20 }
  0x16   :  { %11598 = sst [smem:[#allocation90_spill]] %s11506_s21 }
  0x17   :  { %11599 = sst [smem:[#allocation91_spill]] %s11507_s22 }
  0x18   :  { %11600 = sst [smem:[#allocation92_spill]] %s11508_s23 }
  0x19   :  { %11601 = sst [smem:[#allocation93_spill]] %s11509_s24 }
  0x1a   :  { %11602 = sst [smem:[#allocation94_spill]] %s11510_s25 }
  0x1b   :  { %11603 = sst [smem:[#allocation95_spill]] %s11511_s26 }
  0x1c   :  { %11604 = sst [smem:[#allocation96_spill]] %s11512_s27 }
  0x1d   :  { %33 = vsyncpa [#allocation3], 0 }
  0x1e   :  { %35 = vsyncpa [#allocation3 + $0x1], 0 }
  0x1f   :  { %36 = vsyncpa [#allocation6], 0 }
  0x20   :  { %38 = vsyncpa [#allocation6 + $0x1], 0 }
  0x21   :  { %39 = vsyncpa [#allocation9], 0 }
  0x22   :  { %41 = vsyncpa [#allocation9 + $0x1], 0 }
  0x23   :  { %42 = vsyncpa [#allocation12], 0 }
  0x24   :  { %43 = vsyncpa [#allocation15], 0 }
  0x25   :  { %44 = vsyncpa [#allocation18], 0 }
  0x26   :  { %45 = vsyncpa [#allocation21], 0 }
  0x27   :  { %46 = vsyncpa [#allocation24], 0 }
  0x28   :  { %47 = vsyncpa [#allocation27], 0 }
  0x29   :  { %48 = vsyncpa [#allocation30], 0 }
  0x2a   :  { %49 = vsyncpa [#allocation33], 0 }
  0x2b   :  { %50 = vsyncpa [#allocation36], 0 }
  0x2c   :  { %51 = vsyncpa [#allocation39], 0 }
  0x2d   :  { %52 = vsyncpa [#allocation42], 0 }
  0x2e   :  { %53 = vsyncpa [#allocation4], 0 }
  0x2f   :  { %55 = vsyncpa [#allocation4 + $0x1], 0 }
  0x30   :  { %56 = vsyncpa [#allocation45], 0 }
  0x31   :  { %58 = vsyncpa [#allocation45 + $0x1], 0  ;;  %s9762_s7 = smov 0   ;;  %s9764_s4 = smov 0  }
  0x32   :  { %s9766_s8 = smov 0   ;;  %s9768_s30 = smov 0  }
  0x33 LB: > { %11605 = sst [smem:[#allocation63_spill]] %s9563_s7  ;;  %s9577_s9 = smov [#allocation10]   ;;  %s9575_s30 = sphi %s9768_s30, %s11693_s30   ;;  %s9571_s8 = sphi %s9766_s8, %s11695_s8   ;;  %s9567_s4 = sphi %s9764_s4, %s11697_s4   ;;  %s9563_s7 = sphi %s9762_s7, %s11696_s7  }
  0x34   : > { %11606 = sst [smem:[#allocation64_spill]] %s9571_s8  ;;  %s699_s5 = sshll.u32 %s9577_s9, 4  ;;  %s9788_s5 = int_to_ptr.vmem [resolvable:$true] %s699_s5 }
  0x35   : > { %s9783_s28 = sadd.s32 4294967295, %s9575_s30   ;;  %p7658_p0 = scmp.ge.s32.totalorder %s9575_s30, 1 }
  0x36   : > { %p11538_p1 = scmp.eq.s32.totalorder %s9783_s28, 0  ;;  %p687_p2 = scmp.lt.s32.totalorder %s9575_s30, 3 }
  0x37   : > { %s9578_s10 = smov [#allocation11]   ;;  %s9579_s6 = smov [#allocation14]  }
  0x38   : > { %p9790_p3 = pnand %p7658_p0, %p687_p2  ;;  %s712_s29 = sshll.u32 %s9578_s10, 4  ;;  %s9803_s29 = int_to_ptr.vmem [resolvable:$true] %s712_s29 }
  0x39   : > { %s9805_s11 = sshll.u32 %s9579_s6, 4  ;;  %s11610_s9 = sld [smem:[#allocation73_spill]]  ;;  %s739_s11 = int_to_ptr.vmem [resolvable:$true] %s9805_s11 }
  0x3a   : > { %s11607_s0 = scalar_select %p9790_p3, 1, 0 }
  0x3b   : > { %p8410_p5 = pneg %p9790_p3 }
  0x3c   : > { %11608 = sst [smem:[#allocation65_spill]] %s11607_s0 }
  0x3d   : > { %p9799_p6 = pnand %p8410_p5, %p11538_p1 }
  0x3f   : > { %s11609_s1 = scalar_select %p9799_p6, 1, 0 }
  0x40   : > { %s8685_s27 = scalar_lea.hbm %s11610_s9, 4096  ;;  %p9815_p8 = pneg %p9799_p6 }
  0x41   : > { %p8686_p7 = scmp.ne.s32.totalorder %s11610_s9, %s8685_s27  ;;  %p8692_p11 = scmp.lt.u32.totalorder %s8685_s27, %s11610_s9 }
  0x42   : > { %s11611_s10 = scalar_select %p9815_p8, 1, 0 }
  0x43   : > { %p8688_p9 = pnand %p9815_p8, %p8686_p7 }
  0x45   : > { %p8689_p10 = pneg %p8688_p9 }
  0x47   : > { %p8694_p12 = pnand %p8692_p11, %p8689_p10 }
  0x49   : > { %8697 = shalt.err (!%p8694_p12)
}
  0x4a   : > { %s8698_s26 = scalar_lea.vmem %s9788_s5, 4096  ;;  %p8706_p5 = scmp.lt.s32.totalorder %s9788_s5, %s9788_s5 }
  0x4b   : > { %p8699_p13 = scmp.ne.s32.totalorder %s9788_s5, %s8698_s26  ;;  %p8707_p4 = scmp.lt.s32.totalorder %s8698_s26, %s8698_s26 }
  0x4d   : > { %p8701_p0 = pnand %p8699_p13, %p9815_p8  ;;  %p8708_p7 = por %p8707_p4, %p8706_p5 }
  0x4f   : > { %p8702_p2 = pneg %p8701_p0 }
  0x51   : > { %p8709_p9 = pnand %p8708_p7, %p8702_p2 }
  0x53   : > { %8712 = shalt.err (!%p8709_p9)
}
  0x54   : > { %s11534_s0 = smov 128   ;;  %s11536_s25 = smov 8  }
  0x55   : > { %8413 = dma.hbm_to_vmem [thread:$0]  (!%p9799_p6), %s11610_s9, 4096, %s9788_s5, [#allocation9], %s11534_s0, %s11534_s0, %s11536_s25  }
  0x56   : > { %s11612_s24 = sld [smem:[#allocation74_spill]] }
  0x5c   : > { %s8713_s26 = scalar_lea.hbm %s11612_s24, 2048 }
  0x5d   : > { %p8714_p4 = scmp.ne.s32.totalorder %s11612_s24, %s8713_s26  ;;  %p8720_p12 = scmp.lt.u32.totalorder %s8713_s26, %s11612_s24 }
  0x5f   : > { %p8716_p10 = pnand %p8714_p4, %p9815_p8 }
  0x61   : > { %p8717_p11 = pneg %p8716_p10 }
  0x63   : > { %p8722_p13 = pnand %p8720_p12, %p8717_p11 }
  0x65   : > { %8725 = shalt.err (!%p8722_p13)
}
  0x66   : > { %s8726_s5 = scalar_lea.vmem %s9803_s29, 2048  ;;  %p8734_p7 = scmp.lt.s32.totalorder %s9803_s29, %s9803_s29 }
  0x67   : > { %p8727_p0 = scmp.ne.s32.totalorder %s9803_s29, %s8726_s5  ;;  %p8735_p9 = scmp.lt.s32.totalorder %s8726_s5, %s8726_s5 }
  0x69   : > { %p8729_p2 = pnand %p8727_p0, %p9815_p8  ;;  %p8736_p4 = por %p8735_p9, %p8734_p7 }
  0x6b   : > { %p8730_p5 = pneg %p8729_p2 }
  0x6d   : > { %p8737_p10 = pnand %p8736_p4, %p8730_p5 }
  0x6f   : > { %8740 = shalt.err (!%p8737_p10)
}
  0x70   : > { %s11540_s20 = smov 256   ;;  %s11542_s16 = smov 16  }
  0x71   : > { %8416 = dma.hbm_to_vmem [thread:$0]  (!%p9799_p6), %s11612_s24, 2048, %s9803_s29, [#allocation12], %s11540_s20, %s11540_s20, %s11542_s16  }
  0x72   : > { %s11613_s3 = sld [smem:[#allocation76_spill]] }
  0x78   : > { %s8741_s6 = scalar_lea.hbm %s11613_s3, 512 }
  0x79   : > { %p8742_p11 = scmp.ne.s32.totalorder %s11613_s3, %s8741_s6  ;;  %p8748_p0 = scmp.lt.u32.totalorder %s8741_s6, %s11613_s3 }
  0x7b   : > { %p8744_p12 = pnand %p8742_p11, %p9815_p8 }
  0x7d   : > { %p8745_p13 = pneg %p8744_p12 }
  0x7f   : > { %p8750_p2 = pnand %p8748_p0, %p8745_p13 }
  0x81   : > { %8753 = shalt.err (!%p8750_p2)
}
  0x82   : > { %s8754_s18 = scalar_lea.vmem %s739_s11, 512  ;;  %p8762_p4 = scmp.lt.s32.totalorder %s739_s11, %s739_s11 }
  0x83   : > { %p8755_p5 = scmp.ne.s32.totalorder %s739_s11, %s8754_s18  ;;  %p8763_p10 = scmp.lt.s32.totalorder %s8754_s18, %s8754_s18 }
  0x85   : > { %p8757_p7 = pnand %p8755_p5, %p9815_p8  ;;  %p8764_p1 = por %p8763_p10, %p8762_p4 }
  0x87   : > { %p8758_p9 = pneg %p8757_p7 }
  0x89   : > { %p8765_p3 = pnand %p8764_p1, %p8758_p9 }
  0x8b   : > { %8768 = shalt.err (!%p8765_p3)
}
  0x8c   : > { %s11614_s29 = smov 8   ;;  %s11615_s22 = smov 128  }
  0x8d   : > { %8422 = dma.hbm_to_vmem [thread:$0]  (!%p9799_p6), %s11613_s3, 512, %s739_s11, [#allocation15], %s11615_s22, %s11615_s22, %s11614_s29  }
  0x8e   : > { %s9584_s27 = smov [#allocation17]   ;;  %s9585_s6 = smov [#allocation20]  }
  0x8f   : > { %s763_s2 = sshll.u32 %s9584_s27, 4  ;;  %s784_s26 = sshll.u32 %s9585_s6, 4  ;;  %s764_s2 = int_to_ptr.vmem [resolvable:$true] %s763_s2  ;;  %s785_s26 = int_to_ptr.vmem [resolvable:$true] %s784_s26 }
  0x90   : > { %s11616_s20 = sld [smem:[#allocation78_spill]] }
  0x96   : > { %s8769_s16 = scalar_lea.hbm %s11616_s20, 16 }
  0x97   : > { %p8770_p1 = scmp.ne.s32.totalorder %s11616_s20, %s8769_s16  ;;  %p8776_p12 = scmp.lt.u32.totalorder %s8769_s16, %s11616_s20 }
  0x99   : > { %p8772_p3 = pnand %p8770_p1, %p9815_p8 }
  0x9b   : > { %p8773_p11 = pneg %p8772_p3 }
  0x9d   : > { %p8778_p13 = pnand %p8776_p12, %p8773_p11 }
  0x9f   : > { %8781 = shalt.err (!%p8778_p13)
}
  0xa0   : > { %s8782_s11 = scalar_lea.vmem %s764_s2, 16  ;;  %s8789_s25 = scalar_lea.vmem %s764_s2, 32 }
  0xa1   : > { %p8783_p0 = scmp.ne.s32.totalorder %s764_s2, %s8782_s11  ;;  %p8790_p7 = scmp.lt.s32.totalorder %s764_s2, %s764_s2 }
  0xa2   : > { %p8791_p9 = scmp.lt.s32.totalorder %s8789_s25, %s8782_s11 }
  0xa3   : > { %p8785_p2 = pnand %p8783_p0, %p9815_p8 }
  0xa4   : > { %p8792_p4 = por %p8791_p9, %p8790_p7 }
  0xa5   : > { %p8786_p5 = pneg %p8785_p2 }
  0xa7   : > { %p8793_p10 = pnand %p8792_p4, %p8786_p5 }
  0xa9   : > { %8796 = shalt.err (!%p8793_p10)
}
  0xaa   : > { %8428 = dma.hbm_to_vmem [thread:$0]  (!%p9799_p6), %s11616_s20, 16, %s764_s2, [#allocation18]  }
  0xab   : > { %s11617_s27 = sld [smem:[#allocation80_spill]] }
  0xb1   : > { %s8797_s6 = scalar_lea.hbm %s11617_s27, 2048 }
  0xb2   : > { %p8798_p1 = scmp.ne.s32.totalorder %s11617_s27, %s8797_s6  ;;  %p8804_p12 = scmp.lt.u32.totalorder %s8797_s6, %s11617_s27 }
  0xb4   : > { %p8800_p3 = pnand %p8798_p1, %p9815_p8 }
  0xb6   : > { %p8801_p11 = pneg %p8800_p3 }
  0xb8   : > { %p8806_p13 = pnand %p8804_p12, %p8801_p11 }
  0xba   : > { %8809 = shalt.err (!%p8806_p13)
}
  0xbb   : > { %s8810_s25 = scalar_lea.vmem %s785_s26, 2048  ;;  %p8818_p7 = scmp.lt.s32.totalorder %s785_s26, %s785_s26 }
  0xbc   : > { %p8811_p0 = scmp.ne.s32.totalorder %s785_s26, %s8810_s25  ;;  %p8819_p9 = scmp.lt.s32.totalorder %s8810_s25, %s8810_s25 }
  0xbe   : > { %p8813_p2 = pnand %p8811_p0, %p9815_p8  ;;  %p8820_p4 = por %p8819_p9, %p8818_p7 }
  0xc0   : > { %p8814_p5 = pneg %p8813_p2 }
  0xc2   : > { %p8821_p10 = pnand %p8820_p4, %p8814_p5 }
  0xc4   : > { %8824 = shalt.err (!%p8821_p10)
}
  0xc5   : > { %s11618_s2 = smov 16   ;;  %s11619_s24 = smov 256  }
  0xc6   : > { %8434 = dma.hbm_to_vmem [thread:$0]  (!%p9799_p6), %s11617_s27, 2048, %s785_s26, [#allocation21], %s11619_s24, %s11619_s24, %s11618_s2  }
  0xc7   : > { %s9586_s16 = smov [#allocation23]   ;;  %s9587_s5 = smov [#allocation26]  }
  0xc8   : > { %s810_s6 = sshll.u32 %s9586_s16, 4  ;;  %s837_s18 = sshll.u32 %s9587_s5, 4  ;;  %s811_s6 = int_to_ptr.vmem [resolvable:$true] %s810_s6  ;;  %s838_s18 = int_to_ptr.vmem [resolvable:$true] %s837_s18 }
  0xc9   : > { %s11620_s13 = sld [smem:[#allocation82_spill]] }
  0xcf   : > { %s8825_s25 = scalar_lea.hbm %s11620_s13, 1024 }
  0xd0   : > { %p8826_p1 = scmp.ne.s32.totalorder %s11620_s13, %s8825_s25  ;;  %p8832_p12 = scmp.lt.u32.totalorder %s8825_s25, %s11620_s13 }
  0xd2   : > { %p8828_p3 = pnand %p8826_p1, %p9815_p8 }
  0xd4   : > { %p8829_p11 = pneg %p8828_p3 }
  0xd6   : > { %p8834_p13 = pnand %p8832_p12, %p8829_p11 }
  0xd8   : > { %8837 = shalt.err (!%p8834_p13)
}
  0xd9   : > { %s8838_s26 = scalar_lea.vmem %s811_s6, 1024  ;;  %p8846_p7 = scmp.lt.s32.totalorder %s811_s6, %s811_s6 }
  0xda   : > { %p8839_p0 = scmp.ne.s32.totalorder %s811_s6, %s8838_s26  ;;  %p8847_p9 = scmp.lt.s32.totalorder %s8838_s26, %s8838_s26 }
  0xdc   : > { %p8841_p2 = pnand %p8839_p0, %p9815_p8  ;;  %p8848_p4 = por %p8847_p9, %p8846_p7 }
  0xde   : > { %p8842_p5 = pneg %p8841_p2 }
  0xe0   : > { %p8849_p10 = pnand %p8848_p4, %p8842_p5 }
  0xe2   : > { %8852 = shalt.err (!%p8849_p10)
}
  0xe3   : > { %8440 = dma.hbm_to_vmem [thread:$0]  (!%p9799_p6), %s11620_s13, 1024, %s811_s6, [#allocation24], %s11615_s22, %s11615_s22, %s11614_s29  }
  0xe4   : > { %s11621_s15 = sld [smem:[#allocation84_spill]] }
  0xea   : > { %s8853_s16 = scalar_lea.hbm %s11621_s15, 16 }
  0xeb   : > { %p8854_p1 = scmp.ne.s32.totalorder %s11621_s15, %s8853_s16  ;;  %p8860_p12 = scmp.lt.u32.totalorder %s8853_s16, %s11621_s15 }
  0xed   : > { %p8856_p3 = pnand %p8854_p1, %p9815_p8 }
  0xef   : > { %p8857_p11 = pneg %p8856_p3 }
  0xf1   : > { %p8862_p13 = pnand %p8860_p12, %p8857_p11 }
  0xf3   : > { %8865 = shalt.err (!%p8862_p13)
}
  0xf4   : > { %s8866_s9 = scalar_lea.vmem %s838_s18, 16  ;;  %s8873_s6 = scalar_lea.vmem %s838_s18, 32 }
  0xf5   : > { %p8867_p0 = scmp.ne.s32.totalorder %s838_s18, %s8866_s9  ;;  %p8874_p7 = scmp.lt.s32.totalorder %s838_s18, %s838_s18 }
  0xf6   : > { %p8875_p9 = scmp.lt.s32.totalorder %s8873_s6, %s8866_s9 }
  0xf7   : > { %p8869_p2 = pnand %p8867_p0, %p9815_p8 }
  0xf8   : > { %p8876_p4 = por %p8875_p9, %p8874_p7 }
  0xf9   : > { %p8870_p5 = pneg %p8869_p2 }
  0xfb   : > { %p8877_p10 = pnand %p8876_p4, %p8870_p5 }
  0xfd   : > { %8880 = shalt.err (!%p8877_p10)
}
  0xfe   : > { %8446 = dma.hbm_to_vmem [thread:$0]  (!%p9799_p6), %s11621_s15, 16, %s838_s18, [#allocation27]  }
  0xff   : > { %s9588_s20 = smov [#allocation29]   ;;  %s9589_s14 = smov [#allocation32]  }
 0x100   : > { %s859_s3 = sshll.u32 %s9588_s20, 4  ;;  %s880_s16 = sshll.u32 %s9589_s14, 4  ;;  %s860_s3 = int_to_ptr.vmem [resolvable:$true] %s859_s3  ;;  %s881_s16 = int_to_ptr.vmem [resolvable:$true] %s880_s16 }
 0x101   : > { %s11622_s17 = sld [smem:[#allocation86_spill]] }
 0x107   : > { %s8881_s11 = scalar_lea.hbm %s11622_s17, 16 }
 0x108   : > { %p8882_p1 = scmp.ne.s32.totalorder %s11622_s17, %s8881_s11  ;;  %p8888_p12 = scmp.lt.u32.totalorder %s8881_s11, %s11622_s17 }
 0x10a   : > { %p8884_p3 = pnand %p8882_p1, %p9815_p8 }
 0x10c   : > { %p8885_p11 = pneg %p8884_p3 }
 0x10e   : > { %p8890_p13 = pnand %p8888_p12, %p8885_p11 }
 0x110   : > { %8893 = shalt.err (!%p8890_p13)
}
 0x111   : > { %s8894_s18 = scalar_lea.vmem %s860_s3, 16  ;;  %s8901_s12 = scalar_lea.vmem %s860_s3, 32 }
 0x112   : > { %p8895_p0 = scmp.ne.s32.totalorder %s860_s3, %s8894_s18  ;;  %p8902_p7 = scmp.lt.s32.totalorder %s860_s3, %s860_s3 }
 0x113   : > { %p8903_p9 = scmp.lt.s32.totalorder %s8901_s12, %s8894_s18 }
 0x114   : > { %p8897_p2 = pnand %p8895_p0, %p9815_p8 }
 0x115   : > { %p8904_p4 = por %p8903_p9, %p8902_p7 }
 0x116   : > { %p8898_p5 = pneg %p8897_p2 }
 0x118   : > { %p8905_p10 = pnand %p8904_p4, %p8898_p5 }
 0x11a   : > { %8908 = shalt.err (!%p8905_p10)
}
 0x11b   : > { %8452 = dma.hbm_to_vmem [thread:$0]  (!%p9799_p6), %s11622_s17, 16, %s860_s3, [#allocation30]  }
 0x11c   : > { %s11623_s19 = sld [smem:[#allocation88_spill]] }
 0x122   : > { %s8909_s11 = scalar_lea.hbm %s11623_s19, 2048 }
 0x123   : > { %p8910_p1 = scmp.ne.s32.totalorder %s11623_s19, %s8909_s11  ;;  %p8916_p12 = scmp.lt.u32.totalorder %s8909_s11, %s11623_s19 }
 0x125   : > { %p8912_p3 = pnand %p8910_p1, %p9815_p8 }
 0x127   : > { %p8913_p11 = pneg %p8912_p3 }
 0x129   : > { %p8918_p13 = pnand %p8916_p12, %p8913_p11 }
 0x12b   : > { %8921 = shalt.err (!%p8918_p13)
}
 0x12c   : > { %s8922_s18 = scalar_lea.vmem %s881_s16, 2048  ;;  %p8930_p7 = scmp.lt.s32.totalorder %s881_s16, %s881_s16 }
 0x12d   : > { %p8923_p0 = scmp.ne.s32.totalorder %s881_s16, %s8922_s18  ;;  %p8931_p9 = scmp.lt.s32.totalorder %s8922_s18, %s8922_s18 }
 0x12f   : > { %p8925_p2 = pnand %p8923_p0, %p9815_p8  ;;  %p8932_p4 = por %p8931_p9, %p8930_p7 }
 0x131   : > { %p8926_p5 = pneg %p8925_p2 }
 0x133   : > { %p8933_p10 = pnand %p8932_p4, %p8926_p5 }
 0x135   : > { %8936 = shalt.err (!%p8933_p10)
}
 0x136   : > { %8458 = dma.hbm_to_vmem [thread:$0]  (!%p9799_p6), %s11623_s19, 2048, %s881_s16, [#allocation33], %s11619_s24, %s11619_s24, %s11618_s2  }
 0x137   : > { %s9590_s20 = smov [#allocation35]   ;;  %s9591_s5 = smov [#allocation38]  }
 0x138   : > { %s906_s14 = sshll.u32 %s9590_s20, 4  ;;  %s932_s0 = sshll.u32 %s9591_s5, 4  ;;  %s907_s14 = int_to_ptr.vmem [resolvable:$true] %s906_s14  ;;  %s933_s0 = int_to_ptr.vmem [resolvable:$true] %s932_s0 }
 0x139   : > { %s11624_s21 = sld [smem:[#allocation90_spill]] }
 0x13f   : > { %s8937_s9 = scalar_lea.hbm %s11624_s21, 1024 }
 0x140   : > { %p8938_p1 = scmp.ne.s32.totalorder %s11624_s21, %s8937_s9  ;;  %p8944_p12 = scmp.lt.u32.totalorder %s8937_s9, %s11624_s21 }
 0x142   : > { %p8940_p3 = pnand %p8938_p1, %p9815_p8 }
 0x144   : > { %p8941_p11 = pneg %p8940_p3 }
 0x146   : > { %p8946_p13 = pnand %p8944_p12, %p8941_p11 }
 0x148   : > { %8949 = shalt.err (!%p8946_p13)
}
 0x149   : > { %s8950_s2 = scalar_lea.vmem %s907_s14, 1024  ;;  %p8958_p7 = scmp.lt.s32.totalorder %s907_s14, %s907_s14 }
 0x14a   : > { %p8951_p0 = scmp.ne.s32.totalorder %s907_s14, %s8950_s2  ;;  %p8959_p9 = scmp.lt.s32.totalorder %s8950_s2, %s8950_s2 }
 0x14c   : > { %p8953_p2 = pnand %p8951_p0, %p9815_p8  ;;  %p8960_p4 = por %p8959_p9, %p8958_p7 }
 0x14e   : > { %p8954_p5 = pneg %p8953_p2 }
 0x150   : > { %p8961_p10 = pnand %p8960_p4, %p8954_p5 }
 0x152   : > { %8964 = shalt.err (!%p8961_p10)
}
 0x153   : > { %8464 = dma.hbm_to_vmem [thread:$0]  (!%p9799_p6), %s11624_s21, 1024, %s907_s14, [#allocation36], %s11615_s22, %s11615_s22, %s11614_s29  }
 0x154   : > { %s11625_s23 = sld [smem:[#allocation92_spill]] }
 0x15a   : > { %s8965_s5 = scalar_lea.hbm %s11625_s23, 1024 }
 0x15b   : > { %p8966_p1 = scmp.ne.s32.totalorder %s11625_s23, %s8965_s5  ;;  %p8972_p12 = scmp.lt.u32.totalorder %s8965_s5, %s11625_s23 }
 0x15d   : > { %p8968_p3 = pnand %p8966_p1, %p9815_p8 }
 0x15f   : > { %p8969_p11 = pneg %p8968_p3 }
 0x161   : > { %p8974_p13 = pnand %p8972_p12, %p8969_p11 }
 0x163   : > { %8977 = shalt.err (!%p8974_p13)
}
 0x164   : > { %s8978_s26 = scalar_lea.vmem %s933_s0, 1024  ;;  %p8986_p7 = scmp.lt.s32.totalorder %s933_s0, %s933_s0 }
 0x165   : > { %p8979_p0 = scmp.ne.s32.totalorder %s933_s0, %s8978_s26  ;;  %p8987_p9 = scmp.lt.s32.totalorder %s8978_s26, %s8978_s26 }
 0x167   : > { %p8981_p2 = pnand %p8979_p0, %p9815_p8  ;;  %p8988_p4 = por %p8987_p9, %p8986_p7 }
 0x169   : > { %p8982_p5 = pneg %p8981_p2 }
 0x16b   : > { %p8989_p10 = pnand %p8988_p4, %p8982_p5 }
 0x16d   : > { %8992 = shalt.err (!%p8989_p10)
}
 0x16e   : > { %8470 = dma.hbm_to_vmem [thread:$0]  (!%p9799_p6), %s11625_s23, 1024, %s933_s0, [#allocation39], %s11615_s22, %s11615_s22, %s11614_s29  }
 0x16f   : > { %s7657_s3 = sadd.s32 4294967294, %s9575_s30   ;;  %s10048_s2 = sadd.s32 1, %s9575_s30  }
 0x170   : > { %11626 = sst [smem:[#allocation66_spill]] %s10048_s2  ;;  %s71_s24 = sadd.s32 1, %s9571_s8 }
 0x171   : > { %s68_s16 = ssub.s32 %s9575_s30, %s10048_s2  ;;  %p78_p1 = scmp.ne.s32.totalorder %s9571_s8, %s9567_s4 }
 0x172   : > { %p69_p3 = scmp.eq.s32.totalorder %s68_s16, 0  ;;  %p79_p11 = scmp.eq.s32.totalorder %s9575_s30, 0 }
 0x173   : > { %p84_p12 = scmp.ne.s32.totalorder %s9567_s4, %s9563_s7  ;;  %p648_p13 = scmp.eq.s32.totalorder %s9783_s28, 1 }
 0x174   : > { %s10060_s12 = scalar_select %p69_p3, %s9571_s8, %s71_s24  }
 0x175   : > { %p80_p0 = por %p79_p11, %p78_p1  ;;  %p11628_p2 = scmp.eq.s32.totalorder %s9783_s28, 0 }
 0x176   : > { %11627 = sst [smem:[#allocation67_spill]] %s10060_s12  ;;  %p10068_p7 = por %p648_p13, %p78_p1 }
 0x177   : > { %p10064_p5 = por %p11628_p2, %p84_p12  ;;  %p654_p9 = scmp.eq.s32.totalorder %s7657_s3, 1 }
 0x178   : > { %s11630_s20 = scalar_select %p10068_p7, 1, 0 }
 0x179   : > { %s11629_s0 = scalar_select %p10064_p5, 1, 0 }
 0x17a   : > { %p8519_p4 = scmp.lt.s32.totalorder %s9575_s30, 2  ;;  %s10074_s5 = sand.u32 1, %s9571_s8  }
 0x17b   : > { %p10076_p10 = por %p654_p9, %p84_p12  ;;  %s10081_s25 = sshll.u32 %s10074_s5, 3 }
 0x17c   : > { %s10084_s9 = sshll.u32 %s9575_s30, 7  ;;  %p10086_p3 = pnand %p8519_p4, %p80_p0 }
 0x17d   : > { %s11631_s11 = scalar_select %p10076_p10, 1, 0 }
 0x17e   : > { %s11633_s6 = scalar_select %p10086_p3, 1, 0 }
 0x17f   : > { %11632 = sst [smem:[#allocation68_spill]] %s11631_s11  ;;  %s11551_s26 = sand.u32 1, %s9575_s30  }
 0x180   : > { %s11634_s3 = sld [smem:[#allocation70_spill]]  ;;  %s994_s16 = scalar_lea.vmem [#allocation5], %s10081_s25 }
 0x181   : > { %s1001_s13 = sshll.u32 %s994_s16, 4  ;;  %s10102_s15 = scalar_lea.sflag [#allocation6], %s11551_s26  ;;  %s10098_s13 = int_to_ptr.vmem [resolvable:$true] %s1001_s13 }
 0x182   : > { %p10108_p11 = pneg %p10086_p3 }
 0x184   : > { %s11635_s19 = scalar_select %p10108_p11, 1, 0 }
 0x186   : > { %s10095_s24 = scalar_lea.hbm %s11634_s3, %s10084_s9  ;;  %s8998_s16 = scalar_lea.hbm %s11634_s3, 256 }
 0x187   : > { %s8993_s17 = scalar_lea.hbm %s10095_s24, 128  ;;  %p8999_p0 = scmp.lt.u32.totalorder %s10095_s24, %s11634_s3 }
 0x188   : > { %p8994_p1 = scmp.ne.s32.totalorder %s10095_s24, %s8993_s17  ;;  %p9000_p2 = scmp.lt.u32.totalorder %s8998_s16, %s8993_s17 }
 0x189   : > { %p9002_p4 = scmp.lt.u32.totalorder %s8993_s17, %s10095_s24 }
 0x18a   : > { %p8996_p12 = pnand %p10108_p11, %p8994_p1  ;;  %p9001_p9 = por %p9000_p2, %p8999_p0 }
 0x18c   : > { %p8997_p13 = pneg %p8996_p12  ;;  %p9003_p10 = por %p9002_p4, %p9001_p9 }
 0x18e   : > { %p9004_p7 = pnand %p9003_p10, %p8997_p13 }
 0x190   : > { %9007 = shalt.err (!%p9004_p7)
}
 0x191   : > { %s9008_s26 = scalar_lea.vmem %s10098_s13, 128  ;;  %s9592_s14 = smov [#allocation5]  }
 0x192   : > { %p9009_p1 = scmp.ne.s32.totalorder %s10098_s13, %s9008_s26  ;;  %s9013_s18 = sshll.u32 %s9592_s14, 4  ;;  %s9014_s18 = int_to_ptr.vmem [resolvable:$false] %s9013_s18 }
 0x193   : > { %s9015_s21 = scalar_lea.vmem %s9014_s18, 256  ;;  %p9016_p6 = scmp.lt.s32.totalorder %s10098_s13, %s9014_s18 }
 0x194   : > { %p9011_p12 = pnand %p9009_p1, %p10108_p11  ;;  %p9017_p8 = scmp.lt.s32.totalorder %s9015_s21, %s9008_s26 }
 0x196   : > { %p9012_p5 = pneg %p9011_p12  ;;  %p9018_p0 = por %p9017_p8, %p9016_p6 }
 0x198   : > { %p9019_p2 = pnand %p9018_p0, %p9012_p5 }
 0x19a   : > { %9022 = shalt.err (!%p9019_p2)
}
 0x19b   : > { %8483 = dma.hbm_to_vmem [thread:$0]  (!%p10086_p3), %s10095_s24, 128, %s10098_s13, %s10102_s15  }
 0x19c   : > { %s9593_s17 = smov [#allocation13]   ;;  %s9594_s16 = smov [#allocation16]  }
 0x19d   : > { %s725_s23 = sshll.u32 %s9593_s17, 4  ;;  %s752_s3 = sshll.u32 %s9594_s16, 4  ;;  %s726_s23 = int_to_ptr.vmem [resolvable:$true] %s725_s23  ;;  %s10132_s3 = int_to_ptr.vmem [resolvable:$true] %s752_s3 }
 0x19e   : > { %s11636_s26 = sld [smem:[#allocation75_spill]]  ;;  %p11637_p8 = scmp.ne.s32.totalorder %s11611_s10, 0 }
 0x1a4   : > { %s9023_s21 = scalar_lea.hbm %s11636_s26, 512 }
 0x1a5   : > { %p9024_p6 = scmp.ne.s32.totalorder %s11636_s26, %s9023_s21  ;;  %p9030_p10 = scmp.lt.u32.totalorder %s9023_s21, %s11636_s26 }
 0x1a7   : > { %p9026_p5 = pnand %p9024_p6, %p11637_p8 }
 0x1a9   : > { %p9027_p7 = pneg %p9026_p5 }
 0x1ab   : > { %p9032_p13 = pnand %p9030_p10, %p9027_p7 }
 0x1ad   : > { %9035 = shalt.err (!%p9032_p13)
}
 0x1ae   : > { %s9036_s24 = scalar_lea.vmem %s726_s23, 512  ;;  %p9044_p12 = scmp.lt.s32.totalorder %s726_s23, %s726_s23 }
 0x1af   : > { %p9037_p9 = scmp.ne.s32.totalorder %s726_s23, %s9036_s24  ;;  %p9045_p0 = scmp.lt.s32.totalorder %s9036_s24, %s9036_s24 }
 0x1b1   : > { %p9039_p4 = pnand %p9037_p9, %p11637_p8  ;;  %p9046_p2 = por %p9045_p0, %p9044_p12 }
 0x1b3   : > { %p9040_p1 = pneg %p9039_p4 }
 0x1b5   : > { %p9047_p3 = pnand %p9046_p2, %p9040_p1 }
 0x1b7   : > { %9050 = shalt.err (!%p9047_p3)
}
 0x1b8   : > { %p11638_p6 = scmp.ne.s32.totalorder %s11609_s1, 0  ;;  %s11639_s16 = sld [smem:[#allocation77_spill]] }
 0x1ba   : > { %8419 = dma.hbm_to_vmem [thread:$0]  (!%p11638_p6), %s11636_s26, 512, %s726_s23, [#allocation12], %s11615_s22, %s11615_s22, %s11614_s29  }
 0x1be   : > { %s9051_s14 = scalar_lea.hbm %s11639_s16, 16 }
 0x1bf   : > { %p9052_p5 = scmp.ne.s32.totalorder %s11639_s16, %s9051_s14  ;;  %p9058_p10 = scmp.lt.u32.totalorder %s9051_s14, %s11639_s16 }
 0x1c1   : > { %p9054_p3 = pnand %p9052_p5, %p11637_p8 }
 0x1c3   : > { %p9055_p7 = pneg %p9054_p3 }
 0x1c5   : > { %p9060_p13 = pnand %p9058_p10, %p9055_p7 }
 0x1c7   : > { %9063 = shalt.err (!%p9060_p13)
}
 0x1c8   : > { %s9064_s23 = scalar_lea.vmem %s10132_s3, 16  ;;  %s9071_s8 = scalar_lea.vmem %s10132_s3, 32 }
 0x1c9   : > { %p9065_p9 = scmp.ne.s32.totalorder %s10132_s3, %s9064_s23  ;;  %p9072_p12 = scmp.lt.s32.totalorder %s10132_s3, %s10132_s3 }
 0x1ca   : > { %p9073_p0 = scmp.lt.s32.totalorder %s9071_s8, %s9064_s23 }
 0x1cb   : > { %p9067_p4 = pnand %p9065_p9, %p11637_p8 }
 0x1cc   : > { %p9074_p2 = por %p9073_p0, %p9072_p12 }
 0x1cd   : > { %p9068_p1 = pneg %p9067_p4 }
 0x1cf   : > { %p9075_p5 = pnand %p9074_p2, %p9068_p1 }
 0x1d1   : > { %9078 = shalt.err (!%p9075_p5)
}
 0x1d2   : > { %8425 = dma.hbm_to_vmem [thread:$0]  (!%p11638_p6), %s11639_s16, 16, %s10132_s3, [#allocation15]  }
 0x1d3   : > { %s9595_s17 = smov [#allocation19]   ;;  %s9596_s18 = smov [#allocation22]  }
 0x1d4   : > { %s774_s14 = sshll.u32 %s9595_s17, 4  ;;  %s797_s21 = sshll.u32 %s9596_s18, 4  ;;  %s775_s14 = int_to_ptr.vmem [resolvable:$true] %s774_s14  ;;  %s10179_s21 = int_to_ptr.vmem [resolvable:$true] %s797_s21 }
 0x1d5   : > { %s11640_s23 = sld [smem:[#allocation79_spill]] }
 0x1db   : > { %s9079_s8 = scalar_lea.hbm %s11640_s23, 16 }
 0x1dc   : > { %p9080_p3 = scmp.ne.s32.totalorder %s11640_s23, %s9079_s8  ;;  %p9086_p13 = scmp.lt.u32.totalorder %s9079_s8, %s11640_s23 }
 0x1de   : > { %p9082_p7 = pnand %p9080_p3, %p11637_p8 }
 0x1e0   : > { %p9083_p10 = pneg %p9082_p7 }
 0x1e2   : > { %p9088_p9 = pnand %p9086_p13, %p9083_p10 }
 0x1e4   : > { %9091 = shalt.err (!%p9088_p9)
}
 0x1e5   : > { %s9092_s12 = scalar_lea.vmem %s775_s14, 16  ;;  %s9099_s17 = scalar_lea.vmem %s775_s14, 32 }
 0x1e6   : > { %p9093_p4 = scmp.ne.s32.totalorder %s775_s14, %s9092_s12  ;;  %p9100_p0 = scmp.lt.s32.totalorder %s775_s14, %s775_s14 }
 0x1e7   : > { %p9101_p2 = scmp.lt.s32.totalorder %s9099_s17, %s9092_s12 }
 0x1e8   : > { %p9095_p1 = pnand %p9093_p4, %p11637_p8 }
 0x1e9   : > { %p9102_p5 = por %p9101_p2, %p9100_p0 }
 0x1ea   : > { %p9096_p12 = pneg %p9095_p1 }
 0x1ec   : > { %p9103_p11 = pnand %p9102_p5, %p9096_p12 }
 0x1ee   : > { %9106 = shalt.err (!%p9103_p11)
}
 0x1ef   : > { %8431 = dma.hbm_to_vmem [thread:$0]  (!%p11638_p6), %s11640_s23, 16, %s775_s14, [#allocation18]  }
 0x1f0   : > { %s11641_s24 = sld [smem:[#allocation81_spill]] }
 0x1f6   : > { %s9107_s8 = scalar_lea.hbm %s11641_s24, 1024 }
 0x1f7   : > { %p9108_p3 = scmp.ne.s32.totalorder %s11641_s24, %s9107_s8  ;;  %p9114_p11 = scmp.lt.u32.totalorder %s9107_s8, %s11641_s24 }
 0x1f9   : > { %p9110_p7 = pnand %p9108_p3, %p11637_p8 }
 0x1fb   : > { %p9111_p10 = pneg %p9110_p7 }
 0x1fd   : > { %p9116_p13 = pnand %p9114_p11, %p9111_p10 }
 0x1ff   : > { %9119 = shalt.err (!%p9116_p13)
}
 0x200   : > { %s9120_s14 = scalar_lea.vmem %s10179_s21, 1024  ;;  %p9128_p12 = scmp.lt.s32.totalorder %s10179_s21, %s10179_s21 }
 0x201   : > { %p9121_p9 = scmp.ne.s32.totalorder %s10179_s21, %s9120_s14  ;;  %p9129_p0 = scmp.lt.s32.totalorder %s9120_s14, %s9120_s14 }
 0x203   : > { %p9123_p4 = pnand %p9121_p9, %p11637_p8  ;;  %p9130_p2 = por %p9129_p0, %p9128_p12 }
 0x205   : > { %p9124_p1 = pneg %p9123_p4 }
 0x207   : > { %p9131_p5 = pnand %p9130_p2, %p9124_p1 }
 0x209   : > { %9134 = shalt.err (!%p9131_p5)
}
 0x20a   : > { %8437 = dma.hbm_to_vmem [thread:$0]  (!%p11638_p6), %s11641_s24, 1024, %s10179_s21, [#allocation21], %s11615_s22, %s11615_s22, %s11614_s29  }
 0x20b   : > { %s9597_s18 = smov [#allocation25]   ;;  %s9598_s8 = smov [#allocation28]  }
 0x20c   : > { %s823_s13 = sshll.u32 %s9597_s18, 4  ;;  %s848_s27 = sshll.u32 %s9598_s8, 4  ;;  %s824_s13 = int_to_ptr.vmem [resolvable:$true] %s823_s13  ;;  %s10225_s27 = int_to_ptr.vmem [resolvable:$true] %s848_s27 }
 0x20d   : > { %s11642_s17 = sld [smem:[#allocation83_spill]] }
 0x213   : > { %s9135_s14 = scalar_lea.hbm %s11642_s17, 2048 }
 0x214   : > { %p9136_p3 = scmp.ne.s32.totalorder %s11642_s17, %s9135_s14  ;;  %p9142_p11 = scmp.lt.u32.totalorder %s9135_s14, %s11642_s17 }
 0x216   : > { %p9138_p7 = pnand %p9136_p3, %p11637_p8 }
 0x218   : > { %p9139_p10 = pneg %p9138_p7 }
 0x21a   : > { %p9144_p13 = pnand %p9142_p11, %p9139_p10 }
 0x21c   : > { %9147 = shalt.err (!%p9144_p13)
}
 0x21d   : > { %s9148_s26 = scalar_lea.vmem %s824_s13, 2048  ;;  %p9156_p12 = scmp.lt.s32.totalorder %s824_s13, %s824_s13 }
 0x21e   : > { %p9149_p9 = scmp.ne.s32.totalorder %s824_s13, %s9148_s26  ;;  %p9157_p0 = scmp.lt.s32.totalorder %s9148_s26, %s9148_s26 }
 0x220   : > { %p9151_p4 = pnand %p9149_p9, %p11637_p8  ;;  %p9158_p2 = por %p9157_p0, %p9156_p12 }
 0x222   : > { %p9152_p1 = pneg %p9151_p4 }
 0x224   : > { %p9159_p5 = pnand %p9158_p2, %p9152_p1 }
 0x226   : > { %9162 = shalt.err (!%p9159_p5)
}
 0x227   : > { %8443 = dma.hbm_to_vmem [thread:$0]  (!%p11638_p6), %s11642_s17, 2048, %s824_s13, [#allocation24], %s11615_s22, %s11615_s22, %s11614_s29  }
 0x228   : > { %s11643_s3 = sld [smem:[#allocation85_spill]] }
 0x22e   : > { %s9163_s12 = scalar_lea.hbm %s11643_s3, 16 }
 0x22f   : > { %p9164_p3 = scmp.ne.s32.totalorder %s11643_s3, %s9163_s12  ;;  %p9170_p11 = scmp.lt.u32.totalorder %s9163_s12, %s11643_s3 }
 0x231   : > { %p9166_p7 = pnand %p9164_p3, %p11637_p8 }
 0x233   : > { %p9167_p10 = pneg %p9166_p7 }
 0x235   : > { %p9172_p13 = pnand %p9170_p11, %p9167_p10 }
 0x237   : > { %9175 = shalt.err (!%p9172_p13)
}
 0x238   : > { %s9176_s13 = scalar_lea.vmem %s10225_s27, 16  ;;  %s9183_s16 = scalar_lea.vmem %s10225_s27, 32 }
 0x239   : > { %p9177_p9 = scmp.ne.s32.totalorder %s10225_s27, %s9176_s13  ;;  %p9184_p12 = scmp.lt.s32.totalorder %s10225_s27, %s10225_s27 }
 0x23a   : > { %p9185_p0 = scmp.lt.s32.totalorder %s9183_s16, %s9176_s13 }
 0x23b   : > { %p9179_p4 = pnand %p9177_p9, %p11637_p8 }
 0x23c   : > { %p9186_p2 = por %p9185_p0, %p9184_p12 }
 0x23d   : > { %p9180_p1 = pneg %p9179_p4 }
 0x23f   : > { %p9187_p5 = pnand %p9186_p2, %p9180_p1 }
 0x241   : > { %9190 = shalt.err (!%p9187_p5)
}
 0x242   : > { %8449 = dma.hbm_to_vmem [thread:$0]  (!%p11638_p6), %s11643_s3, 16, %s10225_s27, [#allocation27]  }
 0x243   : > { %s9599_s8 = smov [#allocation31]   ;;  %s9600_s14 = smov [#allocation34]  }
 0x244   : > { %s870_s12 = sshll.u32 %s9599_s8, 4  ;;  %s893_s2 = sshll.u32 %s9600_s14, 4  ;;  %s871_s12 = int_to_ptr.vmem [resolvable:$true] %s870_s12  ;;  %s10272_s2 = int_to_ptr.vmem [resolvable:$true] %s893_s2 }
 0x245   : > { %s11644_s13 = sld [smem:[#allocation87_spill]] }
 0x24b   : > { %s9191_s16 = scalar_lea.hbm %s11644_s13, 16 }
 0x24c   : > { %p9192_p3 = scmp.ne.s32.totalorder %s11644_s13, %s9191_s16  ;;  %p9198_p11 = scmp.lt.u32.totalorder %s9191_s16, %s11644_s13 }
 0x24e   : > { %p9194_p7 = pnand %p9192_p3, %p11637_p8 }
 0x250   : > { %p9195_p10 = pneg %p9194_p7 }
 0x252   : > { %p9200_p13 = pnand %p9198_p11, %p9195_p10 }
 0x254   : > { %9203 = shalt.err (!%p9200_p13)
}
 0x255   : > { %s9204_s18 = scalar_lea.vmem %s871_s12, 16  ;;  %s9211_s8 = scalar_lea.vmem %s871_s12, 32 }
 0x256   : > { %p9205_p9 = scmp.ne.s32.totalorder %s871_s12, %s9204_s18  ;;  %p9212_p12 = scmp.lt.s32.totalorder %s871_s12, %s871_s12 }
 0x257   : > { %p9213_p0 = scmp.lt.s32.totalorder %s9211_s8, %s9204_s18 }
 0x258   : > { %p9207_p4 = pnand %p9205_p9, %p11637_p8 }
 0x259   : > { %p9214_p2 = por %p9213_p0, %p9212_p12 }
 0x25a   : > { %p9208_p1 = pneg %p9207_p4 }
 0x25c   : > { %p9215_p5 = pnand %p9214_p2, %p9208_p1 }
 0x25e   : > { %9218 = shalt.err (!%p9215_p5)
}
 0x25f   : > { %8455 = dma.hbm_to_vmem [thread:$0]  (!%p11638_p6), %s11644_s13, 16, %s871_s12, [#allocation30]  }
 0x260   : > { %s11645_s26 = sld [smem:[#allocation89_spill]] }
 0x266   : > { %s9219_s16 = scalar_lea.hbm %s11645_s26, 1024 }
 0x267   : > { %p9220_p3 = scmp.ne.s32.totalorder %s11645_s26, %s9219_s16  ;;  %p9226_p11 = scmp.lt.u32.totalorder %s9219_s16, %s11645_s26 }
 0x269   : > { %p9222_p7 = pnand %p9220_p3, %p11637_p8 }
 0x26b   : > { %p9223_p10 = pneg %p9222_p7 }
 0x26d   : > { %p9228_p13 = pnand %p9226_p11, %p9223_p10 }
 0x26f   : > { %9231 = shalt.err (!%p9228_p13)
}
 0x270   : > { %s9232_s12 = scalar_lea.vmem %s10272_s2, 1024  ;;  %p9240_p12 = scmp.lt.s32.totalorder %s10272_s2, %s10272_s2 }
 0x271   : > { %p9233_p9 = scmp.ne.s32.totalorder %s10272_s2, %s9232_s12  ;;  %p9241_p0 = scmp.lt.s32.totalorder %s9232_s12, %s9232_s12 }
 0x273   : > { %p9235_p4 = pnand %p9233_p9, %p11637_p8  ;;  %p9242_p2 = por %p9241_p0, %p9240_p12 }
 0x275   : > { %p9236_p1 = pneg %p9235_p4 }
 0x277   : > { %p9243_p5 = pnand %p9242_p2, %p9236_p1 }
 0x279   : > { %9246 = shalt.err (!%p9243_p5)
}
 0x27a   : > { %8461 = dma.hbm_to_vmem [thread:$0]  (!%p11638_p6), %s11645_s26, 1024, %s10272_s2, [#allocation33], %s11615_s22, %s11615_s22, %s11614_s29  }
 0x27b   : > { %s9601_s14 = smov [#allocation37]   ;;  %s9602_s16 = smov [#allocation40]  }
 0x27c   : > { %s919_s21 = sshll.u32 %s9601_s14, 4  ;;  %s945_s23 = sshll.u32 %s9602_s16, 4  ;;  %s920_s21 = int_to_ptr.vmem [resolvable:$true] %s919_s21  ;;  %s10318_s23 = int_to_ptr.vmem [resolvable:$true] %s945_s23 }
 0x27d   : > { %s11646_s8 = sld [smem:[#allocation91_spill]] }
 0x283   : > { %s11647_s12 = smov %s11646_s8  ;;  %s9247_s3 = scalar_lea.hbm %s11646_s8, 1024 }
 0x284   : > { %p9248_p3 = scmp.ne.s32.totalorder %s11647_s12, %s9247_s3  ;;  %p9254_p11 = scmp.lt.u32.totalorder %s9247_s3, %s11647_s12 }
 0x286   : > { %p9250_p7 = pnand %p9248_p3, %p11637_p8 }
 0x288   : > { %p9251_p10 = pneg %p9250_p7 }
 0x28a   : > { %p9256_p13 = pnand %p9254_p11, %p9251_p10 }
 0x28c   : > { %9259 = shalt.err (!%p9256_p13)
}
 0x28d   : > { %s9260_s17 = scalar_lea.vmem %s920_s21, 1024  ;;  %p9268_p12 = scmp.lt.s32.totalorder %s920_s21, %s920_s21 }
 0x28e   : > { %p9261_p9 = scmp.ne.s32.totalorder %s920_s21, %s9260_s17  ;;  %p9269_p0 = scmp.lt.s32.totalorder %s9260_s17, %s9260_s17 }
 0x290   : > { %p9263_p4 = pnand %p9261_p9, %p11637_p8  ;;  %p9270_p2 = por %p9269_p0, %p9268_p12 }
 0x292   : > { %p9264_p1 = pneg %p9263_p4 }
 0x294   : > { %p9271_p5 = pnand %p9270_p2, %p9264_p1 }
 0x296   : > { %9274 = shalt.err (!%p9271_p5)
}
 0x297   : > { %8467 = dma.hbm_to_vmem [thread:$0]  (!%p11638_p6), %s11647_s12, 1024, %s920_s21, [#allocation36], %s11615_s22, %s11615_s22, %s11614_s29  }
 0x298   : > { %s11648_s16 = sld [smem:[#allocation93_spill]] }
 0x29e   : > { %s9275_s27 = scalar_lea.hbm %s11648_s16, 1024 }
 0x29f   : > { %p9276_p3 = scmp.ne.s32.totalorder %s11648_s16, %s9275_s27  ;;  %p9282_p11 = scmp.lt.u32.totalorder %s9275_s27, %s11648_s16 }
 0x2a1   : > { %p9278_p7 = pnand %p9276_p3, %p11637_p8 }
 0x2a3   : > { %p9279_p10 = pneg %p9278_p7 }
 0x2a5   : > { %p9284_p13 = pnand %p9282_p11, %p9279_p10 }
 0x2a7   : > { %9287 = shalt.err (!%p9284_p13)
}
 0x2a8   : > { %s9288_s21 = scalar_lea.vmem %s10318_s23, 1024  ;;  %p9296_p12 = scmp.lt.s32.totalorder %s10318_s23, %s10318_s23 }
 0x2a9   : > { %p9289_p9 = scmp.ne.s32.totalorder %s10318_s23, %s9288_s21  ;;  %p9297_p0 = scmp.lt.s32.totalorder %s9288_s21, %s9288_s21 }
 0x2ab   : > { %p9291_p4 = pnand %p9289_p9, %p11637_p8  ;;  %p9298_p2 = por %p9297_p0, %p9296_p12 }
 0x2ad   : > { %p9292_p1 = pneg %p9291_p4 }
 0x2af   : > { %p9299_p5 = pnand %p9298_p2, %p9292_p1 }
 0x2b1   : > { %9302 = shalt.err (!%p9299_p5)
}
 0x2b2   : > { %8473 = dma.hbm_to_vmem [thread:$0]  (!%p11638_p6), %s11648_s16, 1024, %s10318_s23, [#allocation39], %s11615_s22, %s11615_s22, %s11614_s29  }
 0x2b3   : > { %s9603_s3 = smov [#allocation41]   ;;  %s11649_s18 = sld [smem:[#allocation69_spill]] }
 0x2b4   : > { %s958_s13 = sshll.u32 %s9603_s3, 4  ;;  %s11650_s21 = sld [smem:[#allocation94_spill]]  ;;  %s959_s13 = int_to_ptr.vmem [resolvable:$true] %s958_s13 }
 0x2b9   : > { %s10371_s8 = scalar_lea.hbm %s11649_s18, %s10084_s9 }
 0x2ba   : > { %s9303_s12 = scalar_lea.hbm %s11650_s21, 2048 }
 0x2bb   : > { %p9304_p3 = scmp.ne.s32.totalorder %s11650_s21, %s9303_s12  ;;  %p9310_p11 = scmp.lt.u32.totalorder %s9303_s12, %s11650_s21 }
 0x2bd   : > { %p9306_p7 = pnand %p9304_p3, %p11637_p8 }
 0x2bf   : > { %p9307_p10 = pneg %p9306_p7 }
 0x2c1   : > { %p9312_p13 = pnand %p9310_p11, %p9307_p10 }
 0x2c3   : > { %9315 = shalt.err (!%p9312_p13)
}
 0x2c4   : > { %s9316_s11 = scalar_lea.vmem %s959_s13, 2048  ;;  %p9324_p12 = scmp.lt.s32.totalorder %s959_s13, %s959_s13 }
 0x2c5   : > { %p9317_p9 = scmp.ne.s32.totalorder %s959_s13, %s9316_s11  ;;  %p9325_p0 = scmp.lt.s32.totalorder %s9316_s11, %s9316_s11 }
 0x2c7   : > { %p9319_p4 = pnand %p9317_p9, %p11637_p8  ;;  %p9326_p2 = por %p9325_p0, %p9324_p12 }
 0x2c9   : > { %p9320_p1 = pneg %p9319_p4 }
 0x2cb   : > { %p9327_p5 = pnand %p9326_p2, %p9320_p1 }
 0x2cd   : > { %9330 = shalt.err (!%p9327_p5)
}
 0x2ce   : > { %8476 = dma.hbm_to_vmem [thread:$0]  (!%p11638_p6), %s11650_s21, 2048, %s959_s13, [#allocation42], %s11615_s22, %s11615_s22, %s11614_s29  }
 0x2cf   : > { %s976_s10 = scalar_lea.vmem [#allocation2], %s10081_s25  ;;  %s11651_s14 = sld [smem:[#allocation71_spill]] }
 0x2d0   : > { %s983_s12 = sshll.u32 %s976_s10, 4  ;;  %s973_s24 = scalar_lea.sflag [#allocation3], %s10074_s5  ;;  %s10395_s12 = int_to_ptr.vmem [resolvable:$true] %s983_s12 }
 0x2d1   : > { %s9331_s2 = scalar_lea.hbm %s10371_s8, 128  ;;  %p11652_p3 = scmp.ne.s32.totalorder %s11635_s19, 0 }
 0x2d2   : > { %p9332_p8 = scmp.ne.s32.totalorder %s10371_s8, %s9331_s2  ;;  %s9336_s11 = scalar_lea.hbm %s11649_s18, 256 }
 0x2d3   : > { %p9337_p6 = scmp.lt.u32.totalorder %s10371_s8, %s11649_s18  ;;  %p9338_p11 = scmp.lt.u32.totalorder %s9336_s11, %s9331_s2 }
 0x2d4   : > { %p9334_p7 = pnand %p9332_p8, %p11652_p3  ;;  %p9340_p9 = scmp.lt.u32.totalorder %s9331_s2, %s10371_s8 }
 0x2d5   : > { %s10401_s27 = scalar_lea.hbm %s11651_s14, %s10084_s9  ;;  %p9339_p13 = por %p9338_p11, %p9337_p6 }
 0x2d6   : > { %p9335_p10 = pneg %p9334_p7 }
 0x2d7   : > { %p9341_p4 = por %p9340_p9, %p9339_p13 }
 0x2d9   : > { %p9342_p1 = pnand %p9341_p4, %p9335_p10 }
 0x2db   : > { %9345 = shalt.err (!%p9342_p1)
}
 0x2dc   : > { %s9346_s9 = scalar_lea.vmem %s10395_s12, 128  ;;  %s9604_s13 = smov [#allocation2]  }
 0x2dd   : > { %p9347_p12 = scmp.ne.s32.totalorder %s10395_s12, %s9346_s9  ;;  %s9351_s7 = sshll.u32 %s9604_s13, 4  ;;  %s9352_s7 = int_to_ptr.vmem [resolvable:$false] %s9351_s7 }
 0x2de   : > { %s9353_s26 = scalar_lea.vmem %s9352_s7, 256  ;;  %p9354_p5 = scmp.lt.s32.totalorder %s10395_s12, %s9352_s7 }
 0x2df   : > { %p9349_p0 = pnand %p9347_p12, %p11652_p3  ;;  %p9355_p8 = scmp.lt.s32.totalorder %s9353_s26, %s9346_s9 }
 0x2e1   : > { %p9350_p2 = pneg %p9349_p0  ;;  %p9356_p7 = por %p9355_p8, %p9354_p5 }
 0x2e3   : > { %p9357_p6 = pnand %p9356_p7, %p9350_p2 }
 0x2e5   : > { %9360 = shalt.err (!%p9357_p6)
}
 0x2e6   : > { %p11653_p10 = scmp.ne.s32.totalorder %s11633_s6, 0  ;;  %s1012_s10 = scalar_lea.vmem [#allocation7], %s10081_s25 }
 0x2e7   : > { %s1019_s1 = sshll.u32 %s1012_s10, 4  ;;  %s7688_s3 = sshll.u32 %s9575_s30, 4  ;;  %s1020_s1 = int_to_ptr.vmem [resolvable:$true] %s1019_s1 }
 0x2e8   : > { %8480 = dma.hbm_to_vmem [thread:$0]  (!%p11653_p10), %s10371_s8, 128, %s10395_s12, %s973_s24  }
 0x2e9   : > { %s9361_s2 = scalar_lea.hbm %s10401_s27, 128  ;;  %s9366_s11 = scalar_lea.hbm %s11651_s14, 256 }
 0x2ea   : > { %p9362_p11 = scmp.ne.s32.totalorder %s10401_s27, %s9361_s2  ;;  %p9367_p4 = scmp.lt.u32.totalorder %s10401_s27, %s11651_s14 }
 0x2eb   : > { %p9368_p1 = scmp.lt.u32.totalorder %s9366_s11, %s9361_s2  ;;  %p9370_p0 = scmp.lt.u32.totalorder %s9361_s2, %s10401_s27 }
 0x2ec   : > { %p9364_p13 = pnand %p9362_p11, %p11652_p3 }
 0x2ed   : > { %p9369_p12 = por %p9368_p1, %p9367_p4 }
 0x2ee   : > { %p9365_p9 = pneg %p9364_p13 }
 0x2ef   : > { %p9371_p2 = por %p9370_p0, %p9369_p12 }
 0x2f1   : > { %p9372_p5 = pnand %p9371_p2, %p9365_p9 }
 0x2f3   : > { %9375 = shalt.err (!%p9372_p5)
}
 0x2f4   : > { %s9376_s25 = scalar_lea.vmem %s1020_s1, 128  ;;  %s9605_s8 = smov [#allocation7]  }
 0x2f5   : > { %p9377_p8 = scmp.ne.s32.totalorder %s1020_s1, %s9376_s25  ;;  %s9381_s12 = sshll.u32 %s9605_s8, 4  ;;  %s9382_s12 = int_to_ptr.vmem [resolvable:$false] %s9381_s12 }
 0x2f6   : > { %s9383_s24 = scalar_lea.vmem %s9382_s12, 256  ;;  %p9384_p11 = scmp.lt.s32.totalorder %s1020_s1, %s9382_s12 }
 0x2f7   : > { %p9379_p7 = pnand %p9377_p8, %p11652_p3  ;;  %p9385_p13 = scmp.lt.s32.totalorder %s9383_s24, %s9376_s25 }
 0x2f9   : > { %p9380_p6 = pneg %p9379_p7  ;;  %p9386_p10 = por %p9385_p13, %p9384_p11 }
 0x2fb   : > { %p9387_p1 = pnand %p9386_p10, %p9380_p6 }
 0x2fd   : > { %9390 = shalt.err (!%p9387_p1)
}
 0x2fe   : > { %p11654_p4 = scmp.ne.s32.totalorder %s11633_s6, 0  ;;  %s11655_s7 = sld [smem:[#allocation72_spill]] }
 0x2ff   : > { %s1029_s2 = scalar_lea.vmem [#allocation8], %s10074_s5  ;;  %s11657_s17 = sand.u32 1, %s9575_s30  }
 0x300   : > { %8486 = dma.hbm_to_vmem [thread:$0]  (!%p11654_p4), %s10401_s27, 128, %s1020_s1, %s10102_s15  }
 0x301   : > { %s1036_s23 = sshll.u32 %s1029_s2, 4  ;;  %s1027_s11 = scalar_lea.sflag [#allocation9], %s11657_s17  ;;  %s1037_s23 = int_to_ptr.vmem [resolvable:$true] %s1036_s23 }
 0x304   : > { %s11656_s26 = smov %s11655_s7  ;;  %s10448_s10 = scalar_lea.hbm %s11655_s7, %s7688_s3 }
 0x305   : > { %s9391_s29 = scalar_lea.hbm %s10448_s10, 16  ;;  %s9396_s1 = scalar_lea.hbm %s11656_s26, 32 }
 0x306   : > { %p9392_p10 = scmp.ne.s32.totalorder %s10448_s10, %s9391_s29  ;;  %p9397_p0 = scmp.lt.u32.totalorder %s10448_s10, %s11656_s26 }
 0x307   : > { %p9398_p2 = scmp.lt.u32.totalorder %s9396_s1, %s9391_s29  ;;  %p9400_p8 = scmp.lt.u32.totalorder %s9391_s29, %s10448_s10 }
 0x308   : > { %p9394_p9 = pnand %p9392_p10, %p11652_p3 }
 0x309   : > { %p9399_p5 = por %p9398_p2, %p9397_p0 }
 0x30a   : > { %p9395_p12 = pneg %p9394_p9 }
 0x30b   : > { %p9401_p7 = por %p9400_p8, %p9399_p5 }
 0x30d   : > { %p9402_p6 = pnand %p9401_p7, %p9395_p12 }
 0x30f   : > { %9405 = shalt.err (!%p9402_p6)
}
 0x310   : > { %s9406_s5 = scalar_lea.vmem %s1037_s23, 16  ;;  %s9606_s25 = smov [#allocation8]  }
 0x311   : > { %p9407_p11 = scmp.ne.s32.totalorder %s1037_s23, %s9406_s5  ;;  %s9411_s8 = sshll.u32 %s9606_s25, 4  ;;  %s9412_s8 = int_to_ptr.vmem [resolvable:$false] %s9411_s8 }
 0x312   : > { %s9413_s12 = scalar_lea.vmem %s9412_s8, 32  ;;  %p9414_p10 = scmp.lt.s32.totalorder %s1037_s23, %s9412_s8 }
 0x313   : > { %p9409_p13 = pnand %p9407_p11, %p11652_p3  ;;  %p9415_p9 = scmp.lt.s32.totalorder %s9413_s12, %s9406_s5 }
 0x315   : > { %p9410_p1 = pneg %p9409_p13  ;;  %p9416_p4 = por %p9415_p9, %p9414_p10 }
 0x317   : > { %p9417_p0 = pnand %p9416_p4, %p9410_p1 }
 0x319   : > { %9420 = shalt.err (!%p9417_p0)
}
 0x31a   : > { %p11658_p2 = scmp.ne.s32.totalorder %s11633_s6, 0  ;;  %s11659_s24 = sld [smem:[#allocation65_spill]] }
 0x31c   : > { %8489 = dma.hbm_to_vmem [thread:$0]  (!%p11658_p2), %s10448_s10, 16, %s1037_s23, %s1027_s11  }
 0x320   : > { %p11660_p12 = scmp.ne.s32.totalorder %s11659_s24, 0 }
 0x321   : > { %s10473_s19 = sand.u32 (!%p11660_p12), 1, %s9567_s4   ;;  %p11661_p3 = scmp.ne.s32.totalorder (!%p11660_p12), %s11629_s0, 0 }
 0x322   : > { %1045 = sbr.rel (%p11660_p12) target bundleno = 8889 (0x22b9), region = 124  ;;  %s10476_s9 = sshll.u32 (!%p11660_p12), %s10473_s19, 3 }
 0x323   : > { %s1048_s13 = scalar_lea.sflag (!%p11660_p12), [#allocation3], %s10473_s19  ;;  %s1051_s7 = scalar_lea.vmem (!%p11660_p12), [#allocation2], %s10476_s9 }
 0x329   : > { %9494 = dma.done.wait (%p11661_p3), %s1048_s13, 128  }
 0x32a   : > { %9496 = vsyncadd (%p11661_p3), %s1048_s13, 4294967168  ;;  %s1056_s6 = sand.u32 1, %s9783_s28   ;;  %s1060_s2 = scalar_lea.vmem [#allocation5], %s10476_s9 }
 0x32b   : > { %s1057_s10 = scalar_lea.sflag [#allocation6], %s1056_s6 }
 0x32c   : > { %9498 = dma.done.wait (%p11661_p3), %s1057_s10, 256  }
 0x32d   : > { %9500 = vsyncadd (%p11661_p3), %s1057_s10, 4294967040  ;;  %s1069_s23 = scalar_lea.vmem [#allocation7], %s10476_s9  ;;  %s1075_s17 = scalar_lea.sflag [#allocation9], %s1056_s6 }
 0x32e   : > { %s1077_s11 = scalar_lea.vmem [#allocation8], %s10473_s19 }
 0x32f   : > { %9502 = dma.done.wait (%p11661_p3), %s1075_s17, 16  }
 0x330   : > { %9504 = vsyncadd (%p11661_p3), %s1075_s17, 4294967280  ;;  %p11662_p4 = scmp.eq.s32.totalorder %s9783_s28, 0 }
 0x332   : > { %9506 = dma.done.wait (%p11662_p4), [#allocation9], 4096   ;;  %p11663_p5 = pmov %p11662_p4 }
 0x333   : > { %p11664_p8 = pmov %p11662_p4 }
 0x334   : > { %9508 = vsyncadd (%p11663_p5), [#allocation9], 4294963200 }
 0x335   : > { %9510 = dma.done.wait (%p11664_p8), [#allocation12], 2560   ;;  %p11665_p7 = pmov %p11662_p4 }
 0x336   : > { %p11666_p6 = pmov %p11662_p4 }
 0x337   : > { %9512 = vsyncadd (%p11665_p7), [#allocation12], 4294964736 }
 0x338   : > { %9514 = dma.done.wait (%p11666_p6), [#allocation15], 528   ;;  %p11667_p11 = pmov %p11662_p4 }
 0x339   : > { %p11668_p13 = pmov %p11662_p4 }
 0x33a   : > { %9516 = vsyncadd (%p11667_p11), [#allocation15], 4294966768 }
 0x33b   : > { %9518 = dma.done.wait (%p11668_p13), [#allocation18], 32   ;;  %p11669_p1 = pmov %p11662_p4 }
 0x33d   : > { %9520 = vsyncadd (%p11669_p1), [#allocation18], 4294967264  ;;  %p11670_p10 = pmov %p11669_p1 }
 0x33e   : > { %p11671_p9 = pmov %p11669_p1 }
 0x33f   : > { %9522 = dma.done.wait (%p11670_p10), [#allocation21], 3072  }
 0x340   : > { %9524 = vsyncadd (%p11671_p9), [#allocation21], 4294964224  ;;  %p11672_p0 = pmov %p11669_p1 }
 0x342   : > { %9526 = dma.done.wait (%p11672_p0), [#allocation24], 3072   ;;  %p11673_p2 = pmov %p11672_p0 }
 0x343   : > { %p11674_p12 = pmov %p11672_p0 }
 0x344   : > { %9528 = vsyncadd (%p11673_p2), [#allocation24], 4294964224 }
 0x345   : > { %9530 = dma.done.wait (%p11674_p12), [#allocation27], 32   ;;  %p11675_p3 = pmov %p11672_p0 }
 0x346   : > { %p11676_p4 = pmov %p11672_p0 }
 0x347   : > { %9532 = vsyncadd (%p11675_p3), [#allocation27], 4294967264 }
 0x348   : > { %9534 = dma.done.wait (%p11676_p4), [#allocation30], 32   ;;  %p11677_p5 = pmov %p11672_p0 }
 0x349   : > { %p11678_p8 = pmov %p11672_p0 }
 0x34a   : > { %9536 = vsyncadd (%p11677_p5), [#allocation30], 4294967264 }
 0x34b   : > { %9538 = dma.done.wait (%p11678_p8), [#allocation33], 3072   ;;  %p11679_p7 = pmov %p11672_p0 }
 0x34c   : > { %p11680_p6 = pmov %p11672_p0 }
 0x34d   : > { %9540 = vsyncadd (%p11679_p7), [#allocation33], 4294964224 }
 0x34e   : > { %9542 = dma.done.wait (%p11680_p6), [#allocation36], 2048   ;;  %p11681_p11 = pmov %p11672_p0 }
 0x34f   : > { %p11682_p13 = pmov %p11672_p0 }
 0x350   : > { %9544 = vsyncadd (%p11681_p11), [#allocation36], 4294965248 }
 0x351   : > { %9546 = dma.done.wait (%p11682_p13), [#allocation39], 2048   ;;  %p11683_p1 = pmov %p11672_p0 }
 0x352   : > { %p11684_p10 = pmov %p11672_p0 }
 0x353   : > { %9548 = vsyncadd (%p11683_p1), [#allocation39], 4294965248 }
 0x354   : > { %9550 = dma.done.wait (%p11684_p10), [#allocation42], 2048   ;;  %p11685_p9 = pmov %p11672_p0 }
 0x355   : > { %v9607_v0 = vmov 0   ;;  %v1288_v1 = vld [vmem:[%s1051_s7] sm:$0xff]  ;;  %v1271_v2 = vld [vmem:[#allocation10 + $0x80] sm:$0xff]  ;;  %v1289_v50 = vlaneseq  ;;  %v9608_v54 = vmov 1.0   ;;  %vm1372_vm2 = vcmask 523264   ;;  %s9610_s0 = smov 112  }
 0x356   : > { %9552 = vsyncadd (%p11685_p9), [#allocation42], 4294965248  ;;  %8614 = vset.pattern.permute.xlu0 %v9607_v0  ;;  %1449 = vmatprep.mubr.bf16.mxu1 %v9607_v0  ;;  %v1272_v3 = vld [vmem:[#allocation10 + $0x88] sm:$0xff]  ;;  %v1255_v5 = vld [vmem:[#allocation10] sm:$0xff]  ;;  %s9611_s29 = smov 96   ;;  %s9612_s15 = smov 80  }
 0x357   : > { %1293 = vperm.xlu0 %8614, %v1288_v1   ;;  %v10548_v4 = vpack.c.bf16 %v1272_v3, %v1271_v2  ;;  %v1256_v6 = vld [vmem:[#allocation10 + $0x8] sm:$0xff]  ;;  %v1273_v7 = vld [vmem:[#allocation10 + $0x90] sm:$0xff]  ;;  %v1274_v9 = vld [vmem:[#allocation10 + $0x98] sm:$0xff]  ;;  %v10597_v51 = vand.u32 127, %v1289_v50  ;;  %s9613_s27 = smov 64   ;;  %vm9616_vm3 = vmmov 0  }
 0x358   : > { %v10550_v8 = vpack.c.bf16 %v1256_v6, %v1255_v5  ;;  %v1257_v10 = vld [vmem:[#allocation10 + $0x10] sm:$0xff]  ;;  %v1258_v11 = vld [vmem:[#allocation10 + $0x18] sm:$0xff]  ;;  %v10553_v12 = vpack.c.bf16 %v1274_v9, %v1273_v7  ;;  %v1275_v13 = vld [vmem:[#allocation10 + $0xa0] sm:$0xff]  ;;  %vm2462_vm4 = vcmask 130048   ;;  %vm2635_vm5 = vcmask 64512   ;;  %s9617_s1 = smov 32  }
 0x359   : > { %8247 = vmatprep.subr.bf16.mxu0 %v10548_v4  ;;  %v1276_v14 = vld [vmem:[#allocation10 + $0xa8] sm:$0xff]  ;;  %v10556_v15 = vpack.c.bf16 %v1258_v11, %v1257_v10  ;;  %v1259_v17 = vld [vmem:[#allocation10 + $0x20] sm:$0xff]  ;;  %v1277_v19 = vld [vmem:[#allocation10 + $0xb0] sm:$0xff]  ;;  %v10600_v52 = vadd.s32 128, %v10597_v51  ;;  %vm2749_vm6 = vcmask 1043456   ;;  %s9618_s3 = smov 16  }
 0x35a   : > { %8249 = vmatpush3.bf16.msra.mxu0 %v10550_v8  ;;  %v10559_v16 = vpack.c.bf16 %v1276_v14, %v1275_v13  ;;  %v1260_v18 = vld [vmem:[#allocation10 + $0x28] sm:$0xff]  ;;  %v1278_v20 = vld [vmem:[#allocation10 + $0xb8] sm:$0xff]  ;;  %v1261_v23 = vld [vmem:[#allocation10 + $0x30] sm:$0xff]  ;;  %s9619_s22 = smov 48   ;;  %vm3080_vm7 = vcmask 261120   ;;  %vm3082_vm8 = vcmask 392192  }
 0x35b   : > { %8251 = vmatprep.subr.bf16.mxu0 %v10553_v12  ;;  %v10562_v21 = vpack.c.bf16 %v1260_v18, %v1259_v17  ;;  %v10565_v22 = vpack.c.bf16 %v1278_v20, %v1277_v19  ;;  %v1262_v24 = vld [vmem:[#allocation10 + $0x38] sm:$0xff]  ;;  %v1279_v25 = vld [vmem:[#allocation10 + $0xc0] sm:$0xff]  ;;  %v1280_v26 = vld [vmem:[#allocation10 + $0xc8] sm:$0xff]  ;;  %vm7190_vm13 = vcmask 7168   ;;  %s7715_s5 = sshll.u32 %s10473_s19, 4  ;;  %s7806_s8 = sshll.u32 %s9783_s28, 8 }
 0x35c   : > { %v10568_v27 = vpack.c.bf16 %v1262_v24, %v1261_v23  ;;  %v10571_v28 = vpack.c.bf16 %v1280_v26, %v1279_v25  ;;  %v1263_v29 = vld [vmem:[#allocation10 + $0x40] sm:$0xff]  ;;  %v1264_v30 = vld [vmem:[#allocation10 + $0x48] sm:$0xff]  ;;  %v1281_v31 = vld [vmem:[#allocation10 + $0xd0] sm:$0xff]  ;;  %s11396_s25 = scalar_lea.vmem [#allocation43], %s7715_s5  ;;  %s11686_s9 = sld [smem:[#allocation95_spill]] }
 0x35d   : > { %v1282_v32 = vld [vmem:[#allocation10 + $0xd8] sm:$0xff]  ;;  %v10574_v33 = vpack.c.bf16 %v1264_v30, %v1263_v29  ;;  %v1265_v35 = vld [vmem:[#allocation10 + $0x50] sm:$0xff]  ;;  %v1283_v37 = vld [vmem:[#allocation10 + $0xe0] sm:$0xff]  ;;  %s7274_s7 = sshll.u32 %s11396_s25, 4  ;;  %s7256_s6 = scalar_lea.sflag [#allocation4], %s10473_s19  ;;  %s7275_s7 = int_to_ptr.vmem [resolvable:$true] %s7274_s7 }
 0x35e   : > { %8253 = vmatpush3.bf16.msra.mxu0 %v10556_v15  ;;  %v10577_v34 = vpack.c.bf16 %v1282_v32, %v1281_v31  ;;  %v1266_v36 = vld [vmem:[#allocation10 + $0x58] sm:$0xff]  ;;  %v1284_v38 = vld [vmem:[#allocation10 + $0xe8] sm:$0xff]  ;;  %v1267_v41 = vld [vmem:[#allocation10 + $0x60] sm:$0xff]  ;;  %s9421_s10 = scalar_lea.vmem %s7275_s7, 256  ;;  %p11687_p2 = scmp.ne.s32.totalorder %s11630_s20, 0 }
 0x35f   : > { %8255 = vmatprep.subr.bf16.mxu0 %v10559_v16  ;;  %v10580_v39 = vpack.c.bf16 %v1266_v36, %v1265_v35  ;;  %v10583_v40 = vpack.c.bf16 %v1284_v38, %v1283_v37  ;;  %v1268_v42 = vld [vmem:[#allocation10 + $0x68] sm:$0xff]  ;;  %v1285_v43 = vld [vmem:[#allocation10 + $0xf0] sm:$0xff]  ;;  %v1286_v44 = vld [vmem:[#allocation10 + $0xf8] sm:$0xff]  ;;  %p9422_p0 = scmp.ne.s32.totalorder %s7275_s7, %s9421_s10 }
 0x360   : > { %v10586_v45 = vpack.c.bf16 %v1268_v42, %v1267_v41  ;;  %v10589_v46 = vpack.c.bf16 %v1286_v44, %v1285_v43  ;;  %v1269_v47 = vld [vmem:[#allocation10 + $0x70] sm:$0xff]  ;;  %v1270_v48 = vld [vmem:[#allocation10 + $0x78] sm:$0xff]  ;;  %v1389_v63 = vld [vmem:[#allocation20] sm:$0xff]  ;;  %v9609_v42 = vmov 0.0  }
 0x361   : > { %v10592_v49 = vpack.c.bf16 %v1270_v48, %v1269_v47  ;;  %v1390_v60 = vld [vmem:[#allocation20 + $0x8] sm:$0xff]  ;;  %v1392_v61 = vld [vmem:[#allocation20 + $0x18] sm:$0xff]  ;;  %v1391_v1 = vld [vmem:[#allocation20 + $0x10] sm:$0xff]  ;;  %p9423_p12 = pnand %p9422_p0, %p11687_p2 }
 0x362   : > { %8257 = vmatpush3.bf16.msra.mxu0 %v10562_v21  ;;  %v1407_v62 = vpack.c.bf16 %v1392_v61, %v1390_v60  ;;  %v1406_v2 = vpack.c.bf16 %v1391_v1, %v1389_v63  ;;  %v1394_v3 = vld [vmem:[#allocation20 + $0x28] sm:$0xff]  ;;  %v1396_v5 = vld [vmem:[#allocation20 + $0x38] sm:$0xff]  ;;  %v1393_v6 = vld [vmem:[#allocation20 + $0x20] sm:$0xff]  ;;  %v9614_v60 = vmov 1983009808   ;;  %v10640_v1 = vshrl.u32 %v1289_v50, 7  ;;  %s11411_s13 = scalar_lea.hbm %s11686_s9, %s7806_s8 }
 0x363   : > { %8259 = vmatprep.subr.bf16.mxu0 %v10565_v22  ;;  %v1409_v7 = vpack.c.bf16 %v1396_v5, %v1394_v3  ;;  %v1395_v9 = vld [vmem:[#allocation20 + $0x30] sm:$0xff]  ;;  %v1398_v10 = vld [vmem:[#allocation20 + $0x48] sm:$0xff]  ;;  %v1400_v11 = vld [vmem:[#allocation20 + $0x58] sm:$0xff]  ;;  %v1485_v61 = vunpack.c.l.s4 %v9614_v60  ;;  %p9424_p3 = pneg %p9423_p12 }
 0x364   : > { %1417 = vmatprep.subr.bf16.mxu1 %v1407_v62  ;;  %v1408_v13 = vpack.c.bf16 %v1395_v9, %v1393_v6  ;;  %v1411_v14 = vpack.c.bf16 %v1400_v11, %v1398_v10  ;;  %v1397_v17 = vld [vmem:[#allocation20 + $0x40] sm:$0xff]  ;;  %v1399_v18 = vld [vmem:[#allocation20 + $0x50] sm:$0xff]  ;;  %v1402_v19 = vld [vmem:[#allocation20 + $0x68] sm:$0xff]  ;;  %vm7185_vm12 = vcmp.lt.s32.totalorder %v10640_v1, 3 }
 0x365   : > { %1418 = vmatpush1.bf16.msra.mxu1 %v1406_v2  ;;  %v1404_v20 = vld [vmem:[#allocation20 + $0x78] sm:$0xff]  ;;  %v1410_v23 = vpack.c.bf16 %v1399_v18, %v1397_v17  ;;  %v1401_v25 = vld [vmem:[#allocation20 + $0x60] sm:$0xff]  ;;  %v1403_v26 = vld [vmem:[#allocation20 + $0x70] sm:$0xff]  ;;  %v1486_v63 = vunpack.c.0.s8 %v1485_v61  ;;  %v9615_v2 = vmov 1934713408  }
 0x366   : > { %8261 = vmatpush3.bf16.msra.mxu0 %v10568_v27  ;;  %1419 = vmatprep.subr.bf16.mxu1 %v1409_v7  ;;  %v1413_v24 = vpack.c.bf16 %v1404_v20, %v1402_v19  ;;  %v1412_v29 = vpack.c.bf16 %v1403_v26, %v1401_v25  ;;  %v7720_v36 = vld [vmem:[#allocation16] ss:$0 sm:$0xff]  ;;  %v1517_v3 = vunpack.c.l.s4 %v9615_v2 }
 0x367   : > { %8263 = vmatprep.subr.bf16.mxu0 %v10571_v28  ;;  %v10643_v9 = vsub.s32 %v1486_v63, %v10640_v1 }
 0x368   : > { %v1518_v10 = vunpack.c.0.s8 %v1517_v3 }
 0x369   : > { %1420 = vmatpush1.bf16.msra.mxu1 %v1408_v13 }
 0x36a   : > { %8265 = vmatpush3.bf16.msra.mxu0 %v10574_v33  ;;  %1421 = vmatprep.subr.bf16.mxu1 %v1411_v14  ;;  %v10650_v19 = vsub.s32 %v1518_v10, %v10640_v1 }
 0x36b   : > { %8267 = vmatprep.subr.bf16.mxu0 %v10577_v34 }
 0x36d   : > { %1422 = vmatpush1.bf16.msra.mxu1 %v1410_v23 }
 0x36e   : > { %8269 = vmatpush3.bf16.msra.mxu0 %v10580_v39  ;;  %1423 = vmatprep.subr.bf16.mxu1 %v1413_v24 }
 0x36f   : > { %8271 = vmatprep.subr.bf16.mxu0 %v10583_v40 }
 0x371   : > { %1424 = vmatpush1.bf16.msra.mxu1 %v1412_v29 }
 0x372   : > { %8273 = vmatpush3.bf16.msra.mxu0 %v10586_v45  ;;  %7978 = vmatprep.subr.bf16.mxu1 %v9609_v42 }
 0x373   : > { %8275 = vmatprep.subr.bf16.mxu0 %v10589_v46 }
 0x376   : > { %8277 = vmatpush3.bf16.msra.mxu0 %v10592_v49 }
 0x377   : > { %8002 = vmatprep.subr.bf16.mxu0 %v9609_v42 }
 0x3d6   : > { %v1294_v53 = vpop.permute.xlu0 %1293 }
 0x3d7   : > { %vm1296_vm0 = vcmp.eq.s32.totalorder %v10600_v52, %v1294_v53  ;;  %vm1295_vm1 = vcmp.eq.s32.totalorder %v10597_v51, %v1294_v53 }
 0x3d8   : > { %7718 = vmatprep.mubr.msk.f32.mxu0 %vm1296_vm0, %v9608_v54 }
 0x3d9   : > { %7719 = vmatmul.mubr.msk.f32.vlgmr.msra.gmra.mrb[0].mxu0 %vm1295_vm1, %v9608_v54 }
 0x3da   : > { %8004 = vmatprep.mubr.msk.bf16.mxu0 %vm9616_vm3, %v9609_v42 }
 0x4ac   : > { %v7839_v55 = vpop.f32.mrb[0].mxu0 }
 0x4ad   : > { %v7840_v56 = vpop.f32.mrb[1].mxu0 }
 0x4ae   : > { %v10606_v57 = vadd.f32 %v7840_v56, %v7839_v55 }
 0x4b0   : > { %v1371_v58 = vmul.f32 %v10606_v57, %v10606_v57 }
 0x4b2   : > { %v1373_v59 = vsel %vm1372_vm2, %v1371_v58, 0.0 }
 0x4b3   : > { %1374 = vadd.xlane.f32.xlu0 %v1373_v59 }
 0x540   : > { %v1375_v30 = vpop.xlane.xlu0 %1374 }
 0x541   : > { %v1377_v31 = vmul.f32 0.015625, %v1375_v30 }
 0x543   : > { %v1378_v32 = vadd.f32 1e-06, %v1377_v31 }
 0x545   : > { %8616 = vrsqrt.f32 %v1378_v32 }
 0x54f   : > { %v8617_v35 = vpop.eup %8616 }
 0x550   : > { %v1380_v37 = vmul.f32 %v8617_v35, %v10606_v57 }
 0x552   : > { %v1388_v38 = vmul.f32 %v7720_v36, %v1380_v37 }
 0x554   : > { %v1405_v41 = vpack.c.bf16 %v1388_v38, %v1388_v38 }
 0x556   : > { %7721 = vmatmul.mubr.msk.bf16.vlgmr.msra.gmra.mrb[0].mxu1 %vm1372_vm2, %v1405_v41 }
 0x557   : > { %7980 = vmatprep.mubr.msk.bf16.mxu1 %vm9616_vm3, %v9609_v42 }
 0x629   : > { %v10615_v43 = vpop.f32.mrb[0].mxu1 }
 0x62a   : > { %1473 = vrot.lane.b32.xlu1 %v10615_v43, %s9610_s0  ;;  %v10619_v44 = vpop.f32.mrb[1].mxu1 }
 0x62b   : > { %v1455_v47 = vpop.f32.mrb[2].mxu1 }
 0x62c   : > { %v1456_v48 = vpop.f32.mrb[3].mxu1 }
 0x62e   : > { %1476 = vrot.lane.b32.xlu1 %v10615_v43, %s9611_s29 }
 0x632   : > { %1479 = vrot.lane.b32.xlu1 %v10615_v43, %s9612_s15 }
 0x636   : > { %1558 = vrot.lane.b32.xlu1 %v10615_v43, %s9613_s27 }
 0x69c   : > { %v10627_v53 = vpop.permute.xlu1 %1473 }
 0x69d   : > { %1560 = vrot.lane.b32.xlu1 %v10627_v53, %s9613_s27 }
 0x6a0   : > { %v10631_v55 = vpop.permute.xlu1 %1476 }
 0x6a1   : > { %1562 = vrot.lane.b32.xlu1 %v10631_v55, %s9613_s27 }
 0x6a4   : > { %v10635_v56 = vpop.permute.xlu1 %1479 }
 0x6a5   : > { %1564 = vrot.lane.b32.xlu1 %v10635_v56, %s9613_s27 }
 0x6a8   : > { %v1559_v58 = vpop.permute.xlu1 %1558 }
 0x70f   : > { %v1561_v59 = vpop.permute.xlu1 %1560 }
 0x713   : > { %v1563_v62 = vpop.permute.xlu1 %1562 }
 0x714   : > { %v1570_v5 = vcombine.low %v1559_v58, %v1563_v62  ;;  %v1571_v6 = vcombine.high %v1559_v58, %v1563_v62 }
 0x716   : > { %v1578_v14 = vrot.slane %v1570_v5, %v10643_v9  ;;  %v1585_v17 = vrot.slane %v1571_v6, %v10643_v9 }
 0x717   : > { %v1565_v7 = vpop.permute.xlu1 %1564 }
 0x718   : > { %v1586_v11 = vcombine.low %v1561_v59, %v1565_v7  ;;  %v1587_v13 = vcombine.high %v1561_v59, %v1565_v7 }
 0x71a   : > { %v1594_v18 = vrot.slane %v1586_v11, %v10643_v9  ;;  %v1601_v50 = vrot.slane %v1587_v13, %v10643_v9 }
 0x71c   : > { %v1619_v20 = vcombine.high %v1585_v17, %v1601_v50  ;;  %v1602_v23 = vcombine.low %v1578_v14, %v1594_v18  ;;  %v1603_v24 = vcombine.high %v1578_v14, %v1594_v18  ;;  %v1618_v32 = vcombine.low %v1585_v17, %v1601_v50 }
 0x71e   : > { %v1610_v25 = vrot.slane %v1602_v23, %v10650_v19  ;;  %v1633_v26 = vrot.slane %v1619_v20, %v10650_v19  ;;  %v1617_v31 = vrot.slane %v1603_v24, %v10650_v19  ;;  %v1626_v38 = vrot.slane %v1618_v32, %v10650_v19 }
 0x720   : > { %v1638_v29 = vpack.c.bf16 %v1610_v25, %v1610_v25  ;;  %v1634_v30 = vcombine.high %v1610_v25, %v9609_v42  ;;  %v1637_v36 = vcombine.high %v1633_v26, %v9609_v42  ;;  %v1640_v37 = vpack.c.bf16 %v1617_v31, %v1617_v31 }
 0x721   : > { %v1642_v47 = vpack.c.bf16 %v1626_v38, %v1626_v38  ;;  %v1635_v48 = vcombine.high %v1617_v31, %v9609_v42  ;;  %v1636_v59 = vcombine.high %v1626_v38, %v9609_v42  ;;  %v1644_v61 = vpack.c.bf16 %v1633_v26, %v1633_v26 }
 0x722   : > { %1794 = vxpose.xlu1.c.b16.start.end [1/1] (short) (narrow) %v1638_v29, 16  ;;  %v1639_v35 = vpack.c.bf16 %v1634_v30, %v1634_v30  ;;  %v1645_v41 = vpack.c.bf16 %v1637_v36, %v1637_v36 }
 0x723   : > { %v1641_v58 = vpack.c.bf16 %v1635_v48, %v1635_v48  ;;  %v1643_v60 = vpack.c.bf16 %v1636_v59, %v1636_v59 }
 0x724   : > { %1810 = vxpose.xlu0.c.b16.start.end [1/1] (short) (narrow) %v1639_v35, 16 }
 0x726   : > { %1826 = vxpose.xlu1.c.b16.start.end [1/1] (short) (narrow) %v1640_v37, 16 }
 0x728   : > { %1906 = vxpose.xlu0.c.b16.start.end [1/1] (short) (narrow) %v1645_v41, 16 }
 0x72a   : > { %1858 = vxpose.xlu1.c.b16.start.end [1/1] (short) (narrow) %v1642_v47, 16 }
 0x72e   : > { %1842 = vxpose.xlu1.c.b16.start.end [1/1] (short) (narrow) %v1641_v58, 16 }
 0x732   : > { %1874 = vxpose.xlu1.c.b16.start.end [1/1] (short) (narrow) %v1643_v60, 16 }
 0x736   : > { %1890 = vxpose.xlu1.c.b16.start.end [1/1] (short) (narrow) %v1644_v61, 16 }
 0x788   : > { %v1802_v62 = vpop.trf.xlu1 }
 0x789   : > { %v1926_v17 = vshrl.u32 %v1802_v62, 16 }
 0x78a   : > { %v1818_v3 = vpop.trf.xlu0 }
 0x78b   : > { %v1927_v6 = vshrl.u32 %v1818_v3, 16  ;;  %v1924_v18 = vpack.i.b16 %v1818_v3, %v1802_v62 }
 0x78c   : > { %v1834_v63 = vpop.trf.xlu1 }
 0x78d   : > { %v1928_v24 = vpack.i.b16 %v1927_v6, %v1926_v17  ;;  %v1934_v25 = vshrl.u32 %v1834_v63, 16 }
 0x78e   : > { %v1914_v10 = vpop.trf.xlu0 }
 0x78f   : > { %v1951_v23 = vshrl.u32 %v1914_v10, 16 }
 0x790   : > { %v1866_v2 = vpop.trf.xlu1 }
 0x791   : > { %v1942_v11 = vshrl.u32 %v1866_v2, 16 }
 0x794   : > { %v1850_v5 = vpop.trf.xlu1 }
 0x795   : > { %v1935_v50 = vshrl.u32 %v1850_v5, 16  ;;  %v1932_v29 = vpack.i.b16 %v1850_v5, %v1834_v63 }
 0x797   : > { %v1936_v35 = vpack.i.b16 %v1935_v50, %v1934_v25 }
 0x798   : > { %v1882_v7 = vpop.trf.xlu1 }
 0x799   : > { %v1940_v13 = vpack.i.b16 %v1882_v7, %v1866_v2  ;;  %v1943_v14 = vshrl.u32 %v1882_v7, 16 }
 0x79b   : > { %v1944_v20 = vpack.i.b16 %v1943_v14, %v1942_v11  ;;  %v1954_v30 = vcombine.low %v1924_v18, %v1940_v13  ;;  %v1955_v59 = vcombine.high %v1924_v18, %v1940_v13 }
 0x79c   : > { %v1898_v26 = vpop.trf.xlu1 }
 0x79d   : > { %v1950_v31 = vshrl.u32 %v1898_v26, 16  ;;  %v1948_v32 = vpack.i.b16 %v1914_v10, %v1898_v26  ;;  %v2022_v36 = vcombine.low %v1928_v24, %v1944_v20  ;;  %v1962_v48 = vrot.slane %v1954_v30, %v10643_v9 }
 0x79e   : > { %v2023_v2 = vcombine.high %v1928_v24, %v1944_v20  ;;  %v1969_v14 = vrot.slane %v1955_v59, %v10643_v9 }
 0x79f   : > { %v1952_v37 = vpack.i.b16 %v1951_v23, %v1950_v31  ;;  %v1970_v38 = vcombine.low %v1932_v29, %v1948_v32  ;;  %v1971_v41 = vcombine.high %v1932_v29, %v1948_v32  ;;  %v2030_v62 = vrot.slane %v2022_v36, %v10643_v9 }
 0x7a0   : > { %v2037_v50 = vrot.slane %v2023_v2, %v10643_v9 }
 0x7a1   : > { %v2038_v47 = vcombine.low %v1936_v35, %v1952_v37  ;;  %v1978_v58 = vrot.slane %v1970_v38, %v10643_v9  ;;  %v2039_v60 = vcombine.high %v1936_v35, %v1952_v37  ;;  %v1985_v7 = vrot.slane %v1971_v41, %v10643_v9 }
 0x7a3   : > { %v1986_v61 = vcombine.low %v1962_v48, %v1978_v58  ;;  %v2046_v63 = vrot.slane %v2038_v47, %v10643_v9  ;;  %v1987_v6 = vcombine.high %v1962_v48, %v1978_v58  ;;  %v2053_v13 = vrot.slane %v2039_v60, %v10643_v9 }
 0x7a4   : > { %v2002_v18 = vcombine.low %v1969_v14, %v1985_v7  ;;  %v2003_v25 = vcombine.high %v1969_v14, %v1985_v7 }
 0x7a5   : > { %v1994_v3 = vrot.slane %v1986_v61, %v10650_v19  ;;  %v2054_v5 = vcombine.low %v2030_v62, %v2046_v63  ;;  %v2055_v11 = vcombine.high %v2030_v62, %v2046_v63  ;;  %v2001_v17 = vrot.slane %v1987_v6, %v10650_v19 }
 0x7a6   : > { %v2070_v23 = vcombine.low %v2037_v50, %v2053_v13  ;;  %v2010_v24 = vrot.slane %v2002_v18, %v10650_v19  ;;  %v2071_v29 = vcombine.high %v2037_v50, %v2053_v13  ;;  %v2017_v30 = vrot.slane %v2003_v25, %v10650_v19 }
 0x7a7   : > { %2090 = vxpose.xlu1.c.b16.start.end [1/1] (short) (narrow) %v1994_v3, 16  ;;  %v2062_v10 = vrot.slane %v2054_v5, %v10650_v19  ;;  %v2069_v20 = vrot.slane %v2055_v11, %v10650_v19  ;;  %v2018_v32 = vcombine.high %v1994_v3, %v9607_v0  ;;  %v2019_v36 = vcombine.high %v2001_v17, %v9607_v0 }
 0x7a8   : > { %v2078_v26 = vrot.slane %v2070_v23, %v10650_v19  ;;  %v2085_v31 = vrot.slane %v2071_v29, %v10650_v19  ;;  %v2020_v38 = vcombine.high %v2010_v24, %v9607_v0  ;;  %v2021_v47 = vcombine.high %v2017_v30, %v9607_v0 }
 0x7a9   : > { %2106 = vxpose.xlu0.c.b16.start.end [1/1] (short) (narrow) %v2062_v10, 16  ;;  %v2086_v35 = vcombine.high %v2062_v10, %v9607_v0  ;;  %v2087_v37 = vcombine.high %v2069_v20, %v9607_v0  ;;  %v1498_v62 = vcombine.low %v10627_v53, %v10635_v56  ;;  %v1499_v63 = vcombine.high %v10627_v53, %v10635_v56 }
 0x7aa   : > { %v2088_v41 = vcombine.high %v2078_v26, %v9607_v0  ;;  %v2089_v48 = vcombine.high %v2085_v31, %v9607_v0  ;;  %v1482_v3 = vcombine.low %v10615_v43, %v10631_v55  ;;  %v1483_v5 = vcombine.high %v10615_v43, %v10631_v55 }
 0x7ab   : > { %2154 = vxpose.xlu1.c.b16.start.end [1/1] (short) (narrow) %v2001_v17, 16  ;;  %v1506_v7 = vrot.slane %v1498_v62, %v10643_v9  ;;  %v1513_v10 = vrot.slane %v1499_v63, %v10643_v9 }
 0x7ac   : > { %v1490_v14 = vrot.slane %v1482_v3, %v10643_v9  ;;  %v1497_v13 = vrot.slane %v1483_v5, %v10643_v9 }
 0x7ad   : > { %2170 = vxpose.xlu0.c.b16.start.end [1/1] (short) (narrow) %v2069_v20, 16 }
 0x7ae   : > { %v1514_v18 = vcombine.low %v1490_v14, %v1506_v7  ;;  %v1515_v53 = vcombine.high %v1490_v14, %v1506_v7  ;;  %v1530_v56 = vcombine.low %v1497_v13, %v1513_v10  ;;  %v1531_v50 = vcombine.high %v1497_v13, %v1513_v10 }
 0x7af   : > { %2218 = vxpose.xlu1.c.b16.start.end [1/1] (short) (narrow) %v2010_v24, 16 }
 0x7b0   : > { %v1522_v24 = vrot.slane %v1514_v18, %v10650_v19  ;;  %v1529_v43 = vrot.slane %v1515_v53, %v10650_v19  ;;  %v1538_v55 = vrot.slane %v1530_v56, %v10650_v19  ;;  %v1545_v25 = vrot.slane %v1531_v50, %v10650_v19 }
 0x7b1   : > { %2234 = vxpose.xlu0.c.b16.start.end [1/1] (short) (narrow) %v2078_v26, 16 }
 0x7b2   : > { %v7723_v18 = vpack.c.bf16 %v1538_v55, %v1522_v24  ;;  %v7724_v53 = vpack.c.bf16 %v1545_v25, %v1529_v43 }
 0x7b3   : > { %2282 = vxpose.xlu1.c.b16.start.end [1/1] (short) (narrow) %v2017_v30, 16  ;;  %v1546_v30 = vcombine.high %v1522_v24, %v9609_v42 }
 0x7b5   : > { %2298 = vxpose.xlu0.c.b16.start.end [1/1] (short) (narrow) %v2085_v31, 16  ;;  %v1547_v31 = vcombine.high %v1529_v43, %v9609_v42  ;;  %v1739_v43 = vrot.slane %v7723_v18, %v10643_v9 }
 0x7b7   : > { %2122 = vxpose.xlu1.c.b16.start.end [1/1] (short) (narrow) %v2018_v32, 16  ;;  %v1548_v32 = vcombine.high %v1538_v55, %v9609_v42  ;;  %v1747_v55 = vrot.slane %v7724_v53, %v10643_v9 }
 0x7b9   : > { %2138 = vxpose.xlu0.c.b16.start.end [1/1] (short) (narrow) %v2086_v35, 16  ;;  %v1549_v35 = vcombine.high %v1545_v25, %v9609_v42  ;;  %v7725_v63 = vpack.c.bf16 %v1548_v32, %v1546_v30 }
 0x7bb   : > { %2186 = vxpose.xlu1.c.b16.start.end [1/1] (short) (narrow) %v2019_v36, 16  ;;  %v7726_v3 = vpack.c.bf16 %v1549_v35, %v1547_v31  ;;  %v1748_v35 = vcombine.low %v1739_v43, %v1747_v55 }
 0x7bd   : > { %2202 = vxpose.xlu0.c.b16.start.end [1/1] (short) (narrow) %v2087_v37, 16 }
 0x7bf   : > { %2250 = vxpose.xlu1.c.b16.start.end [1/1] (short) (narrow) %v2020_v38, 16 }
 0x7c1   : > { %2266 = vxpose.xlu0.c.b16.start.end [1/1] (short) (narrow) %v2088_v41, 16 }
 0x7c3   : > { %2314 = vxpose.xlu1.c.b16.start.end [1/1] (short) (narrow) %v2021_v47, 16 }
 0x7c5   : > { %2330 = vxpose.xlu0.c.b16.start.end [1/1] (short) (narrow) %v2089_v48, 16 }
 0x7c7   : > { %8615 = vset.pattern.permute.xlu1 %v9607_v0 }
 0x80d   : > { %v2098_v58 = vpop.trf.xlu1 }
 0x80f   : > { %v2114_v59 = vpop.trf.xlu0 }
 0x811   : > { %v2162_v60 = vpop.trf.xlu1 }
 0x812   : > { %v2346_v41 = vcombine.low %v2098_v58, %v2162_v60 }
 0x813   : > { %v2178_v61 = vpop.trf.xlu0 }
 0x814   : > { %v2396_v48 = vcombine.low %v2114_v59, %v2178_v61  ;;  %v2353_v56 = vrot.slane %v2346_v41, %v10643_v9  ;;  %v1764_v61 = vrot.slane %v7725_v63, %v10643_v9 }
 0x815   : > { %v2226_v2 = vpop.trf.xlu1 }
 0x817   : > { %v2242_v6 = vpop.trf.xlu0 }
 0x819   : > { %v2290_v11 = vpop.trf.xlu1 }
 0x81a   : > { %v2362_v62 = vcombine.low %v2226_v2, %v2290_v11  ;;  %v1772_v2 = vrot.slane %v7726_v3, %v10643_v9 }
 0x81b   : > { %v2306_v17 = vpop.trf.xlu0 }
 0x81c   : > { %v2412_v5 = vcombine.low %v2242_v6, %v2306_v17  ;;  %v2369_v58 = vrot.slane %v2362_v62, %v10643_v9 }
 0x81d   : > { %v2130_v20 = vpop.trf.xlu1 }
 0x81e   : > { %v2419_v6 = vrot.slane %v2412_v5, %v10643_v9 }
 0x81f   : > { %v2146_v23 = vpop.trf.xlu0 }
 0x821   : > { %v2194_v26 = vpop.trf.xlu1 }
 0x822   : > { %v2354_v37 = vcombine.low %v2130_v20, %v2194_v26  ;;  %v2403_v20 = vrot.slane %v2396_v48, %v10643_v9  ;;  %v1755_v48 = vrot.slane %v1748_v35, %v10650_v19 }
 0x823   : > { %v2210_v29 = vpop.trf.xlu0 }
 0x824   : > { %v2404_v38 = vcombine.low %v2146_v23, %v2210_v29  ;;  %v2361_v10 = vrot.slane %v2354_v37, %v10643_v9  ;;  %v1773_v29 = vcombine.low %v1764_v61, %v1772_v2 }
 0x825   : > { %v2258_v36 = vpop.trf.xlu1 }
 0x826   : > { %v2411_v14 = vrot.slane %v2404_v38, %v10643_v9  ;;  %v2378_v11 = vcombine.low %v2353_v56, %v2361_v10  ;;  %v1780_v38 = vrot.slane %v1773_v29, %v10650_v19  ;;  %v1785_v10 = vshrl.u32 %v1755_v48, 16 }
 0x827   : > { %v2274_v47 = vpop.trf.xlu0 }
 0x828   : > { %v2428_v17 = vcombine.low %v2403_v20, %v2411_v14  ;;  %v2385_v30 = vrot.slane %v2378_v11, %v10650_v19  ;;  %v1784_v63 = vpack.i.b16 %v1780_v38, %v1755_v48  ;;  %v1786_v5 = vshrl.u32 %v1780_v38, 16  ;;  %v1458_v11 = vld [vmem:[#allocation13] sm:$0xff] }
 0x829   : > { %v2322_v7 = vpop.trf.xlu1  ;;  %v1781_v53 = vcombine.high %v1780_v38, %v9607_v0 }
 0x82a   : > { %v2370_v13 = vcombine.low %v2258_v36, %v2322_v7  ;;  %v2435_v31 = vrot.slane %v2428_v17, %v10650_v19 }
 0x82b   : > { %v2338_v50 = vpop.trf.xlu0 }
 0x82c   : > { %v2377_v59 = vrot.slane %v2370_v13, %v10643_v9  ;;  %v2420_v60 = vcombine.low %v2274_v47, %v2338_v50  ;;  %v1787_v13 = vpack.i.b16 %v1786_v5, %v1785_v10  ;;  %v1756_v50 = vcombine.high %v1755_v48, %v9607_v0  ;;  %v1461_v5 = vld [vmem:[#allocation13 + $0x18] sm:$0xff] }
 0x82e   : > { %v2386_v23 = vcombine.low %v2369_v58, %v2377_v59  ;;  %v2427_v24 = vrot.slane %v2420_v60, %v10643_v9  ;;  %v1790_v58 = vpack.i.b16 %v1781_v53, %v1756_v50  ;;  %v1792_v60 = vshrl.u32 %v1781_v53, 16 }
 0x82f   : > { %v1791_v61 = vshrl.u32 %v1756_v50, 16 }
 0x830   : > { %v2393_v25 = vrot.slane %v2386_v23, %v10650_v19  ;;  %v2436_v26 = vcombine.low %v2419_v6, %v2427_v24  ;;  %v7722_v6 = vld [vmem:[%s1077_s11] ss:$0 sm:$0xff] }
 0x831   : > { %v1793_v2 = vpack.i.b16 %v1792_v60, %v1791_v61  ;;  %v1468_v17 = vadd.f32 %v7722_v6, %v1458_v11 }
 0x832   : > { %v2443_v32 = vrot.slane %v2436_v26, %v10650_v19  ;;  %v2394_v36 = vcombine.low %v2385_v30, %v2393_v25  ;;  %v2395_v14 = vcombine.high %v2385_v30, %v2393_v25  ;;  %v1459_v25 = vld [vmem:[#allocation13 + $0x8] sm:$0xff] }
 0x833   : > { %v1469_v30 = vadd.f32 %v7722_v6, %v1459_v25 }
 0x834   : > { %v2444_v37 = vcombine.low %v2435_v31, %v2443_v32  ;;  %v2450_v62 = vshrl.u32 %v2394_v36, 16  ;;  %v2445_v7 = vcombine.high %v2435_v31, %v2443_v32  ;;  %v2458_v20 = vshrl.u32 %v2395_v14, 16 }
 0x836   : > { %v2448_v41 = vpack.i.b16 %v2444_v37, %v2394_v36  ;;  %v2451_v47 = vshrl.u32 %v2444_v37, 16  ;;  %v2456_v18 = vpack.i.b16 %v2445_v7, %v2395_v14  ;;  %v2459_v56 = vshrl.u32 %v2445_v7, 16  ;;  %v1460_v37 = vld [vmem:[#allocation13 + $0x10] sm:$0xff] }
 0x837   : > { %v1471_v14 = vadd.f32 %v7722_v6, %v1461_v5 }
 0x838   : > { %7979 = vmatpush3.bf16.msra.mxu1 %v2448_v41  ;;  %v2452_v3 = vpack.i.b16 %v2451_v47, %v2450_v62  ;;  %v2460_v59 = vpack.i.b16 %v2459_v56, %v2458_v20  ;;  %v1470_v47 = vadd.f32 %v7722_v6, %v1460_v37 }
 0x839   : > { %7984 = vmatprep.subr.bf16.mxu1 %v9609_v42 }
 0x83b   : > { %7981 = vmatmul.mubr.msk.bf16.vlgmr.msra.gmra.mrb[4].mxu1 %vm2462_vm4, %v1784_v63 }
 0x83c   : > { %7985 = vmatpush3.bf16.msra.mxu1 %v2452_v3  ;;  %7986 = vmatprep.mubr.msk.bf16.mxu1 %vm9616_vm3, %v9609_v42 }
 0x83d   : > { %7990 = vmatprep.subr.bf16.mxu1 %v9609_v42 }
 0x843   : > { %7987 = vmatmul.mubr.msk.bf16.vlgmr.msra.gmra.mrb[8].mxu1 %vm2462_vm4, %v1787_v13 }
 0x844   : > { %7991 = vmatpush3.bf16.msra.mxu1 %v2456_v18  ;;  %7992 = vmatprep.mubr.msk.bf16.mxu1 %vm9616_vm3, %v9609_v42 }
 0x845   : > { %7996 = vmatprep.subr.bf16.mxu1 %v9609_v42 }
 0x84b   : > { %7993 = vmatmul.mubr.msk.bf16.vlgmr.msra.gmra.mrb[12].mxu1 %vm2462_vm4, %v1790_v58 }
 0x84c   : > { %7997 = vmatpush3.bf16.msra.mxu1 %v2460_v59  ;;  %7998 = vmatprep.mubr.msk.bf16.mxu1 %vm9616_vm3, %v9609_v42 }
 0x84d   : > { %8008 = vmatprep.subr.bf16.mxu1 %v9609_v42 }
 0x853   : > { %7999 = vmatmul.mubr.msk.bf16.vlgmr.msra.gmra.mrb[16].mxu1 %vm2462_vm4, %v1793_v2 }
 0x854   : > { %8010 = vmatprep.mubr.msk.bf16.mxu1 %vm9616_vm3, %v9609_v42 }
 0x90e   : > { %v2500_v23 = vpop.f32.mrb[4].mxu1 }
 0x90f   : > { %v2501_v24 = vadd.f32 %v2500_v23, %v1468_v17  ;;  %v7982_v43 = vpop.f32.mrb[5].mxu1 }
 0x910   : > { %v2503_v55 = vpop.f32.mrb[6].mxu1 }
 0x911   : > { %v7983_v26 = vpop.f32.mrb[7].mxu1  ;;  %v2636_v29 = vsel %vm2635_vm5, %v2501_v24, -inf }
 0x912   : > { %2637 = vmax.xlane.f32.xlu1 %v2636_v29 }
 0x916   : > { %v2543_v31 = vpop.f32.mrb[8].mxu1 }
 0x917   : > { %v2544_v32 = vadd.f32 %v2543_v31, %v1469_v30  ;;  %v7988_v35 = vpop.f32.mrb[9].mxu1 }
 0x918   : > { %v2546_v36 = vpop.f32.mrb[10].mxu1 }
 0x919   : > { %v7989_v38 = vpop.f32.mrb[11].mxu1  ;;  %v2639_v41 = vsel %vm2635_vm5, %v2544_v32, -inf }
 0x91a   : > { %2640 = vmax.xlane.f32.xlu0 %v2639_v41 }
 0x91e   : > { %v2586_v48 = vpop.f32.mrb[12].mxu1 }
 0x91f   : > { %v2587_v62 = vadd.f32 %v2586_v48, %v1470_v47  ;;  %v7994_v63 = vpop.f32.mrb[13].mxu1 }
 0x920   : > { %v2589_v3 = vpop.f32.mrb[14].mxu1 }
 0x921   : > { %v7995_v7 = vpop.f32.mrb[15].mxu1  ;;  %v2642_v10 = vsel %vm2635_vm5, %v2587_v62, -inf }
 0x922   : > { %2643 = vmax.xlane.f32.xlu1 %v2642_v10 }
 0x926   : > { %v2629_v13 = vpop.f32.mrb[16].mxu1 }
 0x927   : > { %v2630_v18 = vadd.f32 %v2629_v13, %v1471_v14  ;;  %v8000_v53 = vpop.f32.mrb[17].mxu1 }
 0x928   : > { %v2632_v56 = vpop.f32.mrb[18].mxu1 }
 0x929   : > { %v8001_v50 = vpop.f32.mrb[19].mxu1  ;;  %v2645_v20 = vsel %vm2635_vm5, %v2630_v18, -inf }
 0x92a   : > { %2646 = vmax.xlane.f32.xlu0 %v2645_v20 }
 0x933   : > { %1647 = vrot.lane.b32.xlu1 %v10619_v44, %s9610_s0 }
 0x99f   : > { %v2638_v58 = vpop.xlane.xlu1 %2637 }
 0x9a0   : > { %v2648_v59 = vsub.f32 %v2501_v24, %v2638_v58 }
 0x9a2   : > { %v2652_v60 = vmul.f32 1.442695, %v2648_v59 }
 0x9a4   : > { %8618 = vpow2.f32 %v2652_v60 }
 0x9a7   : > { %v2641_v61 = vpop.xlane.xlu0 %2640 }
 0x9a8   : > { %v2649_v2 = vsub.f32 %v2544_v32, %v2641_v61 }
 0x9aa   : > { %v2654_v11 = vmul.f32 1.442695, %v2649_v2 }
 0x9ac   : > { %8620 = vpow2.f32 %v2654_v11 }
 0x9ae   : > { %v10753_v6 = vpop.eup %8618 }
 0x9af   : > { %v2660_v17 = vsel %vm2635_vm5, %v10753_v6, 0.0  ;;  %v2644_v24 = vpop.xlane.xlu1 %2643 }
 0x9b0   : > { %2661 = vadd.xlane.f32.xlu1 %v2660_v17  ;;  %v2650_v55 = vsub.f32 %v2587_v62, %v2644_v24 }
 0x9b2   : > { %v2656_v25 = vmul.f32 1.442695, %v2650_v55 }
 0x9b3   : > { %v1648_v37 = vpop.permute.xlu1 %1647 }
 0x9b4   : > { %8622 = vpow2.f32 %v2656_v25 }
 0x9b6   : > { %v10757_v23 = vpop.eup %8620 }
 0x9b7   : > { %v2663_v43 = vsel %vm2635_vm5, %v10757_v23, 0.0  ;;  %v2647_v26 = vpop.xlane.xlu0 %2646 }
 0x9b8   : > { %2664 = vadd.xlane.f32.xlu0 %v2663_v43  ;;  %v2651_v29 = vsub.f32 %v2630_v18, %v2647_v26 }
 0x9ba   : > { %v2658_v30 = vmul.f32 1.442695, %v2651_v29 }
 0x9bc   : > { %8624 = vpow2.f32 %v2658_v30 }
 0x9be   : > { %v10765_v31 = vpop.eup %8622 }
 0x9bf   : > { %v2666_v32 = vsel %vm2635_vm5, %v10765_v31, 0.0 }
 0x9c1   : > { %1653 = vrot.lane.b32.xlu1 %v10619_v44, %s9612_s15 }
 0x9c6   : > { %v10769_v35 = vpop.eup %8624 }
 0x9c7   : > { %v2669_v36 = vsel %vm2635_vm5, %v10769_v35, 0.0 }
 0x9ce   : > { %1650 = vrot.lane.b32.xlu0 %v10619_v44, %s9611_s29 }
 0x9e5   : > { %2667 = vadd.xlane.f32.xlu1 %v2666_v32 }
 0x9ed   : > { %2670 = vadd.xlane.f32.xlu0 %v2669_v36 }
 0xa3d   : > { %v2662_v38 = vpop.xlane.xlu1 %2661 }
 0xa3e   : > { %8626 = vrcp.f32 %v2662_v38 }
 0xa41   : > { %v1654_v41 = vpop.permute.xlu1 %1653 }
 0xa42   : > { %v1672_v48 = vcombine.low %v1648_v37, %v1654_v41  ;;  %v1673_v62 = vcombine.high %v1648_v37, %v1654_v41 }
 0xa44   : > { %v1680_v7 = vrot.slane %v1672_v48, %v10643_v9  ;;  %v1687_v10 = vrot.slane %v1673_v62, %v10643_v9 }
 0xa45   : > { %v2665_v47 = vpop.xlane.xlu0 %2664 }
 0xa46   : > { %8628 = vrcp.f32 %v2665_v47 }
 0xa48   : > { %v8627_v32 = vpop.eup %8626 }
 0xa49   : > { %v1651_v63 = vpop.permute.xlu0 %1650  ;;  %v2676_v48 = vmul.f32 %v8627_v32, %v10753_v6 }
 0xa4a   : > { %v1656_v3 = vcombine.low %v10619_v44, %v1651_v63  ;;  %v1657_v5 = vcombine.high %v10619_v44, %v1651_v63 }
 0xa4c   : > { %v1664_v14 = vrot.slane %v1656_v3, %v10643_v9  ;;  %v1671_v13 = vrot.slane %v1657_v5, %v10643_v9 }
 0xa4e   : > { %v1688_v18 = vcombine.low %v1664_v14, %v1680_v7  ;;  %v1689_v53 = vcombine.high %v1664_v14, %v1680_v7  ;;  %v1704_v56 = vcombine.low %v1671_v13, %v1687_v10  ;;  %v1705_v50 = vcombine.high %v1671_v13, %v1687_v10 }
 0xa50   : > { %v1696_v20 = vrot.slane %v1688_v18, %v10650_v19  ;;  %v1703_v58 = vrot.slane %v1689_v53, %v10650_v19  ;;  %v1712_v44 = vrot.slane %v1704_v56, %v10650_v19  ;;  %v1719_v59 = vrot.slane %v1705_v50, %v10650_v19  ;;  %v8629_v38 = vpop.eup %8628 }
 0xa51   : > { %v2677_v10 = vmul.f32 %v8629_v38, %v10757_v23 }
 0xa52   : > { %v1720_v60 = vcombine.high %v1696_v20, %v9609_v42  ;;  %v1721_v61 = vcombine.high %v1703_v58, %v9609_v42  ;;  %v1722_v2 = vcombine.high %v1712_v44, %v9609_v42  ;;  %v1723_v11 = vcombine.high %v1719_v59, %v9609_v42 }
 0xa53   : > { %v7731_v17 = vpack.c.bf16 %v1712_v44, %v1696_v20  ;;  %v7732_v43 = vpack.c.bf16 %v1719_v59, %v1703_v58  ;;  %v2680_v20 = vpack.c.bf16 %v2676_v48, %v2676_v48  ;;  %v2681_v44 = vpack.c.bf16 %v2677_v10, %v2677_v10 }
 0xa54   : > { %v7733_v24 = vpack.c.bf16 %v1722_v2, %v1720_v60  ;;  %v7734_v55 = vpack.c.bf16 %v1723_v11, %v1721_v61 }
 0xa55   : > { %v2691_v25 = vrot.slane %v7731_v17, %v10643_v9  ;;  %v2699_v26 = vrot.slane %v7732_v43, %v10643_v9 }
 0xa56   : > { %v2716_v29 = vrot.slane %v7733_v24, %v10643_v9  ;;  %v2724_v30 = vrot.slane %v7734_v55, %v10643_v9  ;;  %v3084_v55 = vld [vmem:[#allocation22] sm:$0xff] }
 0xa57   : > { %v2700_v36 = vcombine.low %v2691_v25, %v2699_v26  ;;  %v3085_v25 = vld [vmem:[#allocation22 + $0x8] sm:$0xff]  ;;  %v3086_v26 = vld [vmem:[#allocation22 + $0x10] sm:$0xff] }
 0xa58   : > { %v2725_v37 = vcombine.low %v2716_v29, %v2724_v30  ;;  %v3093_v29 = vpack.c.bf16 %v3085_v25, %v3084_v55 }
 0xa59   : > { %v2707_v41 = vrot.slane %v2700_v36, %v10650_v19 }
 0xa5a   : > { %v2732_v47 = vrot.slane %v2725_v37, %v10650_v19 }
 0xa5b   : > { %v2708_v62 = vcombine.high %v2707_v41, %v9607_v0  ;;  %v2737_v3 = vshrl.u32 %v2707_v41, 16 }
 0xa5c   : > { %v2736_v63 = vpack.i.b16 %v2732_v47, %v2707_v41  ;;  %v2738_v5 = vshrl.u32 %v2732_v47, 16  ;;  %v2733_v7 = vcombine.high %v2732_v47, %v9607_v0 }
 0xa5d   : > { %v2743_v14 = vshrl.u32 %v2708_v62, 16 }
 0xa5e   : > { %v2751_v13 = vsel %vm2749_vm6, %v2736_v63, 0  ;;  %v2739_v18 = vpack.i.b16 %v2738_v5, %v2737_v3  ;;  %v2742_v53 = vpack.i.b16 %v2733_v7, %v2708_v62  ;;  %v2744_v56 = vshrl.u32 %v2733_v7, 16 }
 0xa5f   : > { %8003 = vmatpush3.bf16.msra.mxu0 %v2751_v13 }
 0xa60   : > { %v2797_v50 = vsel %vm2749_vm6, %v2739_v18, 0  ;;  %8014 = vmatprep.subr.bf16.mxu0 %v9609_v42  ;;  %v2745_v6 = vpack.i.b16 %v2744_v56, %v2743_v14  ;;  %v2843_v58 = vsel %vm2749_vm6, %v2742_v53, 0 }
 0xa61   : > { %8009 = vmatpush3.bf16.msra.mxu1 %v2797_v50 }
 0xa62   : > { %8005 = vmatmul.mubr.msk.bf16.vlgmr.msra.gmra.mrb[4].mxu0 %vm2635_vm5, %v2680_v20  ;;  %8020 = vmatprep.subr.bf16.mxu1 %v9609_v42  ;;  %v2889_v23 = vsel %vm2749_vm6, %v2745_v6, 0 }
 0xa63   : > { %8015 = vmatpush3.bf16.msra.mxu0 %v2843_v58  ;;  %8016 = vmatprep.mubr.msk.bf16.mxu0 %vm9616_vm3, %v9609_v42 }
 0xa64   : > { %8011 = vmatmul.mubr.msk.bf16.vlgmr.msra.gmra.mrb[20].mxu1 %vm2635_vm5, %v2681_v44  ;;  %8026 = vmatprep.subr.bf16.mxu0 %v9609_v42 }
 0xa65   : > { %8021 = vmatpush3.bf16.msra.mxu1 %v2889_v23  ;;  %8022 = vmatprep.mubr.msk.bf16.mxu1 %vm9616_vm3, %v9609_v42  ;;  %v3088_v23 = vld [vmem:[#allocation22 + $0x20] sm:$0xff] }
 0xa66   : > { %8038 = vmatprep.subr.bf16.mxu1 %v9609_v42 }
 0xa72   : > { %v2668_v59 = vpop.xlane.xlu1 %2667 }
 0xa73   : > { %8630 = vrcp.f32 %v2668_v59  ;;  %v3089_v59 = vld [vmem:[#allocation22 + $0x28] sm:$0xff] }
 0xa7a   : > { %v2671_v60 = vpop.xlane.xlu0 %2670 }
 0xa7b   : > { %8632 = vrcp.f32 %v2671_v60 }
 0xa7d   : > { %v8631_v61 = vpop.eup %8630 }
 0xa7e   : > { %v2678_v2 = vmul.f32 %v8631_v61, %v10765_v31  ;;  %v3087_v31 = vld [vmem:[#allocation22 + $0x18] sm:$0xff] }
 0xa7f   : > { %v3094_v30 = vpack.c.bf16 %v3087_v31, %v3086_v26  ;;  %v3090_v26 = vld [vmem:[#allocation22 + $0x30] sm:$0xff] }
 0xa80   : > { %v2682_v11 = vpack.c.bf16 %v2678_v2, %v2678_v2 }
 0xa82   : > { %8017 = vmatmul.mubr.msk.bf16.vlgmr.msra.gmra.mrb[8].mxu0 %vm2635_vm5, %v2682_v11 }
 0xa83   : > { %8034 = vmatprep.mubr.msk.bf16.mxu0 %vm9616_vm3, %v9609_v42  ;;  %8027 = vmatpush3.bf16.msra.mxu0 %v3093_v29  ;;  %v3091_v29 = vld [vmem:[#allocation22 + $0x38] sm:$0xff] }
 0xa84   : > { %8028 = vmatprep.subr.bf16.mxu0 %v9609_v42 }
 0xa85   : > { %v8633_v17 = vpop.eup %8632 }
 0xa86   : > { %v2679_v43 = vmul.f32 %v8633_v17, %v10769_v35  ;;  %v3095_v17 = vpack.c.bf16 %v3089_v59, %v3088_v23 }
 0xa87   : > { %8029 = vmatpush3.bf16.msra.mxu0 %v3094_v30 }
 0xa88   : > { %v2683_v24 = vpack.c.bf16 %v2679_v43, %v2679_v43  ;;  %8030 = vmatprep.subr.bf16.mxu0 %v9609_v42 }
 0xa8a   : > { %8023 = vmatmul.mubr.msk.bf16.vlgmr.msra.gmra.mrb[24].mxu1 %vm2635_vm5, %v2683_v24 }
 0xa8b   : > { %8046 = vmatprep.mubr.msk.bf16.mxu1 %vm9616_vm3, %v9609_v42  ;;  %8031 = vmatpush3.bf16.msra.mxu0 %v3095_v17 }
 0xa8c   : > { %8032 = vmatprep.subr.bf16.mxu0 %v9609_v42 }
 0xb35   : > { %v2787_v32 = vpop.f32.mrb[4].mxu0 }
 0xb36   : > { %v8006_v35 = vpop.f32.mrb[5].mxu0 }
 0xb37   : > { %v2790_v36 = vpop.f32.mrb[6].mxu0  ;;  %v2833_v37 = vpop.f32.mrb[20].mxu1 }
 0xb38   : > { %v8007_v38 = vpop.f32.mrb[7].mxu0  ;;  %v8012_v41 = vpop.f32.mrb[21].mxu1  ;;  %v3096_v36 = vpack.c.bf16 %v3091_v29, %v3090_v26  ;;  %v3158_v26 = vld [vmem:[#allocation23 + $0x8] sm:$0xff] }
 0xb39   : > { %v2836_v47 = vpop.f32.mrb[22].mxu1 }
 0xb3a   : > { %v8013_v48 = vpop.f32.mrb[23].mxu1  ;;  %8033 = vmatpush3.bf16.msra.mxu0 %v3096_v36 }
 0xb3b   : > { %8050 = vmatprep.subr.bf16.mxu0 %v9609_v42 }
 0xb55   : > { %v2879_v62 = vpop.f32.mrb[8].mxu0 }
 0xb56   : > { %v2931_v63 = vcombine.low %v2787_v32, %v2879_v62  ;;  %v2932_v3 = vcombine.high %v2787_v32, %v2879_v62  ;;  %v8018_v5 = vpop.f32.mrb[9].mxu0 }
 0xb57   : > { %v2882_v7 = vpop.f32.mrb[10].mxu0 }
 0xb58   : > { %v8019_v10 = vpop.f32.mrb[11].mxu0  ;;  %v2939_v50 = vrot.slane %v2931_v63, %v10643_v9  ;;  %v2946_v20 = vrot.slane %v2932_v3, %v10643_v9 }
 0xb5d   : > { %v2925_v14 = vpop.f32.mrb[24].mxu1 }
 0xb5e   : > { %v2947_v13 = vcombine.low %v2833_v37, %v2925_v14  ;;  %v2948_v18 = vcombine.high %v2833_v37, %v2925_v14  ;;  %v8024_v53 = vpop.f32.mrb[25].mxu1 }
 0xb5f   : > { %v2928_v56 = vpop.f32.mrb[26].mxu1 }
 0xb60   : > { %v2955_v6 = vrot.slane %v2947_v13, %v10643_v9  ;;  %v2962_v58 = vrot.slane %v2948_v18, %v10643_v9  ;;  %v8025_v44 = vpop.f32.mrb[27].mxu1 }
 0xb62   : > { %v2963_v60 = vcombine.low %v2939_v50, %v2955_v6  ;;  %v2964_v61 = vcombine.high %v2939_v50, %v2955_v6  ;;  %v2979_v2 = vcombine.low %v2946_v20, %v2962_v58  ;;  %v2980_v11 = vcombine.high %v2946_v20, %v2962_v58 }
 0xb64   : > { %v2971_v43 = vrot.slane %v2963_v60, %v10650_v19  ;;  %v2978_v24 = vrot.slane %v2964_v61, %v10650_v19  ;;  %v2987_v55 = vrot.slane %v2979_v2, %v10650_v19  ;;  %v2994_v25 = vrot.slane %v2980_v11, %v10650_v19  ;;  %v3296_v60 = vld [vmem:[%s1060_s2] sm:$0xff]  ;;  %s9620_s2 = smov [#allocation43]  }
 0xb66   : > { %v2999_v31 = vcombine.low %v2971_v43, %v2978_v24  ;;  %v7739_v30 = vcombine.high %v2971_v43, %v2978_v24  ;;  %v3015_v32 = vcombine.low %v2987_v55, %v2994_v25  ;;  %v7740_v35 = vcombine.high %v2987_v55, %v2994_v25  ;;  %v3157_v25 = vld [vmem:[#allocation23] sm:$0xff] }
 0xb67   : > { %v3166_v29 = vpack.c.bf16 %v3158_v26, %v3157_v25 }
 0xb68   : > { %v3006_v37 = vrot.slane %v2999_v31, %v10643_v9  ;;  %v3014_v38 = vrot.slane %v7739_v30, %v10643_v9  ;;  %v3022_v41 = vrot.slane %v3015_v32, %v10643_v9  ;;  %v3030_v47 = vrot.slane %v7740_v35, %v10643_v9  ;;  %v3159_v31 = vld [vmem:[#allocation23 + $0x10] sm:$0xff]  ;;  %v3160_v30 = vld [vmem:[#allocation23 + $0x18] sm:$0xff]  ;;  %v3162_v35 = vld [vmem:[#allocation23 + $0x28] sm:$0xff] }
 0xb69   : > { %8039 = vmatpush3.bf16.msra.mxu1 %v3166_v29  ;;  %v3167_v32 = vpack.c.bf16 %v3160_v30, %v3159_v31  ;;  %v3392_v31 = vld [vmem:[#allocation32] sm:$0xff]  ;;  %v3394_v30 = vld [vmem:[#allocation32 + $0x10] sm:$0xff] }
 0xb6a   : > { %v3032_v48 = vcombine.high %v3006_v37, %v3014_v38  ;;  %v3048_v62 = vcombine.high %v3022_v41, %v3030_v47  ;;  %v3031_v63 = vcombine.low %v3006_v37, %v3014_v38  ;;  %v3047_v3 = vcombine.low %v3022_v41, %v3030_v47  ;;  %8040 = vmatprep.subr.bf16.mxu1 %v9609_v42  ;;  %v3163_v37 = vld [vmem:[#allocation23 + $0x30] sm:$0xff]  ;;  %v3164_v38 = vld [vmem:[#allocation23 + $0x38] sm:$0xff]  ;;  %v3214_v47 = vld [vmem:[#allocation25] sm:$0xff] }
 0xb6b   : > { %v3169_v41 = vpack.c.bf16 %v3164_v38, %v3163_v37  ;;  %v3396_v37 = vld [vmem:[#allocation32 + $0x20] sm:$0xff]  ;;  %v3398_v38 = vld [vmem:[#allocation32 + $0x30] sm:$0xff] }
 0xb6c   : > { %v3046_v5 = vrot.slane %v3032_v48, %v10650_v19  ;;  %v3062_v7 = vrot.slane %v3048_v62, %v10650_v19  ;;  %v3039_v10 = vrot.slane %v3031_v63, %v10650_v19  ;;  %v3055_v14 = vrot.slane %v3047_v3, %v10650_v19  ;;  %v3215_v48 = vld [vmem:[#allocation25 + $0x8] sm:$0xff]  ;;  %v3216_v62 = vld [vmem:[#allocation25 + $0x10] sm:$0xff]  ;;  %v3217_v3 = vld [vmem:[#allocation25 + $0x18] sm:$0xff] }
 0xb6d   : > { %8041 = vmatpush3.bf16.msra.mxu1 %v3167_v32  ;;  %v3231_v63 = vpack.c.bf16 %v3215_v48, %v3214_v47  ;;  %v3409_v32 = vpack.c.bf16 %v3394_v30, %v3392_v31  ;;  %v3401_v47 = vld [vmem:[#allocation32 + $0x48] sm:$0xff]  ;;  %v3403_v48 = vld [vmem:[#allocation32 + $0x58] sm:$0xff] }
 0xb6e   : > { %v3065_v13 = vcombine.low %v3046_v5, %v3062_v7  ;;  %v3064_v18 = vcombine.high %v3039_v10, %v3055_v14  ;;  %v3066_v53 = vcombine.high %v3046_v5, %v3062_v7  ;;  %v3063_v56 = vcombine.low %v3039_v10, %v3055_v14  ;;  %8042 = vmatprep.subr.bf16.mxu1 %v9609_v42  ;;  %v3218_v7 = vld [vmem:[#allocation25 + $0x20] sm:$0xff]  ;;  %v3219_v10 = vld [vmem:[#allocation25 + $0x28] sm:$0xff] }
 0xb6f   : > { %v3232_v5 = vpack.c.bf16 %v3217_v3, %v3216_v62  ;;  %v3233_v14 = vpack.c.bf16 %v3219_v10, %v3218_v7  ;;  %v3414_v62 = vpack.c.bf16 %v3403_v48, %v3401_v47  ;;  %v3402_v3 = vld [vmem:[#allocation32 + $0x50] sm:$0xff]  ;;  %v3405_v7 = vld [vmem:[#allocation32 + $0x68] sm:$0xff]  ;;  %v3407_v10 = vld [vmem:[#allocation32 + $0x78] sm:$0xff] }
 0xb70   : > { %3072 = vrot.lane.b32.xlu1 %v3065_v13, %s9617_s1  ;;  %3068 = vrot.lane.b32.xlu0 %v3064_v18, %s9618_s3  ;;  %v3220_v13 = vld [vmem:[#allocation25 + $0x30] sm:$0xff]  ;;  %v3221_v18 = vld [vmem:[#allocation25 + $0x38] sm:$0xff] }
 0xb74   : > { %3076 = vrot.lane.b32.xlu1 %v3066_v53, %s9619_s22  ;;  %v3234_v53 = vpack.c.bf16 %v3221_v18, %v3220_v13  ;;  %v3404_v13 = vld [vmem:[#allocation32 + $0x60] sm:$0xff]  ;;  %v3406_v18 = vld [vmem:[#allocation32 + $0x70] sm:$0xff] }
 0xb78   : > { %3298 = vperm.xlu1 %8615, %v3296_v60  }
 0xbe2   : > { %v3073_v50 = vpop.permute.xlu1 %3072  ;;  %v3069_v20 = vpop.permute.xlu0 %3068 }
 0xbe3   : > { %v3079_v6 = vsel %vm2462_vm4, %v3063_v56, %v3069_v20  ;;  %v3223_v56 = vld [vmem:[#allocation25 + $0x48] sm:$0xff]  ;;  %v3224_v20 = vld [vmem:[#allocation25 + $0x50] sm:$0xff] }
 0xbe4   : > { %v3081_v44 = vsel %vm3080_vm7, %v3079_v6, %v3073_v50  ;;  %v3225_v6 = vld [vmem:[#allocation25 + $0x58] sm:$0xff] }
 0xbe6   : > { %v3077_v58 = vpop.permute.xlu1 %3076 }
 0xbe7   : > { %v3083_v23 = vsel %vm3082_vm8, %v3081_v44, %v3077_v58  ;;  %v3236_v58 = vpack.c.bf16 %v3225_v6, %v3224_v20  ;;  %v3226_v44 = vld [vmem:[#allocation25 + $0x60] sm:$0xff] }
 0xbe8   : > { %v3092_v59 = vpack.c.bf16 %v3083_v23, %v3083_v23  ;;  %v3227_v23 = vld [vmem:[#allocation25 + $0x68] sm:$0xff]  ;;  %v7749_v6 = vld [vmem:[#allocation26] ss:$0 sm:$0xff] }
 0xbea   : > { %8035 = vmatmul.mubr.msk.bf16.vlgmr.msra.gmra.mrb[12].mxu0 %vm1372_vm2, %v3092_v59  ;;  %v3237_v59 = vpack.c.bf16 %v3227_v23, %v3226_v44 }
 0xbeb   : > { %8066 = vmatprep.mubr.msk.bf16.mxu0 %vm9616_vm3, %v9609_v42  ;;  %8051 = vmatpush3.bf16.msra.mxu0 %v3231_v63  ;;  %v3400_v63 = vld [vmem:[#allocation32 + $0x40] sm:$0xff] }
 0xbec   : > { %8052 = vmatprep.subr.bf16.mxu0 %v9609_v42 }
 0xbef   : > { %8053 = vmatpush3.bf16.msra.mxu0 %v3232_v5  ;;  %v3413_v5 = vpack.c.bf16 %v3402_v3, %v3400_v63 }
 0xbf0   : > { %8054 = vmatprep.subr.bf16.mxu0 %v9609_v42 }
 0xbf3   : > { %8055 = vmatpush3.bf16.msra.mxu0 %v3233_v14  ;;  %v3416_v14 = vpack.c.bf16 %v3407_v10, %v3405_v7 }
 0xbf4   : > { %8056 = vmatprep.subr.bf16.mxu0 %v9609_v42 }
 0xbf7   : > { %8057 = vmatpush3.bf16.msra.mxu0 %v3234_v53  ;;  %v3415_v53 = vpack.c.bf16 %v3406_v18, %v3404_v13 }
 0xbf8   : > { %8058 = vmatprep.subr.bf16.mxu0 %v9609_v42 }
 0xcbd   : > { %v3134_v61 = vpop.f32.mrb[12].mxu0 }
 0xcbe   : > { %v10851_v2 = vadd.f32 %v10606_v57, %v3134_v61  ;;  %v8036_v11 = vpop.f32.mrb[13].mxu0  ;;  %v3161_v57 = vld [vmem:[#allocation23 + $0x20] sm:$0xff] }
 0xcbf   : > { %v3137_v17 = vpop.f32.mrb[14].mxu0  ;;  %v3168_v36 = vpack.c.bf16 %v3162_v35, %v3161_v57  ;;  %v3397_v57 = vld [vmem:[#allocation32 + $0x28] sm:$0xff]  ;;  %v3399_v35 = vld [vmem:[#allocation32 + $0x38] sm:$0xff] }
 0xcc0   : > { %v8037_v43 = vpop.f32.mrb[15].mxu0  ;;  %v3141_v24 = vmul.f32 %v10851_v2, %v10851_v2 }
 0xcc1   : > { %8043 = vmatpush3.bf16.msra.mxu1 %v3168_v36  ;;  %v7742_v43 = vld [vmem:[#allocation17] ss:$0 sm:$0xff]  ;;  %v3412_v36 = vpack.c.bf16 %v3399_v35, %v3397_v57 }
 0xcc2   : > { %v3142_v55 = vsel %vm1372_vm2, %v3141_v24, 0.0  ;;  %8044 = vmatprep.subr.bf16.mxu1 %v9609_v42 }
 0xcc3   : > { %3143 = vadd.xlane.f32.xlu0 %v3142_v55  ;;  %v3299_v55 = vpop.permute.xlu1 %3298 }
 0xcc4   : > { %vm3301_vm9 = vcmp.eq.s32.totalorder %v10600_v52, %v3299_v55  ;;  %vm3300_vm10 = vcmp.eq.s32.totalorder %v10597_v51, %v3299_v55 }
 0xcc5   : > { %8045 = vmatpush3.bf16.msra.mxu1 %v3169_v41  ;;  %v3411_v41 = vpack.c.bf16 %v3398_v38, %v3396_v37 }
 0xcc6   : > { %8279 = vmatprep.subr.bf16.mxu1 %v10548_v4  ;;  %v3222_v4 = vld [vmem:[#allocation25 + $0x40] sm:$0xff] }
 0xcc7   : > { %v3235_v50 = vpack.c.bf16 %v3223_v56, %v3222_v4 }
 0xcc9   : > { %8059 = vmatpush3.bf16.msra.mxu0 %v3235_v50 }
 0xcca   : > { %8060 = vmatprep.subr.bf16.mxu0 %v9609_v42 }
 0xccd   : > { %8061 = vmatpush3.bf16.msra.mxu0 %v3236_v58 }
 0xcce   : > { %8062 = vmatprep.subr.bf16.mxu0 %v9609_v42 }
 0xcd1   : > { %8063 = vmatpush3.bf16.msra.mxu0 %v3237_v59 }
 0xcd2   : > { %8064 = vmatprep.subr.bf16.mxu0 %v9609_v42 }
 0xd50   : > { %v3144_v60 = vpop.xlane.xlu0 %3143 }
 0xd51   : > { %v3145_v61 = vmul.f32 0.015625, %v3144_v60 }
 0xd53   : > { %v3146_v11 = vadd.f32 1e-06, %v3145_v61 }
 0xd55   : > { %8634 = vrsqrt.f32 %v3146_v11 }
 0xd5f   : > { %v8635_v17 = vpop.eup %8634 }
 0xd60   : > { %v3148_v24 = vmul.f32 %v8635_v17, %v10851_v2 }
 0xd62   : > { %v3156_v25 = vmul.f32 %v7742_v43, %v3148_v24 }
 0xd64   : > { %v3165_v26 = vpack.c.bf16 %v3156_v25, %v3156_v25 }
 0xd66   : > { %8047 = vmatmul.mubr.msk.bf16.vlgmr.msra.gmra.mrb[28].mxu1 %vm1372_vm2, %v3165_v26 }
 0xd67   : > { %8281 = vmatpush3.bf16.msra.mxu1 %v10550_v8  ;;  %7747 = vmatprep.mubr.msk.f32.mxu1 %vm3301_vm9, %v9608_v54  ;;  %v3228_v8 = vld [vmem:[#allocation25 + $0x70] sm:$0xff] }
 0xd68   : > { %8283 = vmatprep.subr.bf16.mxu1 %v10553_v12  ;;  %v3229_v12 = vld [vmem:[#allocation25 + $0x78] sm:$0xff] }
 0xd6b   : > { %8285 = vmatpush3.bf16.msra.mxu1 %v10556_v15  ;;  %v3238_v15 = vpack.c.bf16 %v3229_v12, %v3228_v8 }
 0xd6c   : > { %8287 = vmatprep.subr.bf16.mxu1 %v10559_v16 }
 0xd6d   : > { %8065 = vmatpush3.bf16.msra.mxu0 %v3238_v15 }
 0xd6f   : > { %8289 = vmatpush3.bf16.msra.mxu1 %v10562_v21 }
 0xd70   : > { %8291 = vmatprep.subr.bf16.mxu1 %v10565_v22 }
 0xd73   : > { %8293 = vmatpush3.bf16.msra.mxu1 %v10568_v27 }
 0xd74   : > { %8295 = vmatprep.subr.bf16.mxu1 %v10571_v28 }
 0xd77   : > { %8297 = vmatpush3.bf16.msra.mxu1 %v10574_v33 }
 0xd78   : > { %8299 = vmatprep.subr.bf16.mxu1 %v10577_v34 }
 0xd7b   : > { %8301 = vmatpush3.bf16.msra.mxu1 %v10580_v39 }
 0xd7c   : > { %8303 = vmatprep.subr.bf16.mxu1 %v10583_v40 }
 0xd7f   : > { %8305 = vmatpush3.bf16.msra.mxu1 %v10586_v45 }
 0xd80   : > { %8307 = vmatprep.subr.bf16.mxu1 %v10589_v46 }
 0xd83   : > { %8309 = vmatpush3.bf16.msra.mxu1 %v10592_v49  ;;  %v3393_v49 = vld [vmem:[#allocation32 + $0x8] sm:$0xff] }
 0xd84   : > { %8070 = vmatprep.subr.bf16.mxu1 %v9609_v42 }
 0xd86   : > { %7748 = vmatmul.mubr.msk.f32.vlgmr.msra.gmra.mrb[32].mxu1 %vm3300_vm10, %v9608_v54  ;;  %v3395_v54 = vld [vmem:[#allocation32 + $0x18] sm:$0xff] }
 0xd87   : > { %8072 = vmatprep.mubr.msk.bf16.mxu1 %vm9616_vm3, %v9609_v42  ;;  %v3410_v29 = vpack.c.bf16 %v3395_v54, %v3393_v49 }
 0xd89   : > { %3420 = vmatprep.subr.bf16.mxu0 %v3410_v29 }
 0xe39   : > { %v3207_v16 = vpop.f32.mrb[28].mxu1 }
 0xe3a   : > { %v3213_v21 = vmax.f32 %v3207_v16, 0.0  ;;  %v8048_v22 = vpop.f32.mrb[29].mxu1 }
 0xe3b   : > { %v3210_v27 = vpop.f32.mrb[30].mxu1 }
 0xe3c   : > { %v3230_v28 = vpack.c.bf16 %v3213_v21, %v3213_v21  ;;  %v8049_v33 = vpop.f32.mrb[31].mxu1 }
 0xe3e   : > { %8067 = vmatmul.mubr.bf16.vlgmr.msra.gmra.mrb[16].mxu0 %v3230_v28 }
 0xe3f   : > { %3452 = vmatprep.mubr.bf16.mxu0 %v9607_v0  ;;  %3421 = vmatpush1.bf16.msra.mxu0 %v3409_v32 }
 0xe40   : > { %3422 = vmatprep.subr.bf16.mxu0 %v3412_v36 }
 0xe43   : > { %3423 = vmatpush1.bf16.msra.mxu0 %v3411_v41 }
 0xe44   : > { %3424 = vmatprep.subr.bf16.mxu0 %v3414_v62 }
 0xe47   : > { %3425 = vmatpush1.bf16.msra.mxu0 %v3413_v5 }
 0xe48   : > { %3426 = vmatprep.subr.bf16.mxu0 %v3416_v14 }
 0xe4b   : > { %3427 = vmatpush1.bf16.msra.mxu0 %v3415_v53 }
 0xe4c   : > { %8082 = vmatprep.subr.bf16.mxu0 %v9609_v42 }
 0xe59   : > { %v7909_v34 = vpop.f32.mrb[32].mxu1 }
 0xe5a   : > { %v7910_v39 = vpop.f32.mrb[33].mxu1 }
 0xe5b   : > { %v10892_v40 = vadd.f32 %v7910_v39, %v7909_v34 }
 0xe5d   : > { %v3376_v45 = vmul.f32 %v10892_v40, %v10892_v40 }
 0xe5f   : > { %v3377_v46 = vsel %vm1372_vm2, %v3376_v45, 0.0 }
 0xe60   : > { %3378 = vadd.xlane.f32.xlu1 %v3377_v46 }
 0xeed   : > { %v3379_v4 = vpop.xlane.xlu1 %3378 }
 0xeee   : > { %v3380_v56 = vmul.f32 0.015625, %v3379_v4 }
 0xef0   : > { %v3381_v50 = vadd.f32 1e-06, %v3380_v56 }
 0xef2   : > { %8636 = vrsqrt.f32 %v3381_v50 }
 0xefc   : > { %v8637_v20 = vpop.eup %8636 }
 0xefd   : > { %v3383_v58 = vmul.f32 %v8637_v20, %v10892_v40 }
 0xeff   : > { %v3391_v44 = vmul.f32 %v7749_v6, %v3383_v58 }
 0xf01   : > { %v3408_v23 = vpack.c.bf16 %v3391_v44, %v3391_v44 }
 0xf03   : > { %7750 = vmatmul.mubr.msk.bf16.vlgmr.msra.gmra.mrb[20].mxu0 %vm1372_vm2, %v3408_v23 }
 0xf04   : > { %8084 = vmatprep.mubr.msk.bf16.mxu0 %vm9616_vm3, %v9609_v42 }
 0xf11   : > { %v10902_v59 = vpop.f32.mrb[16].mxu0 }
 0xf12   : > { %v8068_v60 = vpop.f32.mrb[17].mxu0 }
 0xf13   : > { %v3276_v61 = vpop.f32.mrb[18].mxu0 }
 0xf14   : > { %v8069_v11 = vpop.f32.mrb[19].mxu0 }
 0xfd6   : > { %v10904_v17 = vpop.f32.mrb[20].mxu0 }
 0xfd7   : > { %3469 = vrot.lane.b32.xlu1 %v10904_v17, %s9611_s29  ;;  %3466 = vrot.lane.b32.xlu0 %v10904_v17, %s9610_s0  ;;  %v10910_v43 = vpop.f32.mrb[21].mxu0 }
 0xfd8   : > { %v3458_v24 = vpop.f32.mrb[22].mxu0 }
 0xfd9   : > { %v3459_v55 = vpop.f32.mrb[23].mxu0 }
 0xfdb   : > { %3472 = vrot.lane.b32.xlu0 %v10904_v17, %s9612_s15 }
 0xfdf   : > { %3551 = vrot.lane.b32.xlu0 %v10904_v17, %s9613_s27 }
0x1049   : > { %v10916_v25 = vpop.permute.xlu1 %3469  ;;  %v10918_v26 = vpop.permute.xlu0 %3466 }
0x104a   : > { %3555 = vrot.lane.b32.xlu0 %v10916_v25, %s9613_s27  ;;  %3553 = vrot.lane.b32.xlu1 %v10918_v26, %s9613_s27 }
0x104d   : > { %v10924_v8 = vpop.permute.xlu0 %3472 }
0x104e   : > { %3557 = vrot.lane.b32.xlu1 %v10924_v8, %s9613_s27 }
0x1051   : > { %v3552_v12 = vpop.permute.xlu0 %3551 }
0x10bc   : > { %v3554_v15 = vpop.permute.xlu1 %3553  ;;  %v3556_v16 = vpop.permute.xlu0 %3555 }
0x10bd   : > { %v3563_v21 = vcombine.low %v3552_v12, %v3556_v16  ;;  %v3564_v22 = vcombine.high %v3552_v12, %v3556_v16 }
0x10bf   : > { %v3571_v34 = vrot.slane %v3563_v21, %v10643_v9  ;;  %v3578_v39 = vrot.slane %v3564_v22, %v10643_v9 }
0x10c0   : > { %v3558_v27 = vpop.permute.xlu1 %3557 }
0x10c1   : > { %v3579_v28 = vcombine.low %v3554_v15, %v3558_v27  ;;  %v3580_v33 = vcombine.high %v3554_v15, %v3558_v27 }
0x10c3   : > { %v3587_v45 = vrot.slane %v3579_v28, %v10643_v9  ;;  %v3594_v46 = vrot.slane %v3580_v33, %v10643_v9 }
0x10c5   : > { %v3595_v49 = vcombine.low %v3571_v34, %v3587_v45  ;;  %v3596_v54 = vcombine.high %v3571_v34, %v3587_v45  ;;  %v3611_v29 = vcombine.low %v3578_v39, %v3594_v46  ;;  %v3612_v32 = vcombine.high %v3578_v39, %v3594_v46 }
0x10c7   : > { %v3603_v31 = vrot.slane %v3595_v49, %v10650_v19  ;;  %v3619_v30 = vrot.slane %v3611_v29, %v10650_v19  ;;  %v3610_v36 = vrot.slane %v3596_v54, %v10650_v19  ;;  %v3626_v48 = vrot.slane %v3612_v32, %v10650_v19 }
0x10c9   : > { %v3635_v57 = vpack.c.bf16 %v3619_v30, %v3619_v30  ;;  %v3631_v35 = vpack.c.bf16 %v3603_v31, %v3603_v31  ;;  %v3627_v37 = vcombine.high %v3603_v31, %v9609_v42  ;;  %v3633_v38 = vpack.c.bf16 %v3610_v36, %v3610_v36 }
0x10ca   : > { %v3628_v47 = vcombine.high %v3610_v36, %v9609_v42  ;;  %v3637_v63 = vpack.c.bf16 %v3626_v48, %v3626_v48  ;;  %v3629_v3 = vcombine.high %v3619_v30, %v9609_v42  ;;  %v3630_v7 = vcombine.high %v3626_v48, %v9609_v42 }
0x10cb   : > { %3851 = vxpose.xlu1.c.b16.start.end [1/1] (short) (narrow) %v3635_v57, 16  ;;  %3787 = vxpose.xlu0.c.b16.start.end [1/1] (short) (narrow) %v3631_v35, 16  ;;  %v3632_v41 = vpack.c.bf16 %v3627_v37, %v3627_v37 }
0x10cc   : > { %v3634_v62 = vpack.c.bf16 %v3628_v47, %v3628_v47  ;;  %v3636_v5 = vpack.c.bf16 %v3629_v3, %v3629_v3  ;;  %v3638_v10 = vpack.c.bf16 %v3630_v7, %v3630_v7 }
0x10cf   : > { %3819 = vxpose.xlu0.c.b16.start.end [1/1] (short) (narrow) %v3633_v38, 16  ;;  %3803 = vxpose.xlu1.c.b16.start.end [1/1] (short) (narrow) %v3632_v41, 16 }
0x10d3   : > { %3835 = vxpose.xlu0.c.b16.start.end [1/1] (short) (narrow) %v3634_v62, 16  ;;  %3883 = vxpose.xlu1.c.b16.start.end [1/1] (short) (narrow) %v3637_v63, 16 }
0x10d7   : > { %3867 = vxpose.xlu0.c.b16.start.end [1/1] (short) (narrow) %v3636_v5, 16 }
0x10db   : > { %3899 = vxpose.xlu0.c.b16.start.end [1/1] (short) (narrow) %v3638_v10, 16 }
0x1131   : > { %v3795_v14 = vpop.trf.xlu0  ;;  %v3859_v13 = vpop.trf.xlu1 }
0x1132   : > { %v3935_v58 = vshrl.u32 %v3859_v13, 16  ;;  %v3919_v23 = vshrl.u32 %v3795_v14, 16 }
0x1135   : > { %v3827_v18 = vpop.trf.xlu0  ;;  %v3811_v4 = vpop.trf.xlu1 }
0x1136   : > { %v3920_v50 = vshrl.u32 %v3811_v4, 16  ;;  %v3917_v60 = vpack.i.b16 %v3811_v4, %v3795_v14  ;;  %v3927_v12 = vshrl.u32 %v3827_v18, 16 }
0x1138   : > { %v3921_v15 = vpack.i.b16 %v3920_v50, %v3919_v23 }
0x1139   : > { %v3843_v53 = vpop.trf.xlu0  ;;  %v3891_v6 = vpop.trf.xlu1 }
0x113a   : > { %v3928_v61 = vshrl.u32 %v3843_v53, 16  ;;  %v3943_v55 = vshrl.u32 %v3891_v6, 16  ;;  %v3925_v16 = vpack.i.b16 %v3843_v53, %v3827_v18 }
0x113c   : > { %v3929_v28 = vpack.i.b16 %v3928_v61, %v3927_v12  ;;  %v3491_v12 = vcombine.low %v10918_v26, %v10924_v8 }
0x113d   : > { %v3875_v56 = vpop.trf.xlu0 }
0x113e   : > { %v3936_v20 = vshrl.u32 %v3875_v56, 16  ;;  %v3933_v44 = vpack.i.b16 %v3875_v56, %v3859_v13 }
0x1140   : > { %v3937_v11 = vpack.i.b16 %v3936_v20, %v3935_v58  ;;  %v3947_v21 = vcombine.low %v3917_v60, %v3933_v44  ;;  %v3948_v29 = vcombine.high %v3917_v60, %v3933_v44 }
0x1141   : > { %v3907_v24 = vpop.trf.xlu0 }
0x1142   : > { %v3944_v22 = vshrl.u32 %v3907_v24, 16  ;;  %v3941_v27 = vpack.i.b16 %v3907_v24, %v3891_v6  ;;  %v4015_v33 = vcombine.low %v3921_v15, %v3937_v11  ;;  %v3955_v45 = vrot.slane %v3947_v21, %v10643_v9 }
0x1143   : > { %v4016_v35 = vcombine.high %v3921_v15, %v3937_v11  ;;  %v3962_v47 = vrot.slane %v3948_v29, %v10643_v9  ;;  %v3492_v15 = vcombine.high %v10918_v26, %v10924_v8  ;;  %v3475_v21 = vcombine.low %v10904_v17, %v10916_v25 }
0x1144   : > { %v3945_v34 = vpack.i.b16 %v3944_v22, %v3943_v55  ;;  %v3963_v39 = vcombine.low %v3925_v16, %v3941_v27  ;;  %v3964_v46 = vcombine.high %v3925_v16, %v3941_v27  ;;  %v4023_v31 = vrot.slane %v4015_v33, %v10643_v9 }
0x1145   : > { %v4030_v3 = vrot.slane %v4016_v35, %v10643_v9  ;;  %v3476_v22 = vcombine.high %v10904_v17, %v10916_v25  ;;  %v3506_v33 = vrot.slane %v3492_v15, %v10643_v9 }
0x1146   : > { %v3971_v49 = vrot.slane %v3963_v39, %v10643_v9  ;;  %v4031_v54 = vcombine.low %v3929_v28, %v3945_v34  ;;  %v4032_v30 = vcombine.high %v3929_v28, %v3945_v34  ;;  %v3978_v36 = vrot.slane %v3964_v46, %v10643_v9 }
0x1147   : > { %v3499_v28 = vrot.slane %v3491_v12, %v10643_v9  ;;  %v3483_v39 = vrot.slane %v3475_v21, %v10643_v9 }
0x1148   : > { %v4039_v32 = vrot.slane %v4031_v54, %v10643_v9  ;;  %v3979_v57 = vcombine.low %v3955_v45, %v3971_v49  ;;  %v3980_v41 = vcombine.high %v3955_v45, %v3971_v49  ;;  %v4046_v48 = vrot.slane %v4032_v30, %v10643_v9 }
0x1149   : > { %v3995_v7 = vcombine.low %v3962_v47, %v3978_v36  ;;  %v3996_v18 = vcombine.high %v3962_v47, %v3978_v36  ;;  %v3490_v45 = vrot.slane %v3476_v22, %v10643_v9  ;;  %v3507_v49 = vcombine.low %v3483_v39, %v3499_v28 }
0x114a   : > { %v3987_v37 = vrot.slane %v3979_v57, %v10650_v19  ;;  %v4047_v38 = vcombine.low %v4023_v31, %v4039_v32  ;;  %v4048_v63 = vcombine.high %v4023_v31, %v4039_v32  ;;  %v3994_v5 = vrot.slane %v3980_v41, %v10650_v19 }
0x114b   : > { %v4063_v14 = vcombine.low %v4030_v3, %v4046_v48  ;;  %v4003_v13 = vrot.slane %v3995_v7, %v10650_v19  ;;  %v4064_v4 = vcombine.high %v4030_v3, %v4046_v48  ;;  %v4010_v56 = vrot.slane %v3996_v18, %v10650_v19 }
0x114c   : > { %4083 = vxpose.xlu1.c.b16.start.end [1/1] (short) (narrow) %v3987_v37, 16  ;;  %v4055_v62 = vrot.slane %v4047_v38, %v10650_v19  ;;  %v4062_v10 = vrot.slane %v4048_v63, %v10650_v19  ;;  %v4011_v20 = vcombine.high %v3987_v37, %v9607_v0  ;;  %v4012_v58 = vcombine.high %v3994_v5, %v9607_v0 }
0x114d   : > { %v4071_v53 = vrot.slane %v4063_v14, %v10650_v19  ;;  %v4078_v50 = vrot.slane %v4064_v4, %v10650_v19  ;;  %v4013_v23 = vcombine.high %v4003_v13, %v9607_v0  ;;  %v4014_v61 = vcombine.high %v4010_v56, %v9607_v0 }
0x114e   : > { %4099 = vxpose.xlu0.c.b16.start.end [1/1] (short) (narrow) %v4055_v62, 16  ;;  %v4079_v6 = vcombine.high %v4055_v62, %v9607_v0  ;;  %v4080_v44 = vcombine.high %v4062_v10, %v9607_v0  ;;  %v3508_v26 = vcombine.high %v3483_v39, %v3499_v28  ;;  %v3523_v8 = vcombine.low %v3490_v45, %v3506_v33 }
0x114f   : > { %v4081_v60 = vcombine.high %v4071_v53, %v9607_v0  ;;  %v4082_v11 = vcombine.high %v4078_v50, %v9607_v0  ;;  %v3524_v54 = vcombine.high %v3490_v45, %v3506_v33  ;;  %v3515_v30 = vrot.slane %v3507_v49, %v10650_v19 }
0x1150   : > { %4147 = vxpose.xlu1.c.b16.start.end [1/1] (short) (narrow) %v3994_v5, 16  ;;  %v3522_v17 = vrot.slane %v3508_v26, %v10650_v19  ;;  %v3531_v25 = vrot.slane %v3523_v8, %v10650_v19 }
0x1151   : > { %v3538_v32 = vrot.slane %v3524_v54, %v10650_v19  ;;  %v3539_v36 = vcombine.high %v3515_v30, %v9609_v42 }
0x1152   : > { %4163 = vxpose.xlu0.c.b16.start.end [1/1] (short) (narrow) %v4062_v10, 16  ;;  %v3540_v37 = vcombine.high %v3522_v17, %v9609_v42  ;;  %v3541_v38 = vcombine.high %v3531_v25, %v9609_v42  ;;  %v7751_v10 = vpack.c.bf16 %v3531_v25, %v3515_v30 }
0x1153   : > { %v3542_v41 = vcombine.high %v3538_v32, %v9609_v42  ;;  %v7752_v14 = vpack.c.bf16 %v3538_v32, %v3522_v17 }
0x1154   : > { %4211 = vxpose.xlu1.c.b16.start.end [1/1] (short) (narrow) %v4003_v13, 16  ;;  %v7753_v62 = vpack.c.bf16 %v3541_v38, %v3539_v36 }
0x1155   : > { %v7754_v63 = vpack.c.bf16 %v3542_v41, %v3540_v37 }
0x1156   : > { %4227 = vxpose.xlu0.c.b16.start.end [1/1] (short) (narrow) %v4071_v53, 16 }
0x1158   : > { %4275 = vxpose.xlu1.c.b16.start.end [1/1] (short) (narrow) %v4010_v56, 16  ;;  %v3757_v56 = vrot.slane %v7753_v62, %v10643_v9 }
0x115a   : > { %4291 = vxpose.xlu0.c.b16.start.end [1/1] (short) (narrow) %v4078_v50, 16  ;;  %v3765_v50 = vrot.slane %v7754_v63, %v10643_v9 }
0x115c   : > { %4115 = vxpose.xlu1.c.b16.start.end [1/1] (short) (narrow) %v4011_v20, 16  ;;  %v3766_v22 = vcombine.low %v3757_v56, %v3765_v50  ;;  %v3463_v56 = vld [vmem:[#allocation14 + $0x10] sm:$0xff] }
0x115e   : > { %4131 = vxpose.xlu0.c.b16.start.end [1/1] (short) (narrow) %v4079_v6, 16  ;;  %v3773_v49 = vrot.slane %v3766_v22, %v10650_v19 }
0x1160   : > { %4179 = vxpose.xlu1.c.b16.start.end [1/1] (short) (narrow) %v4012_v58, 16  ;;  %v3774_v32 = vcombine.high %v3773_v49, %v9607_v0  ;;  %v3779_v62 = vshrl.u32 %v3773_v49, 16 }
0x1162   : > { %4195 = vxpose.xlu0.c.b16.start.end [1/1] (short) (narrow) %v4080_v44, 16 }
0x1164   : > { %4243 = vxpose.xlu1.c.b16.start.end [1/1] (short) (narrow) %v4013_v23, 16 }
0x1166   : > { %4259 = vxpose.xlu0.c.b16.start.end [1/1] (short) (narrow) %v4081_v60, 16  ;;  %v3732_v60 = vrot.slane %v7751_v10, %v10643_v9 }
0x1168   : > { %4307 = vxpose.xlu1.c.b16.start.end [1/1] (short) (narrow) %v4014_v61, 16  ;;  %v3740_v61 = vrot.slane %v7752_v14, %v10643_v9  ;;  %v3785_v14 = vshrl.u32 %v3774_v32, 16 }
0x116a   : > { %4323 = vxpose.xlu0.c.b16.start.end [1/1] (short) (narrow) %v4082_v11, 16  ;;  %v3741_v39 = vcombine.low %v3732_v60, %v3740_v61 }
0x11b2   : > { %v4091_v24 = vpop.trf.xlu1 }
0x11b4   : > { %v4107_v55 = vpop.trf.xlu0 }
0x11b6   : > { %v4155_v16 = vpop.trf.xlu1 }
0x11b7   : > { %v4339_v13 = vcombine.low %v4091_v24, %v4155_v16 }
0x11b8   : > { %v4171_v27 = vpop.trf.xlu0 }
0x11b9   : > { %v4389_v53 = vcombine.low %v4107_v55, %v4171_v27  ;;  %v4346_v11 = vrot.slane %v4339_v13, %v10643_v9 }
0x11ba   : > { %v4219_v34 = vpop.trf.xlu1 }
0x11bb   : > { %v4396_v55 = vrot.slane %v4389_v53, %v10643_v9  ;;  %v3461_v53 = vld [vmem:[#allocation14] sm:$0xff] }
0x11bc   : > { %v4235_v46 = vpop.trf.xlu0 }
0x11be   : > { %v4283_v29 = vpop.trf.xlu1 }
0x11bf   : > { %v4355_v4 = vcombine.low %v4219_v34, %v4283_v29  ;;  %v3748_v29 = vrot.slane %v3741_v39, %v10650_v19 }
0x11c0   : > { %v4299_v31 = vpop.trf.xlu0 }
0x11c1   : > { %v4405_v20 = vcombine.low %v4235_v46, %v4299_v31  ;;  %v4362_v12 = vrot.slane %v4355_v4, %v10643_v9  ;;  %v3749_v37 = vcombine.high %v3748_v29, %v9607_v0  ;;  %v3777_v41 = vpack.i.b16 %v3773_v49, %v3748_v29 }
0x11c2   : > { %v4123_v57 = vpop.trf.xlu1 }
0x11c3   : > { %v4412_v21 = vrot.slane %v4405_v20, %v10643_v9  ;;  %v3784_v13 = vshrl.u32 %v3749_v37, 16 }
0x11c4   : > { %v4139_v35 = vpop.trf.xlu0 }
0x11c6   : > { %v4187_v47 = vpop.trf.xlu1 }
0x11c7   : > { %v4347_v5 = vcombine.low %v4123_v57, %v4187_v47  ;;  %v3783_v47 = vpack.i.b16 %v3774_v32, %v3749_v37 }
0x11c8   : > { %v4203_v48 = vpop.trf.xlu0 }
0x11c9   : > { %v4397_v7 = vcombine.low %v4139_v35, %v4203_v48  ;;  %v4354_v58 = vrot.slane %v4347_v5, %v10643_v9 }
0x11ca   : > { %v4251_v3 = vpop.trf.xlu1 }
0x11cb   : > { %v4404_v44 = vrot.slane %v4397_v7, %v10643_v9  ;;  %v4371_v27 = vcombine.low %v4346_v11, %v4354_v58 }
0x11cc   : > { %v4267_v18 = vpop.trf.xlu0 }
0x11cd   : > { %v4421_v28 = vcombine.low %v4396_v55, %v4404_v44  ;;  %v4378_v26 = vrot.slane %v4371_v27, %v10650_v19  ;;  %v3462_v55 = vld [vmem:[#allocation14 + $0x8] sm:$0xff] }
0x11ce   : > { %v4315_v6 = vpop.trf.xlu1 }
0x11cf   : > { %v4363_v23 = vcombine.low %v4251_v3, %v4315_v6  ;;  %v4428_v8 = vrot.slane %v4421_v28, %v10650_v19  ;;  %v3778_v3 = vshrl.u32 %v3748_v29, 16 }
0x11d0   : > { %v4331_v24 = vpop.trf.xlu0 }
0x11d1   : > { %v4370_v15 = vrot.slane %v4363_v23, %v10643_v9  ;;  %v4413_v16 = vcombine.low %v4267_v18, %v4331_v24  ;;  %v3780_v7 = vpack.i.b16 %v3779_v62, %v3778_v3  ;;  %v3786_v18 = vpack.i.b16 %v3785_v14, %v3784_v13 }
0x11d3   : > { %v4379_v33 = vcombine.low %v4362_v12, %v4370_v15  ;;  %v4420_v34 = vrot.slane %v4413_v16, %v10643_v9 }
0x11d5   : > { %v4386_v45 = vrot.slane %v4379_v33, %v10650_v19  ;;  %v4429_v46 = vcombine.low %v4412_v21, %v4420_v34  ;;  %v3464_v33 = vld [vmem:[#allocation14 + $0x18] sm:$0xff] }
0x11d7   : > { %v4436_v54 = vrot.slane %v4429_v46, %v10650_v19  ;;  %v4387_v31 = vcombine.low %v4378_v26, %v4386_v45  ;;  %v4388_v30 = vcombine.high %v4378_v26, %v4386_v45 }
0x11d9   : > { %v4437_v17 = vcombine.low %v4428_v8, %v4436_v54  ;;  %v4438_v25 = vcombine.high %v4428_v8, %v4436_v54  ;;  %v4443_v38 = vshrl.u32 %v4387_v31, 16  ;;  %v4451_v5 = vshrl.u32 %v4388_v30, 16 }
0x11db   : > { %v4441_v57 = vpack.i.b16 %v4437_v17, %v4387_v31  ;;  %v4449_v35 = vpack.i.b16 %v4438_v25, %v4388_v30  ;;  %v4444_v36 = vshrl.u32 %v4437_v17, 16  ;;  %v4452_v63 = vshrl.u32 %v4438_v25, 16 }
0x11dd   : > { %8071 = vmatpush3.bf16.msra.mxu1 %v4441_v57  ;;  %8083 = vmatpush3.bf16.msra.mxu0 %v4449_v35  ;;  %v4445_v48 = vpack.i.b16 %v4444_v36, %v4443_v38  ;;  %v4453_v10 = vpack.i.b16 %v4452_v63, %v4451_v5 }
0x11de   : > { %8076 = vmatprep.subr.bf16.mxu1 %v9609_v42  ;;  %8094 = vmatprep.subr.bf16.mxu0 %v9609_v42 }
0x11e0   : > { %8073 = vmatmul.mubr.msk.bf16.vlgmr.msra.gmra.mrb[36].mxu1 %vm2462_vm4, %v3777_v41  ;;  %8085 = vmatmul.mubr.msk.bf16.vlgmr.msra.gmra.mrb[24].mxu0 %vm2462_vm4, %v3783_v47 }
0x11e1   : > { %8077 = vmatpush3.bf16.msra.mxu1 %v4445_v48  ;;  %8078 = vmatprep.mubr.msk.bf16.mxu1 %vm9616_vm3, %v9609_v42 }
0x11e2   : > { %8088 = vmatprep.subr.bf16.mxu1 %v9609_v42  ;;  %8096 = vmatprep.mubr.msk.bf16.mxu0 %vm9616_vm3, %v9609_v42 }
0x11e8   : > { %8079 = vmatmul.mubr.msk.bf16.vlgmr.msra.gmra.mrb[40].mxu1 %vm2462_vm4, %v3780_v7 }
0x11e9   : > { %8089 = vmatpush3.bf16.msra.mxu1 %v4453_v10  ;;  %8090 = vmatprep.mubr.msk.bf16.mxu1 %vm9616_vm3, %v9609_v42 }
0x11ea   : > { %8100 = vmatprep.subr.bf16.mxu1 %v9609_v42 }
0x11f0   : > { %8091 = vmatmul.mubr.msk.bf16.vlgmr.msra.gmra.mrb[44].mxu1 %vm2462_vm4, %v3786_v18 }
0x11f1   : > { %8102 = vmatprep.mubr.msk.bf16.mxu1 %vm9616_vm3, %v9609_v42 }
0x12b3   : > { %v4492_v4 = vpop.f32.mrb[36].mxu1  ;;  %v4578_v50 = vpop.f32.mrb[24].mxu0 }
0x12b4   : > { %v4493_v20 = vadd.f32 %v4492_v4, %v3461_v53  ;;  %v8074_v6 = vpop.f32.mrb[37].mxu1  ;;  %v8086_v58 = vpop.f32.mrb[25].mxu0  ;;  %v4579_v60 = vadd.f32 %v4578_v50, %v3463_v56 }
0x12b5   : > { %v4495_v44 = vpop.f32.mrb[38].mxu1  ;;  %v4581_v23 = vpop.f32.mrb[26].mxu0 }
0x12b6   : > { %v8075_v61 = vpop.f32.mrb[39].mxu1  ;;  %v8087_v11 = vpop.f32.mrb[27].mxu0  ;;  %v4627_v24 = vsel %vm2635_vm5, %v4493_v20, -inf  ;;  %v4633_v12 = vsel %vm2635_vm5, %v4579_v60, -inf }
0x12b7   : > { %4628 = vmax.xlane.f32.xlu1 %v4627_v24 }
0x12bb   : > { %v4535_v15 = vpop.f32.mrb[40].mxu1  ;;  %4634 = vmax.xlane.f32.xlu1 %v4633_v12 }
0x12bc   : > { %v4536_v16 = vadd.f32 %v4535_v15, %v3462_v55  ;;  %v8080_v21 = vpop.f32.mrb[41].mxu1 }
0x12bd   : > { %v4538_v22 = vpop.f32.mrb[42].mxu1 }
0x12be   : > { %v8081_v27 = vpop.f32.mrb[43].mxu1  ;;  %v4630_v28 = vsel %vm2635_vm5, %v4536_v16, -inf }
0x12bf   : > { %4631 = vmax.xlane.f32.xlu0 %v4630_v28 }
0x12c3   : > { %v4621_v34 = vpop.f32.mrb[44].mxu1 }
0x12c4   : > { %v4622_v39 = vadd.f32 %v4621_v34, %v3464_v33  ;;  %v8092_v45 = vpop.f32.mrb[45].mxu1 }
0x12c5   : > { %v4624_v46 = vpop.f32.mrb[46].mxu1 }
0x12c6   : > { %v8093_v49 = vpop.f32.mrb[47].mxu1  ;;  %v4636_v26 = vsel %vm2635_vm5, %v4622_v39, -inf }
0x12c7   : > { %4637 = vmax.xlane.f32.xlu0 %v4636_v26 }
0x12cc   : > { %3640 = vrot.lane.b32.xlu1 %v10910_v43, %s9610_s0 }
0x1344   : > { %v4629_v8 = vpop.xlane.xlu1 %4628 }
0x1345   : > { %v4639_v54 = vsub.f32 %v4493_v20, %v4629_v8 }
0x1347   : > { %v4643_v29 = vmul.f32 1.442695, %v4639_v54 }
0x1348   : > { %v4635_v36 = vpop.xlane.xlu1 %4634 }
0x1349   : > { %8638 = vpow2.f32 %v4643_v29  ;;  %v4641_v37 = vsub.f32 %v4579_v60, %v4635_v36 }
0x134b   : > { %v4647_v38 = vmul.f32 1.442695, %v4641_v37 }
0x134c   : > { %v4632_v31 = vpop.xlane.xlu0 %4631  ;;  %v3641_v7 = vpop.permute.xlu1 %3640 }
0x134d   : > { %v4640_v30 = vsub.f32 %v4536_v16, %v4632_v31 }
0x134f   : > { %v4645_v17 = vmul.f32 1.442695, %v4640_v30 }
0x1351   : > { %8640 = vpow2.f32 %v4645_v17 }
0x1352   : > { %8642 = vpow2.f32 %v4647_v38 }
0x1353   : > { %v11026_v25 = vpop.eup %8638 }
0x1354   : > { %v4651_v32 = vsel %vm2635_vm5, %v11026_v25, 0.0  ;;  %v4638_v41 = vpop.xlane.xlu0 %4637 }
0x1355   : > { %4652 = vadd.xlane.f32.xlu1 %v4651_v32  ;;  %v4642_v47 = vsub.f32 %v4622_v39, %v4638_v41 }
0x1357   : > { %v4649_v48 = vmul.f32 1.442695, %v4642_v47 }
0x1359   : > { %8644 = vpow2.f32 %v4649_v48 }
0x135b   : > { %v11030_v57 = vpop.eup %8640 }
0x135c   : > { %v4654_v35 = vsel %vm2635_vm5, %v11030_v57, 0.0  ;;  %v11038_v62 = vpop.eup %8642 }
0x135d   : > { %4655 = vadd.xlane.f32.xlu0 %v4654_v35  ;;  %v4657_v63 = vsel %vm2635_vm5, %v11038_v62, 0.0 }
0x1363   : > { %v11042_v3 = vpop.eup %8644 }
0x1364   : > { %v4660_v5 = vsel %vm2635_vm5, %v11042_v3, 0.0 }
0x1366   : > { %3646 = vrot.lane.b32.xlu1 %v10910_v43, %s9612_s15 }
0x1373   : > { %3643 = vrot.lane.b32.xlu0 %v10910_v43, %s9611_s29 }
0x138a   : > { %4658 = vadd.xlane.f32.xlu1 %v4657_v63 }
0x1392   : > { %4661 = vadd.xlane.f32.xlu0 %v4660_v5 }
0x13e2   : > { %v4653_v10 = vpop.xlane.xlu1 %4652 }
0x13e3   : > { %8646 = vrcp.f32 %v4653_v10 }
0x13e6   : > { %v3647_v14 = vpop.permute.xlu1 %3646 }
0x13e7   : > { %v3665_v18 = vcombine.low %v3641_v7, %v3647_v14  ;;  %v3666_v53 = vcombine.high %v3641_v7, %v3647_v14 }
0x13e9   : > { %v3673_v20 = vrot.slane %v3665_v18, %v10643_v9  ;;  %v3680_v6 = vrot.slane %v3666_v53, %v10643_v9 }
0x13ea   : > { %v4656_v13 = vpop.xlane.xlu0 %4655 }
0x13eb   : > { %8648 = vrcp.f32 %v4656_v13 }
0x13ed   : > { %v8647_v26 = vpop.eup %8646 }
0x13ee   : > { %v3644_v4 = vpop.permute.xlu0 %3643  ;;  %v4667_v17 = vmul.f32 %v8647_v26, %v11026_v25 }
0x13ef   : > { %v3649_v56 = vcombine.low %v10910_v43, %v3644_v4  ;;  %v3650_v50 = vcombine.high %v10910_v43, %v3644_v4 }
0x13f0   : > { %v4671_v14 = vpack.c.bf16 %v4667_v17, %v4667_v17 }
0x13f1   : > { %v3657_v58 = vrot.slane %v3649_v56, %v10643_v9  ;;  %v3664_v44 = vrot.slane %v3650_v50, %v10643_v9 }
0x13f3   : > { %v3681_v23 = vcombine.low %v3657_v58, %v3673_v20  ;;  %v3682_v60 = vcombine.high %v3657_v58, %v3673_v20  ;;  %v3697_v61 = vcombine.low %v3664_v44, %v3680_v6  ;;  %v3698_v11 = vcombine.high %v3664_v44, %v3680_v6 }
0x13f5   : > { %v3689_v24 = vrot.slane %v3681_v23, %v10650_v19  ;;  %v3696_v55 = vrot.slane %v3682_v60, %v10650_v19  ;;  %v3705_v43 = vrot.slane %v3697_v61, %v10650_v19  ;;  %v3712_v12 = vrot.slane %v3698_v11, %v10650_v19  ;;  %v8649_v29 = vpop.eup %8648  ;;  %v5072_v23 = vld [vmem:[#allocation34] sm:$0xff]  ;;  %v5073_v60 = vld [vmem:[#allocation34 + $0x8] sm:$0xff]  ;;  %v5074_v61 = vld [vmem:[#allocation34 + $0x10] sm:$0xff] }
0x13f6   : > { %v4668_v41 = vmul.f32 %v8649_v29, %v11030_v57  ;;  %v5081_v11 = vpack.c.bf16 %v5073_v60, %v5072_v23 }
0x13f7   : > { %v3713_v15 = vcombine.high %v3689_v24, %v9609_v42  ;;  %v3714_v16 = vcombine.high %v3696_v55, %v9609_v42  ;;  %v3715_v21 = vcombine.high %v3705_v43, %v9609_v42  ;;  %v3716_v22 = vcombine.high %v3712_v12, %v9609_v42 }
0x13f8   : > { %v7759_v27 = vpack.c.bf16 %v3705_v43, %v3689_v24  ;;  %v7760_v28 = vpack.c.bf16 %v3712_v12, %v3696_v55  ;;  %v4672_v18 = vpack.c.bf16 %v4668_v41, %v4668_v41 }
0x13f9   : > { %v7761_v33 = vpack.c.bf16 %v3715_v21, %v3713_v15  ;;  %v7762_v34 = vpack.c.bf16 %v3716_v22, %v3714_v16 }
0x13fa   : > { %v4682_v39 = vrot.slane %v7759_v27, %v10643_v9  ;;  %v4690_v45 = vrot.slane %v7760_v28, %v10643_v9 }
0x13fb   : > { %v4707_v46 = vrot.slane %v7761_v33, %v10643_v9  ;;  %v4715_v49 = vrot.slane %v7762_v34, %v10643_v9 }
0x13fc   : > { %v4691_v8 = vcombine.low %v4682_v39, %v4690_v45 }
0x13fd   : > { %v4716_v54 = vcombine.low %v4707_v46, %v4715_v49 }
0x13fe   : > { %v4698_v31 = vrot.slane %v4691_v8, %v10650_v19 }
0x13ff   : > { %v4723_v30 = vrot.slane %v4716_v54, %v10650_v19 }
0x1400   : > { %v4699_v32 = vcombine.high %v4698_v31, %v9607_v0  ;;  %v4728_v36 = vshrl.u32 %v4698_v31, 16 }
0x1401   : > { %v4727_v35 = vpack.i.b16 %v4723_v30, %v4698_v31  ;;  %v4729_v37 = vshrl.u32 %v4723_v30, 16  ;;  %v4724_v38 = vcombine.high %v4723_v30, %v9607_v0 }
0x1402   : > { %v4734_v47 = vshrl.u32 %v4699_v32, 16 }
0x1403   : > { %v4741_v48 = vsel %vm2749_vm6, %v4727_v35, 0  ;;  %v4730_v63 = vpack.i.b16 %v4729_v37, %v4728_v36  ;;  %v4733_v5 = vpack.i.b16 %v4724_v38, %v4699_v32  ;;  %v4735_v7 = vshrl.u32 %v4724_v38, 16  ;;  %v5076_v35 = vld [vmem:[#allocation34 + $0x20] sm:$0xff]  ;;  %v5077_v36 = vld [vmem:[#allocation34 + $0x28] sm:$0xff] }
0x1404   : > { %8095 = vmatpush3.bf16.msra.mxu0 %v4741_v48  ;;  %v5083_v48 = vpack.c.bf16 %v5077_v36, %v5076_v35 }
0x1405   : > { %v4787_v10 = vsel %vm2749_vm6, %v4730_v63, 0  ;;  %8106 = vmatprep.subr.bf16.mxu0 %v9609_v42  ;;  %v4736_v25 = vpack.i.b16 %v4735_v7, %v4734_v47  ;;  %v4833_v13 = vsel %vm2749_vm6, %v4733_v5, 0 }
0x1406   : > { %8101 = vmatpush3.bf16.msra.mxu1 %v4787_v10 }
0x1407   : > { %8097 = vmatmul.mubr.msk.bf16.vlgmr.msra.gmra.mrb[28].mxu0 %vm2635_vm5, %v4671_v14  ;;  %8112 = vmatprep.subr.bf16.mxu1 %v9609_v42  ;;  %v4879_v57 = vsel %vm2749_vm6, %v4736_v25, 0  ;;  %v5078_v14 = vld [vmem:[#allocation34 + $0x30] sm:$0xff]  ;;  %v5079_v25 = vld [vmem:[#allocation34 + $0x38] sm:$0xff] }
0x1408   : > { %8107 = vmatpush3.bf16.msra.mxu0 %v4833_v13  ;;  %8108 = vmatprep.mubr.msk.bf16.mxu0 %vm9616_vm3, %v9609_v42 }
0x1409   : > { %8103 = vmatmul.mubr.msk.bf16.vlgmr.msra.gmra.mrb[48].mxu1 %vm2635_vm5, %v4672_v18  ;;  %8118 = vmatprep.subr.bf16.mxu0 %v9609_v42 }
0x140a   : > { %8113 = vmatpush3.bf16.msra.mxu1 %v4879_v57  ;;  %8114 = vmatprep.mubr.msk.bf16.mxu1 %vm9616_vm3, %v9609_v42 }
0x140b   : > { %8130 = vmatprep.subr.bf16.mxu1 %v9609_v42 }
0x1417   : > { %v4659_v53 = vpop.xlane.xlu1 %4658 }
0x1418   : > { %8650 = vrcp.f32 %v4659_v53 }
0x141f   : > { %v4662_v4 = vpop.xlane.xlu0 %4661 }
0x1420   : > { %8652 = vrcp.f32 %v4662_v4  ;;  %v5084_v4 = vpack.c.bf16 %v5079_v25, %v5078_v14 }
0x1422   : > { %v8651_v56 = vpop.eup %8650 }
0x1423   : > { %v4669_v50 = vmul.f32 %v8651_v56, %v11038_v62  ;;  %v5075_v62 = vld [vmem:[#allocation34 + $0x18] sm:$0xff] }
0x1424   : > { %v5082_v24 = vpack.c.bf16 %v5075_v62, %v5074_v61 }
0x1425   : > { %v4673_v20 = vpack.c.bf16 %v4669_v50, %v4669_v50 }
0x1427   : > { %8109 = vmatmul.mubr.msk.bf16.vlgmr.msra.gmra.mrb[32].mxu0 %vm2635_vm5, %v4673_v20 }
0x1428   : > { %8126 = vmatprep.mubr.msk.bf16.mxu0 %vm9616_vm3, %v9609_v42  ;;  %8119 = vmatpush3.bf16.msra.mxu0 %v5081_v11 }
0x1429   : > { %8120 = vmatprep.subr.bf16.mxu0 %v9609_v42 }
0x142a   : > { %v8653_v6 = vpop.eup %8652 }
0x142b   : > { %v4670_v58 = vmul.f32 %v8653_v6, %v11042_v3 }
0x142c   : > { %8121 = vmatpush3.bf16.msra.mxu0 %v5082_v24 }
0x142d   : > { %v4674_v44 = vpack.c.bf16 %v4670_v58, %v4670_v58  ;;  %8122 = vmatprep.subr.bf16.mxu0 %v9609_v42 }
0x142f   : > { %8115 = vmatmul.mubr.msk.bf16.vlgmr.msra.gmra.mrb[52].mxu1 %vm2635_vm5, %v4674_v44 }
0x1430   : > { %8138 = vmatprep.mubr.msk.bf16.mxu1 %vm9616_vm3, %v9609_v42  ;;  %8123 = vmatpush3.bf16.msra.mxu0 %v5083_v48 }
0x1431   : > { %8124 = vmatprep.subr.bf16.mxu0 %v9609_v42 }
0x1434   : > { %8125 = vmatpush3.bf16.msra.mxu0 %v5084_v4 }
0x1435   : > { %8142 = vmatprep.subr.bf16.mxu0 %v9609_v42 }
0x14da   : > { %v4777_v55 = vpop.f32.mrb[28].mxu0 }
0x14db   : > { %v8098_v3 = vpop.f32.mrb[29].mxu0 }
0x14dc   : > { %v4780_v43 = vpop.f32.mrb[30].mxu0  ;;  %v4823_v12 = vpop.f32.mrb[48].mxu1 }
0x14dd   : > { %v8099_v15 = vpop.f32.mrb[31].mxu0  ;;  %v8104_v16 = vpop.f32.mrb[49].mxu1 }
0x14de   : > { %v4826_v21 = vpop.f32.mrb[50].mxu1  ;;  %v3279_v15 = vadd.f32 %v10902_v59, %v10851_v2  ;;  %v5205_v59 = vld [vmem:[#allocation37 + $0x20] sm:$0xff] }
0x14df   : > { %v8105_v22 = vpop.f32.mrb[51].mxu1 }
0x14e0   : > { %v3280_v16 = vmul.f32 %v3279_v15, %v3279_v15 }
0x14e2   : > { %v3281_v21 = vsel %vm1372_vm2, %v3280_v16, 0.0 }
0x14fa   : > { %v4869_v27 = vpop.f32.mrb[32].mxu0 }
0x14fb   : > { %v4921_v28 = vcombine.low %v4777_v55, %v4869_v27  ;;  %v4922_v33 = vcombine.high %v4777_v55, %v4869_v27  ;;  %v8110_v34 = vpop.f32.mrb[33].mxu0 }
0x14fc   : > { %v4872_v39 = vpop.f32.mrb[34].mxu0  ;;  %v5202_v34 = vld [vmem:[#allocation37 + $0x8] sm:$0xff] }
0x14fd   : > { %v8111_v45 = vpop.f32.mrb[35].mxu0  ;;  %v4929_v29 = vrot.slane %v4921_v28, %v10643_v9  ;;  %v4936_v31 = vrot.slane %v4922_v33, %v10643_v9  ;;  %v5201_v33 = vld [vmem:[#allocation37] sm:$0xff] }
0x1502   : > { %v4915_v46 = vpop.f32.mrb[52].mxu1 }
0x1503   : > { %v4937_v49 = vcombine.low %v4823_v12, %v4915_v46  ;;  %v4938_v26 = vcombine.high %v4823_v12, %v4915_v46  ;;  %v8116_v8 = vpop.f32.mrb[53].mxu1 }
0x1504   : > { %v4918_v54 = vpop.f32.mrb[54].mxu1  ;;  %v5203_v8 = vld [vmem:[#allocation37 + $0x10] sm:$0xff] }
0x1505   : > { %v4945_v30 = vrot.slane %v4937_v49, %v10643_v9  ;;  %v4952_v17 = vrot.slane %v4938_v26, %v10643_v9  ;;  %v8117_v32 = vpop.f32.mrb[55].mxu1  ;;  %v5210_v49 = vpack.c.bf16 %v5202_v34, %v5201_v33  ;;  %v5204_v54 = vld [vmem:[#allocation37 + $0x18] sm:$0xff] }
0x1506   : > { %v5211_v2 = vpack.c.bf16 %v5204_v54, %v5203_v8 }
0x1507   : > { %v4953_v37 = vcombine.low %v4929_v29, %v4945_v30  ;;  %v4954_v38 = vcombine.high %v4929_v29, %v4945_v30  ;;  %v4969_v41 = vcombine.low %v4936_v31, %v4952_v17  ;;  %v4970_v47 = vcombine.high %v4936_v31, %v4952_v17  ;;  %v5206_v29 = vld [vmem:[#allocation37 + $0x28] sm:$0xff]  ;;  %v5207_v30 = vld [vmem:[#allocation37 + $0x30] sm:$0xff]  ;;  %v5208_v17 = vld [vmem:[#allocation37 + $0x38] sm:$0xff] }
0x1508   : > { %v5212_v31 = vpack.c.bf16 %v5206_v29, %v5205_v59  ;;  %v5213_v32 = vpack.c.bf16 %v5208_v17, %v5207_v30 }
0x1509   : > { %v4961_v63 = vrot.slane %v4953_v37, %v10650_v19  ;;  %v4968_v5 = vrot.slane %v4954_v38, %v10650_v19  ;;  %v4977_v7 = vrot.slane %v4969_v41, %v10650_v19  ;;  %v4984_v10 = vrot.slane %v4970_v47, %v10650_v19  ;;  %v7744_v41 = vld [vmem:[#allocation19] ss:$0 sm:$0xff] }
0x150b   : > { %v4989_v13 = vcombine.low %v4961_v63, %v4968_v5  ;;  %v7767_v18 = vcombine.high %v4961_v63, %v4968_v5  ;;  %v5005_v57 = vcombine.low %v4977_v7, %v4984_v10  ;;  %v7768_v53 = vcombine.high %v4977_v7, %v4984_v10 }
0x150d   : > { %v4996_v56 = vrot.slane %v4989_v13, %v10643_v9  ;;  %v5004_v50 = vrot.slane %v7767_v18, %v10643_v9  ;;  %v5012_v20 = vrot.slane %v5005_v57, %v10643_v9  ;;  %v5020_v6 = vrot.slane %v7768_v53, %v10643_v9  ;;  %v5145_v57 = vld [vmem:[#allocation35] sm:$0xff]  ;;  %v5146_v53 = vld [vmem:[#allocation35 + $0x8] sm:$0xff] }
0x150e   : > { %v5154_v4 = vpack.c.bf16 %v5146_v53, %v5145_v57 }
0x150f   : > { %v5022_v58 = vcombine.high %v4996_v56, %v5004_v50  ;;  %v5038_v44 = vcombine.high %v5012_v20, %v5020_v6  ;;  %v5021_v23 = vcombine.low %v4996_v56, %v5004_v50  ;;  %v5037_v60 = vcombine.low %v5012_v20, %v5020_v6  ;;  %v5147_v56 = vld [vmem:[#allocation35 + $0x10] sm:$0xff]  ;;  %v5148_v50 = vld [vmem:[#allocation35 + $0x18] sm:$0xff]  ;;  %v5150_v6 = vld [vmem:[#allocation35 + $0x28] sm:$0xff] }
0x1510   : > { %8131 = vmatpush3.bf16.msra.mxu1 %v5154_v4  ;;  %v5155_v20 = vpack.c.bf16 %v5148_v50, %v5147_v56 }
0x1511   : > { %v5036_v61 = vrot.slane %v5022_v58, %v10650_v19  ;;  %v5052_v11 = vrot.slane %v5038_v44, %v10650_v19  ;;  %v5029_v62 = vrot.slane %v5021_v23, %v10650_v19  ;;  %v5045_v24 = vrot.slane %v5037_v60, %v10650_v19  ;;  %8132 = vmatprep.subr.bf16.mxu1 %v9609_v42  ;;  %v5151_v44 = vld [vmem:[#allocation35 + $0x30] sm:$0xff]  ;;  %v5152_v23 = vld [vmem:[#allocation35 + $0x38] sm:$0xff] }
0x1512   : > { %v5157_v60 = vpack.c.bf16 %v5152_v23, %v5151_v44 }
0x1513   : > { %v5055_v55 = vcombine.low %v5036_v61, %v5052_v11  ;;  %v5054_v3 = vcombine.high %v5029_v62, %v5045_v24  ;;  %v5056_v43 = vcombine.high %v5036_v61, %v5052_v11  ;;  %v5053_v12 = vcombine.low %v5029_v62, %v5045_v24 }
0x1514   : > { %8133 = vmatpush3.bf16.msra.mxu1 %v5155_v20 }
0x1515   : > { %5062 = vrot.lane.b32.xlu1 %v5055_v55, %s9617_s1  ;;  %5058 = vrot.lane.b32.xlu0 %v5054_v3, %s9618_s3 }
0x1516   : > { %8134 = vmatprep.subr.bf16.mxu1 %v9609_v42 }
0x1519   : > { %5066 = vrot.lane.b32.xlu1 %v5056_v43, %s9619_s22 }
0x1534   : > { %3282 = vadd.xlane.f32.xlu0 %v3281_v21 }
0x1587   : > { %v5063_v22 = vpop.permute.xlu1 %5062  ;;  %v5059_v27 = vpop.permute.xlu0 %5058 }
0x1588   : > { %v5069_v28 = vsel %vm2462_vm4, %v5053_v12, %v5059_v27 }
0x1589   : > { %v5070_v45 = vsel %vm3080_vm7, %v5069_v28, %v5063_v22 }
0x158b   : > { %v5067_v39 = vpop.permute.xlu1 %5066 }
0x158c   : > { %v5071_v46 = vsel %vm3082_vm8, %v5070_v45, %v5067_v39 }
0x158d   : > { %v5080_v26 = vpack.c.bf16 %v5071_v46, %v5071_v46 }
0x158f   : > { %8127 = vmatmul.mubr.msk.bf16.vlgmr.msra.gmra.mrb[36].mxu0 %vm1372_vm2, %v5080_v26 }
0x1590   : > { %8143 = vmatpush3.bf16.msra.mxu0 %v5210_v49  ;;  %8150 = vmatprep.mubr.msk.bf16.mxu0 %vm9616_vm3, %v9609_v42 }
0x1591   : > { %8144 = vmatprep.subr.bf16.mxu0 %v9609_v42 }
0x1594   : > { %8145 = vmatpush3.bf16.msra.mxu0 %v5211_v2 }
0x1595   : > { %8146 = vmatprep.subr.bf16.mxu0 %v9609_v42 }
0x1598   : > { %8147 = vmatpush3.bf16.msra.mxu0 %v5212_v31 }
0x1599   : > { %8148 = vmatprep.subr.bf16.mxu0 %v9609_v42 }
0x159c   : > { %8149 = vmatpush3.bf16.msra.mxu0 %v5213_v32 }
0x159d   : > { %8166 = vmatprep.subr.bf16.mxu0 %v9609_v42 }
0x15c1   : > { %v3283_v35 = vpop.xlane.xlu0 %3282 }
0x15c2   : > { %v3284_v36 = vmul.f32 0.015625, %v3283_v35 }
0x15c4   : > { %v3285_v37 = vadd.f32 1e-06, %v3284_v36 }
0x15c6   : > { %8654 = vrsqrt.f32 %v3285_v37 }
0x15d0   : > { %v8655_v38 = vpop.eup %8654 }
0x15d1   : > { %v3287_v47 = vmul.f32 %v8655_v38, %v3279_v15  ;;  %v7770_v15 = vld [vmem:[#allocation28] ss:$0 sm:$0xff] }
0x15d3   : > { %v3295_v48 = vmul.f32 %v7744_v41, %v3287_v47 }
0x15d5   : > { %v5209_v63 = vpack.c.bf16 %v3295_v48, %v3295_v48 }
0x15d7   : > { %8151 = vmatmul.mubr.msk.bf16.vlgmr.msra.gmra.mrb[40].mxu0 %vm1372_vm2, %v5209_v63 }
0x15d8   : > { %8168 = vmatprep.mubr.msk.bf16.mxu0 %vm9616_vm3, %v9609_v42 }
0x1662   : > { %v5122_v5 = vpop.f32.mrb[36].mxu0 }
0x1663   : > { %v11132_v7 = vadd.f32 %v10892_v40, %v5122_v5  ;;  %v8128_v10 = vpop.f32.mrb[37].mxu0  ;;  %v5149_v40 = vld [vmem:[#allocation35 + $0x20] sm:$0xff] }
0x1664   : > { %v5125_v14 = vpop.f32.mrb[38].mxu0  ;;  %v5156_v58 = vpack.c.bf16 %v5150_v6, %v5149_v40 }
0x1665   : > { %v8129_v25 = vpop.f32.mrb[39].mxu0  ;;  %v5129_v13 = vmul.f32 %v11132_v7, %v11132_v7 }
0x1666   : > { %8135 = vmatpush3.bf16.msra.mxu1 %v5156_v58 }
0x1667   : > { %v5130_v18 = vsel %vm1372_vm2, %v5129_v13, 0.0  ;;  %8136 = vmatprep.subr.bf16.mxu1 %v9609_v42 }
0x1668   : > { %5131 = vadd.xlane.f32.xlu1 %v5130_v18 }
0x166a   : > { %8137 = vmatpush3.bf16.msra.mxu1 %v5157_v60 }
0x166b   : > { %8154 = vmatprep.subr.bf16.mxu1 %v9609_v42 }
0x16aa   : > { %v11141_v61 = vpop.f32.mrb[40].mxu0 }
0x16ab   : > { %5347 = vrot.lane.b32.xlu1 %v11141_v61, %s9611_s29  ;;  %5344 = vrot.lane.b32.xlu0 %v11141_v61, %s9610_s0  ;;  %v8152_v11 = vpop.f32.mrb[41].mxu0 }
0x16ac   : > { %v5254_v62 = vpop.f32.mrb[42].mxu0 }
0x16ad   : > { %v8153_v24 = vpop.f32.mrb[43].mxu0 }
0x16af   : > { %5350 = vrot.lane.b32.xlu0 %v11141_v61, %s9612_s15 }
0x16f5   : > { %v5132_v55 = vpop.xlane.xlu1 %5131 }
0x16f6   : > { %v5133_v3 = vmul.f32 0.015625, %v5132_v55 }
0x16f8   : > { %v5134_v43 = vadd.f32 1e-06, %v5133_v3 }
0x16fa   : > { %8656 = vrsqrt.f32 %v5134_v43 }
0x1704   : > { %v8657_v12 = vpop.eup %8656 }
0x1705   : > { %v5136_v16 = vmul.f32 %v8657_v12, %v11132_v7 }
0x1707   : > { %v5144_v21 = vmul.f32 %v7770_v15, %v5136_v16 }
0x1709   : > { %v5153_v22 = vpack.c.bf16 %v5144_v21, %v5144_v21 }
0x170b   : > { %8139 = vmatmul.mubr.msk.bf16.vlgmr.msra.gmra.mrb[56].mxu1 %vm1372_vm2, %v5153_v22 }
0x170c   : > { %8156 = vmatprep.mubr.msk.bf16.mxu1 %vm9616_vm3, %v9609_v42 }
0x171d   : > { %v11153_v27 = vpop.permute.xlu1 %5347  ;;  %v11155_v28 = vpop.permute.xlu0 %5344 }
0x171e   : > { %v5353_v33 = vcombine.low %v11141_v61, %v11153_v27  ;;  %v5354_v34 = vcombine.high %v11141_v61, %v11153_v27 }
0x1720   : > { %v5361_v49 = vrot.slane %v5353_v33, %v10643_v9  ;;  %v5368_v26 = vrot.slane %v5354_v34, %v10643_v9 }
0x1721   : > { %v11161_v39 = vpop.permute.xlu0 %5350 }
0x1722   : > { %v5369_v45 = vcombine.low %v11155_v28, %v11161_v39  ;;  %v5370_v46 = vcombine.high %v11155_v28, %v11161_v39 }
0x1724   : > { %v5377_v8 = vrot.slane %v5369_v45, %v10643_v9  ;;  %v5384_v54 = vrot.slane %v5370_v46, %v10643_v9 }
0x1726   : > { %v5385_v2 = vcombine.low %v5361_v49, %v5377_v8  ;;  %v5386_v59 = vcombine.high %v5361_v49, %v5377_v8  ;;  %v5401_v29 = vcombine.low %v5368_v26, %v5384_v54  ;;  %v5402_v17 = vcombine.high %v5368_v26, %v5384_v54 }
0x1728   : > { %v5393_v31 = vrot.slane %v5385_v2, %v10650_v19  ;;  %v5400_v30 = vrot.slane %v5386_v59, %v10650_v19  ;;  %v5409_v36 = vrot.slane %v5401_v29, %v10650_v19  ;;  %v5416_v47 = vrot.slane %v5402_v17, %v10650_v19 }
0x172a   : > { %v5421_v32 = vpack.c.bf16 %v5393_v31, %v5393_v31  ;;  %v5423_v35 = vpack.c.bf16 %v5400_v30, %v5400_v30  ;;  %v5418_v37 = vcombine.high %v5400_v30, %v9609_v42  ;;  %v5425_v38 = vpack.c.bf16 %v5409_v36, %v5409_v36 }
0x172b   : > { %v5419_v48 = vcombine.high %v5409_v36, %v9609_v42  ;;  %v5427_v63 = vpack.c.bf16 %v5416_v47, %v5416_v47  ;;  %v5420_v10 = vcombine.high %v5416_v47, %v9609_v42  ;;  %v5417_v14 = vcombine.high %v5393_v31, %v9609_v42 }
0x172c   : > { %5611 = vxpose.xlu0.c.b16.start.end [1/1] (short) (narrow) %v5423_v35, 16  ;;  %5579 = vxpose.xlu1.c.b16.start.end [1/1] (short) (narrow) %v5421_v32, 16  ;;  %v5424_v41 = vpack.c.bf16 %v5418_v37, %v5418_v37 }
0x172d   : > { %v5426_v5 = vpack.c.bf16 %v5419_v48, %v5419_v48  ;;  %v5428_v25 = vpack.c.bf16 %v5420_v10, %v5420_v10  ;;  %v5422_v13 = vpack.c.bf16 %v5417_v14, %v5417_v14 }
0x1730   : > { %5643 = vxpose.xlu0.c.b16.start.end [1/1] (short) (narrow) %v5425_v38, 16  ;;  %5627 = vxpose.xlu1.c.b16.start.end [1/1] (short) (narrow) %v5424_v41, 16 }
0x1734   : > { %5675 = vxpose.xlu0.c.b16.start.end [1/1] (short) (narrow) %v5427_v63, 16  ;;  %5659 = vxpose.xlu1.c.b16.start.end [1/1] (short) (narrow) %v5426_v5, 16 }
0x1738   : > { %5691 = vxpose.xlu1.c.b16.start.end [1/1] (short) (narrow) %v5428_v25, 16  ;;  %5595 = vxpose.xlu0.c.b16.start.end [1/1] (short) (narrow) %v5422_v13, 16 }
0x1792   : > { %v5619_v18 = vpop.trf.xlu0  ;;  %v5587_v57 = vpop.trf.xlu1 }
0x1793   : > { %v5719_v56 = vshrl.u32 %v5619_v18, 16  ;;  %v5711_v44 = vshrl.u32 %v5587_v57, 16 }
0x1796   : > { %v5651_v53 = vpop.trf.xlu0  ;;  %v5635_v4 = vpop.trf.xlu1 }
0x1797   : > { %v5720_v50 = vshrl.u32 %v5635_v4, 16  ;;  %v5727_v6 = vshrl.u32 %v5651_v53, 16  ;;  %v5717_v23 = vpack.i.b16 %v5635_v4, %v5619_v18 }
0x1799   : > { %v5721_v11 = vpack.i.b16 %v5720_v50, %v5719_v56 }
0x179a   : > { %v5683_v20 = vpop.trf.xlu0  ;;  %v5667_v40 = vpop.trf.xlu1 }
0x179b   : > { %v5728_v58 = vshrl.u32 %v5667_v40, 16  ;;  %v5735_v60 = vshrl.u32 %v5683_v20, 16  ;;  %v5725_v62 = vpack.i.b16 %v5667_v40, %v5651_v53 }
0x179d   : > { %v5729_v16 = vpack.i.b16 %v5728_v58, %v5727_v6 }
0x179e   : > { %v5699_v24 = vpop.trf.xlu1  ;;  %v5603_v55 = vpop.trf.xlu0 }
0x179f   : > { %v5733_v3 = vpack.i.b16 %v5699_v24, %v5683_v20  ;;  %v5736_v43 = vshrl.u32 %v5699_v24, 16  ;;  %v5709_v12 = vpack.i.b16 %v5603_v55, %v5587_v57  ;;  %v5712_v15 = vshrl.u32 %v5603_v55, 16 }
0x17a1   : > { %v5737_v21 = vpack.i.b16 %v5736_v43, %v5735_v60  ;;  %v5755_v22 = vcombine.low %v5717_v23, %v5733_v3  ;;  %v5756_v33 = vcombine.high %v5717_v23, %v5733_v3  ;;  %v5713_v34 = vpack.i.b16 %v5712_v15, %v5711_v44 }
0x17a2   : > { %v5739_v45 = vcombine.low %v5709_v12, %v5725_v62  ;;  %v5740_v46 = vcombine.high %v5709_v12, %v5725_v62 }
0x17a3   : > { %v5763_v49 = vrot.slane %v5755_v22, %v10643_v9  ;;  %v5770_v26 = vrot.slane %v5756_v33, %v10643_v9  ;;  %v5823_v8 = vcombine.low %v5721_v11, %v5737_v21  ;;  %v5807_v59 = vcombine.low %v5713_v34, %v5729_v16 }
0x17a4   : > { %v5747_v54 = vrot.slane %v5739_v45, %v10643_v9  ;;  %v5754_v2 = vrot.slane %v5740_v46, %v10643_v9  ;;  %v5824_v29 = vcombine.high %v5721_v11, %v5737_v21  ;;  %v5808_v31 = vcombine.high %v5713_v34, %v5729_v16 }
0x17a5   : > { %v5831_v30 = vrot.slane %v5823_v8, %v10643_v9  ;;  %v5815_v36 = vrot.slane %v5807_v59, %v10643_v9 }
0x17a6   : > { %v5771_v17 = vcombine.low %v5747_v54, %v5763_v49  ;;  %v5772_v32 = vcombine.high %v5747_v54, %v5763_v49  ;;  %v5787_v35 = vcombine.low %v5754_v2, %v5770_v26  ;;  %v5838_v41 = vrot.slane %v5824_v29, %v10643_v9 }
0x17a7   : > { %v5788_v47 = vcombine.high %v5754_v2, %v5770_v26  ;;  %v5822_v48 = vrot.slane %v5808_v31, %v10643_v9  ;;  %v5840_v10 = vcombine.high %v5815_v36, %v5831_v30  ;;  %v5839_v13 = vcombine.low %v5815_v36, %v5831_v30 }
0x17a8   : > { %v5786_v37 = vrot.slane %v5772_v32, %v10650_v19  ;;  %v5779_v38 = vrot.slane %v5771_v17, %v10650_v19  ;;  %v5795_v63 = vrot.slane %v5787_v35, %v10650_v19 }
0x17a9   : > { %v5802_v14 = vrot.slane %v5788_v47, %v10650_v19  ;;  %v5854_v25 = vrot.slane %v5840_v10, %v10650_v19  ;;  %v5855_v18 = vcombine.low %v5822_v48, %v5838_v41  ;;  %v5847_v57 = vrot.slane %v5839_v13, %v10650_v19 }
0x17aa   : > { %5939 = vxpose.xlu1.c.b16.start.end [1/1] (short) (narrow) %v5786_v37, 16  ;;  %5875 = vxpose.xlu0.c.b16.start.end [1/1] (short) (narrow) %v5779_v38, 16  ;;  %v5803_v5 = vcombine.high %v5779_v38, %v9607_v0  ;;  %v5856_v4 = vcombine.high %v5822_v48, %v5838_v41  ;;  %v5804_v56 = vcombine.high %v5786_v37, %v9607_v0 }
0x17ab   : > { %v5863_v53 = vrot.slane %v5855_v18, %v10650_v19  ;;  %v5805_v20 = vcombine.high %v5795_v63, %v9607_v0  ;;  %v5871_v40 = vcombine.high %v5847_v57, %v9607_v0  ;;  %v5872_v6 = vcombine.high %v5854_v25, %v9607_v0 }
0x17ac   : > { %v5870_v50 = vrot.slane %v5856_v4, %v10650_v19  ;;  %v5806_v24 = vcombine.high %v5802_v14, %v9607_v0 }
0x17ad   : > { %v5873_v58 = vcombine.high %v5863_v53, %v9607_v0 }
0x17ae   : > { %6003 = vxpose.xlu1.c.b16.start.end [1/1] (short) (narrow) %v5795_v63, 16  ;;  %5907 = vxpose.xlu0.c.b16.start.end [1/1] (short) (narrow) %v5803_v5, 16  ;;  %v5874_v62 = vcombine.high %v5870_v50, %v9607_v0 }
0x17b2   : > { %6067 = vxpose.xlu1.c.b16.start.end [1/1] (short) (narrow) %v5802_v14, 16  ;;  %5955 = vxpose.xlu0.c.b16.start.end [1/1] (short) (narrow) %v5854_v25, 16 }
0x17b6   : > { %5891 = vxpose.xlu1.c.b16.start.end [1/1] (short) (narrow) %v5847_v57, 16  ;;  %6019 = vxpose.xlu0.c.b16.start.end [1/1] (short) (narrow) %v5863_v53, 16 }
0x17ba   : > { %5971 = vxpose.xlu1.c.b16.start.end [1/1] (short) (narrow) %v5804_v56, 16  ;;  %6083 = vxpose.xlu0.c.b16.start.end [1/1] (short) (narrow) %v5870_v50, 16 }
0x17be   : > { %6035 = vxpose.xlu1.c.b16.start.end [1/1] (short) (narrow) %v5805_v20, 16  ;;  %5923 = vxpose.xlu0.c.b16.start.end [1/1] (short) (narrow) %v5871_v40, 16 }
0x17c2   : > { %5987 = vxpose.xlu0.c.b16.start.end [1/1] (short) (narrow) %v5872_v6, 16 }
0x17c6   : > { %6051 = vxpose.xlu0.c.b16.start.end [1/1] (short) (narrow) %v5873_v58, 16 }
0x17de   : > { %v5195_v44 = vpop.f32.mrb[56].mxu1 }
0x17df   : > { %v8140_v23 = vpop.f32.mrb[57].mxu1  ;;  %5261 = vrot.lane.b32.xlu1 %v5195_v44, %s9611_s29  ;;  %5258 = vrot.lane.b32.xlu0 %v5195_v44, %s9610_s0 }
0x17e0   : > { %v5198_v60 = vpop.f32.mrb[58].mxu1 }
0x17e1   : > { %v8141_v11 = vpop.f32.mrb[59].mxu1 }
0x17e3   : > { %5264 = vrot.lane.b32.xlu1 %v5195_v44, %s9612_s15 }
0x17fd   : > { %6115 = vxpose.xlu0.c.b16.start.end [1/1] (short) (narrow) %v5874_v62, 16 }
0x1806   : > { %6099 = vxpose.xlu1.c.b16.start.end [1/1] (short) (narrow) %v5806_v24, 16 }
0x1810   : > { %v5883_v55 = vpop.trf.xlu0  ;;  %v5947_v43 = vpop.trf.xlu1 }
0x1811   : > { %v6131_v4 = vcombine.low %v5883_v55, %v5947_v43 }
0x1813   : > { %v6138_v11 = vrot.slane %v6131_v4, %v10643_v9 }
0x1814   : > { %v5915_v3 = vpop.trf.xlu0  ;;  %v6011_v15 = vpop.trf.xlu1 }
0x1818   : > { %v5963_v12 = vpop.trf.xlu0  ;;  %v6075_v21 = vpop.trf.xlu1 }
0x1819   : > { %v6147_v62 = vcombine.low %v6011_v15, %v6075_v21 }
0x181b   : > { %v6154_v21 = vrot.slane %v6147_v62, %v10643_v9 }
0x181c   : > { %v6027_v16 = vpop.trf.xlu0  ;;  %v5899_v33 = vpop.trf.xlu1 }
0x181d   : > { %v6181_v40 = vcombine.low %v5899_v33, %v5963_v12 }
0x181f   : > { %v6188_v55 = vrot.slane %v6181_v40, %v10643_v9 }
0x1820   : > { %v6091_v22 = vpop.trf.xlu0  ;;  %v5979_v45 = vpop.trf.xlu1 }
0x1821   : > { %v6197_v20 = vcombine.low %v6027_v16, %v6091_v22  ;;  %v6139_v6 = vcombine.low %v5915_v3, %v5979_v45 }
0x1823   : > { %v6146_v43 = vrot.slane %v6139_v6, %v10643_v9 }
0x1824   : > { %v5931_v34 = vpop.trf.xlu0  ;;  %v6043_v49 = vpop.trf.xlu1 }
0x1825   : > { %v6163_v45 = vcombine.low %v6138_v11, %v6146_v43 }
0x1828   : > { %v5995_v46 = vpop.trf.xlu0 }
0x1829   : > { %v6189_v58 = vcombine.low %v5931_v34, %v5995_v46 }
0x182b   : > { %v6196_v3 = vrot.slane %v6189_v58, %v10643_v9 }
0x182c   : > { %v6059_v26 = vpop.trf.xlu0 }
0x182d   : > { %v6213_v46 = vcombine.low %v6188_v55, %v6196_v3 }
0x1851   : > { %v5262_v8 = vpop.permute.xlu1 %5261  ;;  %v5259_v59 = vpop.permute.xlu0 %5258 }
0x1852   : > { %v5267_v54 = vcombine.low %v5195_v44, %v5262_v8  ;;  %v5268_v2 = vcombine.high %v5195_v44, %v5262_v8 }
0x1854   : > { %v5275_v17 = vrot.slane %v5267_v54, %v10643_v9  ;;  %v5282_v32 = vrot.slane %v5268_v2, %v10643_v9 }
0x1855   : > { %v5265_v29 = vpop.permute.xlu1 %5264 }
0x1856   : > { %v5283_v31 = vcombine.low %v5259_v59, %v5265_v29  ;;  %v5284_v30 = vcombine.high %v5259_v59, %v5265_v29 }
0x1858   : > { %v5291_v35 = vrot.slane %v5283_v31, %v10643_v9  ;;  %v5298_v36 = vrot.slane %v5284_v30, %v10643_v9  ;;  %v6170_v30 = vrot.slane %v6163_v45, %v10650_v19 }
0x185a   : > { %v5299_v37 = vcombine.low %v5275_v17, %v5291_v35  ;;  %v5300_v38 = vcombine.high %v5275_v17, %v5291_v35  ;;  %v5315_v41 = vcombine.low %v5282_v32, %v5298_v36  ;;  %v5316_v47 = vcombine.high %v5282_v32, %v5298_v36 }
0x185b   : > { %v6220_v17 = vrot.slane %v6213_v46, %v10650_v19 }
0x185c   : > { %v5307_v48 = vrot.slane %v5299_v37, %v10650_v19  ;;  %v5314_v63 = vrot.slane %v5300_v38, %v10650_v19  ;;  %v5323_v5 = vrot.slane %v5315_v41, %v10650_v19  ;;  %v5330_v10 = vrot.slane %v5316_v47, %v10650_v19 }
0x185e   : > { %v5331_v14 = vcombine.high %v5307_v48, %v9609_v42  ;;  %v5332_v25 = vcombine.high %v5314_v63, %v9609_v42  ;;  %v5333_v13 = vcombine.high %v5323_v5, %v9609_v42  ;;  %v5334_v18 = vcombine.high %v5330_v10, %v9609_v42 }
0x185f   : > { %v7773_v44 = vpack.c.bf16 %v5323_v5, %v5307_v48  ;;  %v7774_v23 = vpack.c.bf16 %v5330_v10, %v5314_v63 }
0x1860   : > { %v7775_v56 = vpack.c.bf16 %v5333_v13, %v5331_v14  ;;  %v7776_v50 = vpack.c.bf16 %v5334_v18, %v5332_v25 }
0x1861   : > { %v5524_v12 = vrot.slane %v7773_v44, %v10643_v9  ;;  %v5532_v16 = vrot.slane %v7774_v23, %v10643_v9  ;;  %v8684_v23 = vld [vmem:[%s1077_s11] ss:$0 sm:$0xff] }
0x1862   : > { %v5549_v24 = vrot.slane %v7775_v56, %v10643_v9  ;;  %v5557_v8 = vrot.slane %v7776_v50, %v10643_v9 }
0x1863   : > { %v6123_v57 = vpop.trf.xlu0  ;;  %v5533_v2 = vcombine.low %v5524_v12, %v5532_v16 }
0x1864   : > { %v6205_v53 = vcombine.low %v6059_v26, %v6123_v57  ;;  %v6204_v26 = vrot.slane %v6197_v20, %v10643_v9  ;;  %v5558_v15 = vcombine.low %v5549_v24, %v5557_v8 }
0x1866   : > { %v6212_v60 = vrot.slane %v6205_v53, %v10643_v9  ;;  %v5565_v31 = vrot.slane %v5558_v15, %v10650_v19 }
0x1868   : > { %v6221_v33 = vcombine.low %v6204_v26, %v6212_v60  ;;  %v5566_v41 = vcombine.high %v5565_v31, %v9607_v0  ;;  %v5571_v18 = vshrl.u32 %v5565_v31, 16 }
0x186a   : > { %v6228_v59 = vrot.slane %v6221_v33, %v10650_v19  ;;  %v5577_v20 = vshrl.u32 %v5566_v41, 16 }
0x186c   : > { %v6107_v22 = vpop.trf.xlu1  ;;  %v6229_v35 = vcombine.low %v6220_v17, %v6228_v59  ;;  %v6230_v36 = vcombine.high %v6220_v17, %v6228_v59 }
0x186d   : > { %v6155_v34 = vcombine.low %v6043_v49, %v6107_v22  ;;  %v5540_v49 = vrot.slane %v5533_v2, %v10650_v19 }
0x186e   : > { %v6236_v10 = vshrl.u32 %v6229_v35, 16  ;;  %v6244_v4 = vshrl.u32 %v6230_v36, 16 }
0x186f   : > { %v6162_v54 = vrot.slane %v6155_v34, %v10643_v9  ;;  %v5541_v5 = vcombine.high %v5540_v49, %v9607_v0  ;;  %v5569_v14 = vpack.i.b16 %v5565_v31, %v5540_v49  ;;  %v5570_v53 = vshrl.u32 %v5540_v49, 16 }
0x1871   : > { %v6171_v29 = vcombine.low %v6154_v21, %v6162_v54  ;;  %v5575_v25 = vpack.i.b16 %v5566_v41, %v5541_v5  ;;  %v5572_v56 = vpack.i.b16 %v5571_v18, %v5570_v53  ;;  %v5576_v40 = vshrl.u32 %v5541_v5, 16 }
0x1873   : > { %v6178_v32 = vrot.slane %v6171_v29, %v10650_v19  ;;  %v5578_v6 = vpack.i.b16 %v5577_v20, %v5576_v40 }
0x1875   : > { %v6179_v37 = vcombine.low %v6170_v30, %v6178_v32  ;;  %v6180_v38 = vcombine.high %v6170_v30, %v6178_v32 }
0x1877   : > { %v6233_v47 = vpack.i.b16 %v6229_v35, %v6179_v37  ;;  %v6241_v48 = vpack.i.b16 %v6230_v36, %v6180_v38  ;;  %v6235_v63 = vshrl.u32 %v6179_v37, 16  ;;  %v6243_v57 = vshrl.u32 %v6180_v38, 16 }
0x1879   : > { %8155 = vmatpush3.bf16.msra.mxu1 %v6233_v47  ;;  %8167 = vmatpush3.bf16.msra.mxu0 %v6241_v48  ;;  %v6237_v13 = vpack.i.b16 %v6236_v10, %v6235_v63  ;;  %v6245_v50 = vpack.i.b16 %v6244_v4, %v6243_v57 }
0x187a   : > { %8160 = vmatprep.subr.bf16.mxu1 %v9609_v42  ;;  %8178 = vmatprep.subr.bf16.mxu0 %v9609_v42 }
0x187c   : > { %8157 = vmatmul.mubr.msk.bf16.vlgmr.msra.gmra.mrb[60].mxu1 %vm2462_vm4, %v5569_v14  ;;  %8169 = vmatmul.mubr.msk.bf16.vlgmr.msra.gmra.mrb[44].mxu0 %vm2462_vm4, %v5575_v25 }
0x187d   : > { %8161 = vmatpush3.bf16.msra.mxu1 %v6237_v13  ;;  %8162 = vmatprep.mubr.msk.bf16.mxu1 %vm9616_vm3, %v9609_v42 }
0x187e   : > { %8172 = vmatprep.subr.bf16.mxu1 %v9609_v42  ;;  %8180 = vmatprep.mubr.msk.bf16.mxu0 %vm9616_vm3, %v9609_v42 }
0x1884   : > { %8163 = vmatmul.mubr.msk.bf16.vlgmr.msra.gmra.mrb[64].mxu1 %vm2462_vm4, %v5572_v56 }
0x1885   : > { %8173 = vmatpush3.bf16.msra.mxu1 %v6245_v50  ;;  %8174 = vmatprep.mubr.msk.bf16.mxu1 %vm9616_vm3, %v9609_v42 }
0x1886   : > { %8184 = vmatprep.subr.bf16.mxu1 %v9609_v42 }
0x188c   : > { %8175 = vmatmul.mubr.msk.bf16.vlgmr.msra.gmra.mrb[68].mxu1 %vm2462_vm4, %v5578_v6 }
0x188d   : > { %8186 = vmatprep.mubr.msk.bf16.mxu1 %vm9616_vm3, %v9609_v42 }
0x194f   : > { %v6284_v58 = vpop.f32.mrb[60].mxu1  ;;  %v6370_v44 = vpop.f32.mrb[44].mxu0 }
0x1950   : > { %v6285_v60 = vadd.f32 %v8684_v23, %v6284_v58  ;;  %v8158_v11 = vpop.f32.mrb[61].mxu1  ;;  %v8170_v62 = vpop.f32.mrb[45].mxu0  ;;  %v6371_v26 = vadd.f32 %v8684_v23, %v6370_v44 }
0x1951   : > { %v6287_v24 = vpop.f32.mrb[62].mxu1  ;;  %v6373_v8 = vpop.f32.mrb[46].mxu0 }
0x1952   : > { %v8159_v55 = vpop.f32.mrb[63].mxu1  ;;  %v8171_v43 = vpop.f32.mrb[47].mxu0  ;;  %v6419_v3 = vsel %vm2635_vm5, %v6285_v60, -inf  ;;  %v6425_v12 = vsel %vm2635_vm5, %v6371_v26, -inf }
0x1953   : > { %6420 = vmax.xlane.f32.xlu1 %v6419_v3 }
0x1957   : > { %v6327_v16 = vpop.f32.mrb[64].mxu1  ;;  %6426 = vmax.xlane.f32.xlu1 %v6425_v12 }
0x1958   : > { %v6328_v22 = vadd.f32 %v8684_v23, %v6327_v16  ;;  %v8164_v33 = vpop.f32.mrb[65].mxu1 }
0x1959   : > { %v6330_v34 = vpop.f32.mrb[66].mxu1 }
0x195a   : > { %v8165_v15 = vpop.f32.mrb[67].mxu1  ;;  %v6422_v21 = vsel %vm2635_vm5, %v6328_v22, -inf }
0x195b   : > { %6423 = vmax.xlane.f32.xlu0 %v6422_v21 }
0x195f   : > { %v6413_v45 = vpop.f32.mrb[68].mxu1 }
0x1960   : > { %v6414_v46 = vadd.f32 %v8684_v23, %v6413_v45  ;;  %v8176_v54 = vpop.f32.mrb[69].mxu1 }
0x1961   : > { %v6416_v2 = vpop.f32.mrb[70].mxu1 }
0x1962   : > { %v8177_v59 = vpop.f32.mrb[71].mxu1  ;;  %v6428_v29 = vsel %vm2635_vm5, %v6414_v46, -inf }
0x1963   : > { %6429 = vmax.xlane.f32.xlu0 %v6428_v29 }
0x1968   : > { %5429 = vrot.lane.b32.xlu1 %v11141_v61, %s9613_s27 }
0x19e0   : > { %v6421_v31 = vpop.xlane.xlu1 %6420 }
0x19e1   : > { %v6431_v30 = vsub.f32 %v6285_v60, %v6421_v31 }
0x19e3   : > { %v6435_v17 = vmul.f32 1.442695, %v6431_v30 }
0x19e4   : > { %v6427_v48 = vpop.xlane.xlu1 %6426 }
0x19e5   : > { %8658 = vpow2.f32 %v6435_v17  ;;  %v6433_v63 = vsub.f32 %v6371_v26, %v6427_v48 }
0x19e7   : > { %v6439_v10 = vmul.f32 1.442695, %v6433_v63 }
0x19e8   : > { %v6424_v32 = vpop.xlane.xlu0 %6423 }
0x19e9   : > { %v6432_v49 = vsub.f32 %v6328_v22, %v6424_v32 }
0x19eb   : > { %v6437_v35 = vmul.f32 1.442695, %v6432_v49 }
0x19ed   : > { %8660 = vpow2.f32 %v6437_v35 }
0x19ef   : > { %v11262_v36 = vpop.eup %8658 }
0x19f0   : > { %v6443_v37 = vsel %vm2635_vm5, %v11262_v36, 0.0  ;;  %v6430_v61 = vpop.xlane.xlu0 %6429 }
0x19f1   : > { %6444 = vadd.xlane.f32.xlu1 %v6443_v37  ;;  %v6434_v47 = vsub.f32 %v6414_v46, %v6430_v61 }
0x19f3   : > { %v6441_v5 = vmul.f32 1.442695, %v6434_v47 }
0x19f5   : > { %8662 = vpow2.f32 %v6441_v5 }
0x19f6   : > { %8664 = vpow2.f32 %v6439_v10 }
0x19f7   : > { %v11266_v38 = vpop.eup %8660 }
0x19f8   : > { %v6446_v41 = vsel %vm2635_vm5, %v11266_v38, 0.0 }
0x19f9   : > { %6447 = vadd.xlane.f32.xlu0 %v6446_v41 }
0x19ff   : > { %v11276_v14 = vpop.eup %8662 }
0x1a00   : > { %v6452_v25 = vsel %vm2635_vm5, %v11276_v14, 0.0 }
0x1a02   : > { %5433 = vrot.lane.b32.xlu1 %v11153_v27, %s9613_s27  ;;  %v11280_v27 = vpop.eup %8664 }
0x1a06   : > { %5435 = vrot.lane.b32.xlu1 %v11161_v39, %s9613_s27  ;;  %v6449_v39 = vsel %vm2635_vm5, %v11280_v27, 0.0 }
0x1a0f   : > { %5431 = vrot.lane.b32.xlu0 %v11155_v28, %s9613_s27  ;;  %v5430_v28 = vpop.permute.xlu1 %5429 }
0x1a2a   : > { %6453 = vadd.xlane.f32.xlu1 %v6452_v25 }
0x1a2e   : > { %6450 = vadd.xlane.f32.xlu0 %v6449_v39 }
0x1a7e   : > { %v6445_v13 = vpop.xlane.xlu1 %6444 }
0x1a7f   : > { %8666 = vrcp.f32 %v6445_v13 }
0x1a82   : > { %v5434_v18 = vpop.permute.xlu1 %5433 }
0x1a83   : > { %v5441_v53 = vcombine.low %v5430_v28, %v5434_v18  ;;  %v5442_v4 = vcombine.high %v5430_v28, %v5434_v18 }
0x1a85   : > { %v5449_v6 = vrot.slane %v5441_v53, %v10643_v9  ;;  %v5456_v58 = vrot.slane %v5442_v4, %v10643_v9 }
0x1a86   : > { %v6448_v57 = vpop.xlane.xlu0 %6447  ;;  %v5436_v56 = vpop.permute.xlu1 %5435 }
0x1a87   : > { %8668 = vrcp.f32 %v6448_v57 }
0x1a89   : > { %v8667_v59 = vpop.eup %8666 }
0x1a8a   : > { %v5432_v50 = vpop.permute.xlu0 %5431  ;;  %v6459_v49 = vmul.f32 %v8667_v59, %v11262_v36 }
0x1a8b   : > { %v5457_v20 = vcombine.low %v5432_v50, %v5436_v56  ;;  %v5458_v40 = vcombine.high %v5432_v50, %v5436_v56 }
0x1a8c   : > { %v6463_v13 = vpack.c.bf16 %v6459_v49, %v6459_v49  ;;  %v6868_v49 = vld [vmem:[#allocation38 + $0x20] sm:$0xff] }
0x1a8d   : > { %v5465_v44 = vrot.slane %v5457_v20, %v10643_v9  ;;  %v5472_v23 = vrot.slane %v5458_v40, %v10643_v9 }
0x1a8f   : > { %v5473_v60 = vcombine.low %v5449_v6, %v5465_v44  ;;  %v5474_v11 = vcombine.high %v5449_v6, %v5465_v44  ;;  %v5489_v62 = vcombine.low %v5456_v58, %v5472_v23  ;;  %v5490_v24 = vcombine.high %v5456_v58, %v5472_v23  ;;  %v6864_v44 = vld [vmem:[#allocation38] sm:$0xff]  ;;  %v6865_v23 = vld [vmem:[#allocation38 + $0x8] sm:$0xff] }
0x1a91   : > { %v5481_v8 = vrot.slane %v5473_v60, %v10650_v19  ;;  %v5488_v26 = vrot.slane %v5474_v11, %v10650_v19  ;;  %v5497_v55 = vrot.slane %v5489_v62, %v10650_v19  ;;  %v5504_v43 = vrot.slane %v5490_v24, %v10650_v19  ;;  %v8669_v30 = vpop.eup %8668  ;;  %v6866_v60 = vld [vmem:[#allocation38 + $0x10] sm:$0xff] }
0x1a92   : > { %v6460_v48 = vmul.f32 %v8669_v30, %v11266_v38  ;;  %v6873_v11 = vpack.c.bf16 %v6865_v23, %v6864_v44 }
0x1a93   : > { %v5505_v3 = vcombine.high %v5481_v8, %v9609_v42  ;;  %v5506_v12 = vcombine.high %v5488_v26, %v9609_v42  ;;  %v5507_v16 = vcombine.high %v5497_v55, %v9609_v42  ;;  %v5508_v22 = vcombine.high %v5504_v43, %v9609_v42 }
0x1a94   : > { %v7781_v33 = vpack.c.bf16 %v5497_v55, %v5481_v8  ;;  %v7782_v34 = vpack.c.bf16 %v5504_v43, %v5488_v26  ;;  %v6464_v57 = vpack.c.bf16 %v6460_v48, %v6460_v48 }
0x1a95   : > { %v7783_v15 = vpack.c.bf16 %v5507_v16, %v5505_v3  ;;  %v7784_v21 = vpack.c.bf16 %v5508_v22, %v5506_v12 }
0x1a96   : > { %v6474_v45 = vrot.slane %v7781_v33, %v10643_v9  ;;  %v6482_v46 = vrot.slane %v7782_v34, %v10643_v9 }
0x1a97   : > { %v6499_v54 = vrot.slane %v7783_v15, %v10643_v9  ;;  %v6507_v2 = vrot.slane %v7784_v21, %v10643_v9 }
0x1a98   : > { %v6483_v29 = vcombine.low %v6474_v45, %v6482_v46 }
0x1a99   : > { %v6508_v31 = vcombine.low %v6499_v54, %v6507_v2 }
0x1a9a   : > { %v6490_v17 = vrot.slane %v6483_v29, %v10650_v19 }
0x1a9b   : > { %v6515_v32 = vrot.slane %v6508_v31, %v10650_v19 }
0x1a9c   : > { %v6491_v35 = vcombine.high %v6490_v17, %v9607_v0  ;;  %v6520_v41 = vshrl.u32 %v6490_v17, 16 }
0x1a9d   : > { %v6519_v37 = vpack.i.b16 %v6515_v32, %v6490_v17  ;;  %v6521_v61 = vshrl.u32 %v6515_v32, 16  ;;  %v6516_v47 = vcombine.high %v6515_v32, %v9607_v0 }
0x1a9e   : > { %v6526_v63 = vshrl.u32 %v6491_v35, 16 }
0x1a9f   : > { %v6533_v5 = vsel %vm2749_vm6, %v6519_v37, 0  ;;  %v6522_v10 = vpack.i.b16 %v6521_v61, %v6520_v41  ;;  %v6525_v25 = vpack.i.b16 %v6516_v47, %v6491_v35  ;;  %v6527_v39 = vshrl.u32 %v6516_v47, 16  ;;  %v6869_v35 = vld [vmem:[#allocation38 + $0x28] sm:$0xff] }
0x1aa0   : > { %8179 = vmatpush3.bf16.msra.mxu0 %v6533_v5  ;;  %v6875_v48 = vpack.c.bf16 %v6869_v35, %v6868_v49  ;;  %v6937_v49 = vld [vmem:[#allocation40] sm:$0xff]  ;;  %v6938_v35 = vld [vmem:[#allocation40 + $0x8] sm:$0xff] }
0x1aa1   : > { %v6579_v28 = vsel %vm2749_vm6, %v6522_v10, 0  ;;  %8190 = vmatprep.subr.bf16.mxu0 %v9609_v42  ;;  %v6528_v36 = vpack.i.b16 %v6527_v39, %v6526_v63  ;;  %v6625_v18 = vsel %vm2749_vm6, %v6525_v25, 0  ;;  %v6870_v39 = vld [vmem:[#allocation38 + $0x30] sm:$0xff] }
0x1aa2   : > { %8185 = vmatpush3.bf16.msra.mxu1 %v6579_v28  ;;  %v6871_v28 = vld [vmem:[#allocation38 + $0x38] sm:$0xff] }
0x1aa3   : > { %8181 = vmatmul.mubr.msk.bf16.vlgmr.msra.gmra.mrb[48].mxu0 %vm2635_vm5, %v6463_v13  ;;  %8196 = vmatprep.subr.bf16.mxu1 %v9609_v42  ;;  %v6671_v38 = vsel %vm2749_vm6, %v6528_v36, 0 }
0x1aa4   : > { %8191 = vmatpush3.bf16.msra.mxu0 %v6625_v18  ;;  %8192 = vmatprep.mubr.msk.bf16.mxu0 %vm9616_vm3, %v9609_v42 }
0x1aa5   : > { %8187 = vmatmul.mubr.msk.bf16.vlgmr.msra.gmra.mrb[72].mxu1 %vm2635_vm5, %v6464_v57  ;;  %8202 = vmatprep.subr.bf16.mxu0 %v9609_v42 }
0x1aa6   : > { %8197 = vmatpush3.bf16.msra.mxu1 %v6671_v38  ;;  %8198 = vmatprep.mubr.msk.bf16.mxu1 %vm9616_vm3, %v9609_v42  ;;  %v6876_v38 = vpack.c.bf16 %v6871_v28, %v6870_v39  ;;  %v6994_v39 = vld [vmem:[#allocation41] sm:$0xff]  ;;  %v6995_v28 = vld [vmem:[#allocation41 + $0x8] sm:$0xff] }
0x1aa7   : > { %8214 = vmatprep.subr.bf16.mxu1 %v9609_v42 }
0x1ab7   : > { %v6454_v53 = vpop.xlane.xlu1 %6453 }
0x1ab8   : > { %8670 = vrcp.f32 %v6454_v53 }
0x1abb   : > { %v6451_v4 = vpop.xlane.xlu0 %6450 }
0x1abc   : > { %8672 = vrcp.f32 %v6451_v4 }
0x1ac2   : > { %v8671_v56 = vpop.eup %8670 }
0x1ac3   : > { %v6462_v50 = vmul.f32 %v8671_v56, %v11276_v14  ;;  %v6867_v14 = vld [vmem:[#allocation38 + $0x18] sm:$0xff] }
0x1ac4   : > { %v6874_v62 = vpack.c.bf16 %v6867_v14, %v6866_v60 }
0x1ac5   : > { %v6466_v20 = vpack.c.bf16 %v6462_v50, %v6462_v50 }
0x1ac6   : > { %v8673_v40 = vpop.eup %8672 }
0x1ac7   : > { %v6461_v6 = vmul.f32 %v8673_v40, %v11280_v27  ;;  %8199 = vmatmul.mubr.msk.bf16.vlgmr.msra.gmra.mrb[76].mxu1 %vm2635_vm5, %v6466_v20 }
0x1ac8   : > { %8222 = vmatprep.mubr.msk.bf16.mxu1 %vm9616_vm3, %v9609_v42 }
0x1ac9   : > { %v6465_v58 = vpack.c.bf16 %v6461_v6, %v6461_v6 }
0x1acb   : > { %8193 = vmatmul.mubr.msk.bf16.vlgmr.msra.gmra.mrb[52].mxu0 %vm2635_vm5, %v6465_v58 }
0x1acc   : > { %8210 = vmatprep.mubr.msk.bf16.mxu0 %vm9616_vm3, %v9609_v42  ;;  %8203 = vmatpush3.bf16.msra.mxu0 %v6873_v11 }
0x1acd   : > { %8204 = vmatprep.subr.bf16.mxu0 %v9609_v42 }
0x1ad0   : > { %8205 = vmatpush3.bf16.msra.mxu0 %v6874_v62 }
0x1ad1   : > { %8206 = vmatprep.subr.bf16.mxu0 %v9609_v42 }
0x1ad4   : > { %8207 = vmatpush3.bf16.msra.mxu0 %v6875_v48  ;;  %v6942_v48 = vld [vmem:[#allocation40 + $0x28] sm:$0xff] }
0x1ad5   : > { %8208 = vmatprep.subr.bf16.mxu0 %v9609_v42 }
0x1ad8   : > { %8209 = vmatpush3.bf16.msra.mxu0 %v6876_v38  ;;  %v6998_v38 = vld [vmem:[#allocation41 + $0x20] sm:$0xff] }
0x1ad9   : > { %8226 = vmatprep.subr.bf16.mxu0 %v9609_v42 }
0x1b76   : > { %v6569_v27 = vpop.f32.mrb[48].mxu0 }
0x1b77   : > { %v8182_v24 = vpop.f32.mrb[49].mxu0 }
0x1b78   : > { %v6572_v8 = vpop.f32.mrb[50].mxu0  ;;  %v6615_v26 = vpop.f32.mrb[72].mxu1 }
0x1b79   : > { %v8183_v55 = vpop.f32.mrb[51].mxu0  ;;  %v8188_v43 = vpop.f32.mrb[73].mxu1 }
0x1b7a   : > { %v6618_v3 = vpop.f32.mrb[74].mxu1 }
0x1b7b   : > { %v8189_v12 = vpop.f32.mrb[75].mxu1 }
0x1b7c   : > { %v7148_v12 = vld [vmem:[%s1069_s23] sm:$0xff]  ;;  %s9425_s23 = sshll.u32 %s9620_s2, 4  ;;  %s9426_s23 = int_to_ptr.vmem [resolvable:$false] %s9425_s23 }
0x1b7d   : > { %vm7178_vm11 = vcmp.ne.s32.totalorder %v7148_v12, 4294967196  ;;  %s9427_s17 = scalar_lea.vmem %s9426_s23, 512  ;;  %p9428_p4 = scmp.lt.s32.totalorder %s7275_s7, %s9426_s23 }
0x1b7e   : > { %p9429_p5 = scmp.lt.s32.totalorder %s9427_s17, %s9421_s10 }
0x1b80   : > { %p9430_p8 = por %p9429_p5, %p9428_p4 }
0x1b82   : > { %p9431_p7 = pnand %p9430_p8, %p9424_p3 }
0x1b9a   : > { %v6707_v16 = vpop.f32.mrb[76].mxu1 }
0x1b9b   : > { %v6729_v22 = vcombine.low %v6615_v26, %v6707_v16  ;;  %v6730_v33 = vcombine.high %v6615_v26, %v6707_v16  ;;  %v8200_v34 = vpop.f32.mrb[77].mxu1  ;;  %v11361_v16 = vsel %vm7178_vm11, 1.0, %v9609_v42 }
0x1b9c   : > { %v6710_v15 = vpop.f32.mrb[78].mxu1 }
0x1b9d   : > { %v8201_v21 = vpop.f32.mrb[79].mxu1  ;;  %v6737_v29 = vrot.slane %v6729_v22, %v10643_v9  ;;  %v6744_v31 = vrot.slane %v6730_v33, %v10643_v9  ;;  %v11364_v22 = vsel %vm7185_vm12, 1.0, %v9609_v42 }
0x1b9e   : > { %v6661_v45 = vpop.f32.mrb[52].mxu0  ;;  %v7198_v33 = vmul.f32 %v11364_v22, %v11361_v16 }
0x1b9f   : > { %v6713_v46 = vcombine.low %v6569_v27, %v6661_v45  ;;  %v6714_v54 = vcombine.high %v6569_v27, %v6661_v45  ;;  %v8194_v2 = vpop.f32.mrb[53].mxu0 }
0x1ba0   : > { %v6664_v59 = vpop.f32.mrb[54].mxu0  ;;  %v7199_v15 = vsel %vm7190_vm13, %v7198_v33, 0.0 }
0x1ba1   : > { %v6721_v30 = vrot.slane %v6713_v46, %v10643_v9  ;;  %v6728_v17 = vrot.slane %v6714_v54, %v10643_v9  ;;  %v8195_v32 = vpop.f32.mrb[55].mxu0  ;;  %v7200_v2 = vrot.slane %v7199_v15, 4 }
0x1ba3   : > { %v6745_v37 = vcombine.low %v6721_v30, %v6737_v29  ;;  %v6746_v41 = vcombine.high %v6721_v30, %v6737_v29  ;;  %v6761_v61 = vcombine.low %v6728_v17, %v6744_v31  ;;  %v6762_v47 = vcombine.high %v6728_v17, %v6744_v31 }
0x1ba4   : > { %v7201_v29 = vadd.f32 %v7200_v2, %v7199_v15 }
0x1ba5   : > { %v6753_v63 = vrot.slane %v6745_v37, %v10650_v19  ;;  %v6760_v5 = vrot.slane %v6746_v41, %v10650_v19  ;;  %v6769_v10 = vrot.slane %v6761_v61, %v10650_v19  ;;  %v6776_v25 = vrot.slane %v6762_v47, %v10650_v19  ;;  %v6939_v37 = vld [vmem:[#allocation40 + $0x10] sm:$0xff]  ;;  %v6940_v41 = vld [vmem:[#allocation40 + $0x18] sm:$0xff]  ;;  %v6941_v47 = vld [vmem:[#allocation40 + $0x20] sm:$0xff] }
0x1ba6   : > { %v7202_v31 = vrot.slane %v7201_v29, 2  ;;  %v6947_v61 = vpack.c.bf16 %v6940_v41, %v6939_v37  ;;  %v7079_v37 = vld [vmem:[#allocation11 + $0x10] sm:$0xff] }
0x1ba7   : > { %v6781_v13 = vcombine.low %v6753_v63, %v6760_v5  ;;  %v7789_v36 = vcombine.high %v6753_v63, %v6760_v5  ;;  %v6797_v18 = vcombine.low %v6769_v10, %v6776_v25  ;;  %v7790_v57 = vcombine.high %v6769_v10, %v6776_v25  ;;  %v6943_v5 = vld [vmem:[#allocation40 + $0x30] sm:$0xff]  ;;  %v6944_v10 = vld [vmem:[#allocation40 + $0x38] sm:$0xff] }
0x1ba8   : > { %v7203_v30 = vadd.f32 %v7202_v31, %v7201_v29  ;;  %v6948_v63 = vpack.c.bf16 %v6942_v48, %v6941_v47  ;;  %v6949_v25 = vpack.c.bf16 %v6944_v10, %v6943_v5  ;;  %v7084_v47 = vld [vmem:[#allocation11 + $0x38] sm:$0xff]  ;;  %v7086_v10 = vld [vmem:[#allocation11 + $0x48] sm:$0xff] }
0x1ba9   : > { %v6788_v53 = vrot.slane %v6781_v13, %v10643_v9  ;;  %v6796_v4 = vrot.slane %v7789_v36, %v10643_v9  ;;  %v6804_v56 = vrot.slane %v6797_v18, %v10643_v9  ;;  %v6812_v50 = vrot.slane %v7790_v57, %v10643_v9  ;;  %v6996_v13 = vld [vmem:[#allocation41 + $0x10] sm:$0xff]  ;;  %v6997_v18 = vld [vmem:[#allocation41 + $0x18] sm:$0xff] }
0x1baa   : > { %v7204_v17 = vrot.slane %v7203_v30, 1  ;;  %v7011_v36 = vpack.c.bf16 %v6995_v28, %v6994_v39  ;;  %v7012_v57 = vpack.c.bf16 %v6997_v18, %v6996_v13  ;;  %v7085_v28 = vld [vmem:[#allocation11 + $0x40] sm:$0xff]  ;;  %v7087_v13 = vld [vmem:[#allocation11 + $0x50] sm:$0xff]  ;;  %v7090_v18 = vld [vmem:[#allocation11 + $0x68] sm:$0xff] }
0x1bab   : > { %v6814_v20 = vcombine.high %v6788_v53, %v6796_v4  ;;  %v6830_v40 = vcombine.high %v6804_v56, %v6812_v50  ;;  %v6813_v6 = vcombine.low %v6788_v53, %v6796_v4  ;;  %v6829_v58 = vcombine.low %v6804_v56, %v6812_v50  ;;  %v6999_v53 = vld [vmem:[#allocation41 + $0x28] sm:$0xff]  ;;  %v7000_v56 = vld [vmem:[#allocation41 + $0x30] sm:$0xff]  ;;  %v7001_v50 = vld [vmem:[#allocation41 + $0x38] sm:$0xff] }
0x1bac   : > { %v7205_v32 = vadd.f32 %v7204_v17, %v7203_v30  ;;  %v7013_v4 = vpack.c.bf16 %v6999_v53, %v6998_v38  ;;  %v7089_v38 = vld [vmem:[#allocation11 + $0x60] sm:$0xff] }
0x1bad   : > { %v6828_v44 = vrot.slane %v6814_v20, %v10650_v19  ;;  %v6844_v23 = vrot.slane %v6830_v40, %v10650_v19  ;;  %v6821_v60 = vrot.slane %v6813_v6, %v10650_v19  ;;  %v6837_v11 = vrot.slane %v6829_v58, %v10650_v19  ;;  %v7002_v40 = vld [vmem:[#allocation41 + $0x40] sm:$0xff]  ;;  %v7003_v6 = vld [vmem:[#allocation41 + $0x48] sm:$0xff] }
0x1bae   : > { %v7014_v20 = vpack.c.bf16 %v7001_v50, %v7000_v56  ;;  %v7015_v58 = vpack.c.bf16 %v7003_v6, %v7002_v40 }
0x1baf   : > { %v6847_v14 = vcombine.low %v6828_v44, %v6844_v23  ;;  %v6846_v62 = vcombine.high %v6821_v60, %v6837_v11  ;;  %v6848_v27 = vcombine.high %v6828_v44, %v6844_v23  ;;  %v6845_v9 = vcombine.low %v6821_v60, %v6837_v11  ;;  %v7004_v44 = vld [vmem:[#allocation41 + $0x50] sm:$0xff]  ;;  %v7005_v23 = vld [vmem:[#allocation41 + $0x58] sm:$0xff]  ;;  %v7006_v11 = vld [vmem:[#allocation41 + $0x60] sm:$0xff] }
0x1bb0   : > { %v7016_v60 = vpack.c.bf16 %v7005_v23, %v7004_v44 }
0x1bb1   : > { %6854 = vrot.lane.b32.xlu1 %v6847_v14, %s9617_s1  ;;  %6850 = vrot.lane.b32.xlu0 %v6846_v62, %s9618_s3  ;;  %v7007_v14 = vld [vmem:[#allocation41 + $0x68] sm:$0xff] }
0x1bb2   : > { %v7017_v62 = vpack.c.bf16 %v7007_v14, %v7006_v11 }
0x1bb5   : > { %6858 = vrot.lane.b32.xlu0 %v6848_v27, %s9619_s22 }
0x1c23   : > { %v6851_v24 = vpop.permute.xlu0 %6850  ;;  %v6855_v8 = vpop.permute.xlu1 %6854 }
0x1c24   : > { %v6861_v26 = vsel %vm2462_vm4, %v6845_v9, %v6851_v24 }
0x1c25   : > { %v6862_v43 = vsel %vm3080_vm7, %v6861_v26, %v6855_v8  ;;  %v7792_v26 = vld [vmem:[#allocation29] ss:$0 sm:$0xff] }
0x1c27   : > { %v6859_v55 = vpop.permute.xlu0 %6858 }
0x1c28   : > { %v6863_v19 = vsel %vm3082_vm8, %v6862_v43, %v6859_v55 }
0x1c29   : > { %v6872_v3 = vpack.c.bf16 %v6863_v19, %v6863_v19 }
0x1c2b   : > { %8211 = vmatmul.mubr.msk.bf16.vlgmr.msra.gmra.mrb[56].mxu0 %vm1372_vm2, %v6872_v3  ;;  %v7008_v3 = vld [vmem:[#allocation41 + $0x70] sm:$0xff] }
0x1c2c   : > { %8242 = vmatprep.mubr.msk.bf16.mxu0 %vm9616_vm3, %v9609_v42  ;;  %8227 = vmatpush3.bf16.msra.mxu0 %v7011_v36  ;;  %v7098_v36 = vpack.c.bf16 %v7087_v13, %v7085_v28 }
0x1c2d   : > { %8228 = vmatprep.subr.bf16.mxu0 %v9609_v42 }
0x1c30   : > { %8229 = vmatpush3.bf16.msra.mxu0 %v7012_v57  ;;  %v7092_v57 = vld [vmem:[#allocation11 + $0x78] sm:$0xff] }
0x1c31   : > { %8230 = vmatprep.subr.bf16.mxu0 %v9609_v42  ;;  %v7101_v53 = vpack.c.bf16 %v7092_v57, %v7090_v18 }
0x1c34   : > { %8231 = vmatpush3.bf16.msra.mxu0 %v7013_v4  ;;  %v7091_v4 = vld [vmem:[#allocation11 + $0x70] sm:$0xff] }
0x1c35   : > { %8232 = vmatprep.subr.bf16.mxu0 %v9609_v42  ;;  %v7100_v56 = vpack.c.bf16 %v7091_v4, %v7089_v38 }
0x1c38   : > { %8233 = vmatpush3.bf16.msra.mxu0 %v7014_v20 }
0x1c39   : > { %8234 = vmatprep.subr.bf16.mxu0 %v9609_v42 }
0x1c3c   : > { %8235 = vmatpush3.bf16.msra.mxu0 %v7015_v58  ;;  %v7794_v58 = vld [vmem:[#allocation31] ss:$0 sm:$0xff] }
0x1c3d   : > { %8236 = vmatprep.subr.bf16.mxu0 %v9609_v42 }
0x1c40   : > { %8237 = vmatpush3.bf16.msra.mxu0 %v7016_v60 }
0x1c41   : > { %8238 = vmatprep.subr.bf16.mxu0 %v9609_v42 }
0x1c44   : > { %8239 = vmatpush3.bf16.msra.mxu0 %v7017_v62 }
0x1c45   : > { %8240 = vmatprep.subr.bf16.mxu0 %v9609_v42 }
0x1cfe   : > { %v6914_v34 = vpop.f32.mrb[56].mxu0 }
0x1cff   : > { %v11370_v21 = vadd.f32 %v6914_v34, %v11132_v7  ;;  %v8212_v45 = vpop.f32.mrb[57].mxu0  ;;  %v6946_v7 = vpack.c.bf16 %v6938_v35, %v6937_v49  ;;  %v7080_v49 = vld [vmem:[#allocation11 + $0x18] sm:$0xff] }
0x1d00   : > { %v6917_v46 = vpop.f32.mrb[58].mxu0 }
0x1d01   : > { %v8213_v54 = vpop.f32.mrb[59].mxu0  ;;  %v6921_v1 = vmul.f32 %v11370_v21, %v11370_v21  ;;  %8215 = vmatpush3.bf16.msra.mxu1 %v6946_v7  ;;  %v7077_v7 = vld [vmem:[#allocation11] sm:$0xff] }
0x1d02   : > { %8216 = vmatprep.subr.bf16.mxu1 %v9609_v42  ;;  %v7094_v41 = vpack.c.bf16 %v7079_v37, %v7077_v7 }
0x1d03   : > { %v6922_v59 = vsel %vm1372_vm2, %v6921_v1, 0.0 }
0x1d04   : > { %6923 = vadd.xlane.f32.xlu1 %v6922_v59 }
0x1d05   : > { %8217 = vmatpush3.bf16.msra.mxu1 %v6947_v61  ;;  %v7082_v61 = vld [vmem:[#allocation11 + $0x28] sm:$0xff] }
0x1d06   : > { %8218 = vmatprep.subr.bf16.mxu1 %v9609_v42  ;;  %v7097_v48 = vpack.c.bf16 %v7084_v47, %v7082_v61 }
0x1d09   : > { %8219 = vmatpush3.bf16.msra.mxu1 %v6948_v63  ;;  %v7081_v63 = vld [vmem:[#allocation11 + $0x20] sm:$0xff] }
0x1d0a   : > { %8220 = vmatprep.subr.bf16.mxu1 %v9609_v42 }
0x1d0d   : > { %8221 = vmatpush3.bf16.msra.mxu1 %v6949_v25  ;;  %v7088_v25 = vld [vmem:[#allocation11 + $0x58] sm:$0xff] }
0x1d0e   : > { %v7099_v39 = vpack.c.bf16 %v7088_v25, %v7086_v10 }
0x1d15   : > { %7165 = vperm.xlu1 %8615, %v7148_v12   ;;  %v7009_v12 = vld [vmem:[#allocation41 + $0x78] sm:$0xff] }
0x1d16   : > { %v7018_v33 = vpack.c.bf16 %v7009_v12, %v7008_v3 }
0x1d18   : > { %8241 = vmatpush3.bf16.msra.mxu0 %v7018_v33 }
0x1d19   : > { %7232 = vperm.xlu1 %8615, %v7205_v32   ;;  %v7078_v32 = vld [vmem:[#allocation11 + $0x8] sm:$0xff] }
0x1d1a   : > { %v7095_v35 = vpack.c.bf16 %v7080_v49, %v7078_v32 }
0x1d1c   : > { %7105 = vmatprep.subr.bf16.mxu1 %v7095_v35 }
0x1d91   : > { %v6924_v27 = vpop.xlane.xlu1 %6923 }
0x1d92   : > { %v6925_v9 = vmul.f32 0.015625, %v6924_v27 }
0x1d94   : > { %v6926_v24 = vadd.f32 1e-06, %v6925_v9 }
0x1d95   : > { %v7166_v14 = vpop.permute.xlu1 %7165 }
0x1d96   : > { %8674 = vrsqrt.f32 %v6926_v24  ;;  %vm7167_vm14 = vcmp.eq.s32.totalorder %v10597_v51, %v7166_v14  ;;  %vm7168_vm15 = vcmp.eq.s32.totalorder %v10600_v52, %v7166_v14 }
0x1d97   : > { %v7796_v62 = vsel %vm7167_vm14, 1.0, %v9609_v42  ;;  %v7797_v9 = vsel %vm7168_vm15, 1.0, %v9609_v42 }
0x1da0   : > { %v8675_v8 = vpop.eup %8674 }
0x1da1   : > { %v6928_v55 = vmul.f32 %v8675_v8, %v11370_v21 }
0x1da3   : > { %v6936_v43 = vmul.f32 %v7792_v26, %v6928_v55 }
0x1da5   : > { %v6945_v19 = vpack.c.bf16 %v6936_v43, %v6936_v43 }
0x1da7   : > { %8223 = vmatmul.mubr.msk.bf16.vlgmr.msra.gmra.mrb[80].mxu1 %vm1372_vm2, %v6945_v19 }
0x1da8   : > { %7137 = vmatprep.mubr.bf16.mxu1 %v9607_v0  ;;  %7106 = vmatpush1.bf16.msra.mxu1 %v7094_v41 }
0x1da9   : > { %7107 = vmatprep.subr.bf16.mxu1 %v7097_v48 }
0x1e7a   : > { %v6987_v34 = vpop.f32.mrb[80].mxu1 }
0x1e7b   : > { %v6993_v15 = vmax.f32 %v6987_v34, 0.0  ;;  %v8224_v45 = vpop.f32.mrb[81].mxu1 }
0x1e7c   : > { %v6990_v46 = vpop.f32.mrb[82].mxu1 }
0x1e7d   : > { %v7010_v54 = vpack.c.bf16 %v6993_v15, %v6993_v15  ;;  %v8225_v1 = vpop.f32.mrb[83].mxu1 }
0x1e7e   : > { %v7188_v1 = vsub.f32 1.0, %v11364_v22 }
0x1e7f   : > { %8243 = vmatmul.mubr.bf16.vlgmr.msra.gmra.mrb[60].mxu0 %v7010_v54 }
0x1f52   : > { %v7053_v2 = vpop.f32.mrb[60].mxu0 }
0x1f53   : > { %v7059_v59 = vadd.f32 %v7053_v2, %v11370_v21  ;;  %v8244_v29 = vpop.f32.mrb[61].mxu0  ;;  %v7083_v21 = vld [vmem:[#allocation11 + $0x30] sm:$0xff]  ;;  %v7214_v2 = vmul.f32 %v11361_v16, %v7188_v1 }
0x1f54   : > { %v7056_v31 = vpop.f32.mrb[62].mxu0  ;;  %v7096_v5 = vpack.c.bf16 %v7083_v21, %v7081_v63 }
0x1f55   : > { %v7060_v30 = vmul.f32 %v7059_v59, %v7059_v59  ;;  %v8245_v17 = vpop.f32.mrb[63].mxu0  ;;  %v7215_v31 = vsel %vm7190_vm13, %v7214_v2, 0.0 }
0x1f56   : > { %7108 = vmatpush1.bf16.msra.mxu1 %v7096_v5  ;;  %v7216_v17 = vrot.slane %v7215_v31, 4 }
0x1f57   : > { %v7061_v0 = vsel %vm1372_vm2, %v7060_v30, 0.0  ;;  %7109 = vmatprep.subr.bf16.mxu1 %v7099_v39 }
0x1f58   : > { %7062 = vadd.xlane.f32.xlu0 %v7061_v0  ;;  %v7217_v35 = vadd.f32 %v7216_v17, %v7215_v31 }
0x1f5a   : > { %7110 = vmatpush1.bf16.msra.mxu1 %v7098_v36  ;;  %v7218_v63 = vrot.slane %v7217_v35, 2 }
0x1f5b   : > { %7111 = vmatprep.subr.bf16.mxu1 %v7101_v53 }
0x1f5c   : > { %v7219_v39 = vadd.f32 %v7218_v63, %v7217_v35 }
0x1f5e   : > { %7112 = vmatpush1.bf16.msra.mxu1 %v7100_v56  ;;  %v7220_v36 = vrot.slane %v7219_v39, 1 }
0x1f60   : > { %v7221_v38 = vadd.f32 %v7220_v36, %v7219_v39 }
0x1fe5   : > { %v7063_v50 = vpop.xlane.xlu0 %7062 }
0x1fe6   : > { %v7064_v20 = vmul.f32 0.015625, %v7063_v50 }
0x1fe8   : > { %v7065_v40 = vadd.f32 1e-06, %v7064_v20 }
0x1fea   : > { %8676 = vrsqrt.f32 %v7065_v40 }
0x1ff4   : > { %v8677_v6 = vpop.eup %8676 }
0x1ff5   : > { %v7067_v44 = vmul.f32 %v8677_v6, %v7059_v59 }
0x1ff7   : > { %v7075_v23 = vmul.f32 %v7794_v58, %v7067_v44 }
0x1ff9   : > { %v7076_v60 = vmul.f32 0.125, %v7075_v23 }
0x1ffb   : > { %v7093_v11 = vpack.c.bf16 %v7076_v60, %v7076_v60 }
0x1ffd   : > { %7795 = vmatmul.mubr.msk.bf16.vlgmr.msra.gmra.mrb[84].mxu1 %vm1372_vm2, %v7093_v11 }
0x20d0   : > { %v7139_v27 = vpop.f32.mrb[84].mxu1 }
0x20d1   : > { %7146 = vst [vmem:[%s11396_s25] sm:$0xff] %v7139_v27  ;;  %v7173_v24 = vmul.f32 %v7796_v62, %v7139_v27  ;;  %v7141_v8 = vpop.f32.mrb[85].mxu1 }
0x20d2   : > { %7147 = vst [vmem:[%s11396_s25 + $0x8] sm:$0xff] %v7141_v8  ;;  %v7174_v26 = vmul.f32 %v7797_v9, %v7141_v8  ;;  %v7143_v55 = vpop.f32.mrb[86].mxu1  ;;  %v7149_v43 = vmax.f32 %v7139_v27, %v7141_v8 }
0x20d3   : > { %v7144_v19 = vpop.f32.mrb[87].mxu1 }
0x20d4   : > { %7150 = vmax.xlane.f32.xlu0 %v7149_v43  ;;  %v7175_v3 = vadd.f32 %v7174_v26, %v7173_v24 }
0x2161   : > { %v7151_v52 = vpop.xlane.xlu0 %7150 }
0x2162   : > { %v7152_v12 = vsub.f32 %v7139_v27, %v7151_v52  ;;  %v7153_v33 = vsub.f32 %v7141_v8, %v7151_v52 }
0x2164   : > { %v7154_v34 = vmul.f32 1.442695, %v7152_v12  ;;  %v7156_v15 = vmul.f32 1.442695, %v7153_v33 }
0x2166   : > { %8678 = vpow2.f32 %v7154_v34 }
0x2167   : > { %8680 = vpow2.f32 %v7156_v15 }
0x2170   : > { %v8679_v42 = vpop.eup %8678 }
0x2171   : > { %v8681_v45 = vpop.eup %8680 }
0x2172   : > { %v7158_v46 = vadd.f32 %v8681_v45, %v8679_v42 }
0x2174   : > { %7159 = vadd.xlane.f32.xlu0 %v7158_v46 }
0x2178   : > { %7176 = vadd.xlane.f32.xlu0 %v7175_v3 }
0x2201   : > { %v7160_v54 = vpop.xlane.xlu0 %7159 }
0x2202   : > { %8682 = vlog2.f32 %v7160_v54 }
0x2205   : > { %v7177_v0 = vpop.xlane.xlu0 %7176 }
0x220c   : > { %v8683_v59 = vpop.eup %8682 }
0x220d   : > { %v7162_v29 = vmul.f32 0.6931472, %v8683_v59 }
0x220f   : > { %v7163_v30 = vadd.f32 %v7162_v29, %v7151_v52 }
0x2211   : > { %v7181_v32 = vsub.f32 %v7163_v30, %v7177_v0 }
0x2213   : > { %v7182_v49 = vmul.f32 %v11361_v16, %v7181_v32 }
0x2215   : > { %v7189_v7 = vmul.f32 %v11364_v22, %v7182_v49  ;;  %v7206_v37 = vmul.f32 %v7188_v1, %v7182_v49 }
0x2217   : > { %v7191_v41 = vsel %vm7190_vm13, %v7189_v7, 0.0  ;;  %v7207_v61 = vsel %vm7190_vm13, %v7206_v37, 0.0 }
0x2218   : > { %v7192_v47 = vrot.slane %v7191_v41, 4  ;;  %v7208_v48 = vrot.slane %v7207_v61, 4 }
0x221a   : > { %v7193_v21 = vadd.f32 %v7192_v47, %v7191_v41  ;;  %v7209_v5 = vadd.f32 %v7208_v48, %v7207_v61 }
0x221c   : > { %v7194_v10 = vrot.slane %v7193_v21, 2  ;;  %v7210_v25 = vrot.slane %v7209_v5, 2 }
0x221e   : > { %v7211_v16 = vadd.f32 %v7210_v25, %v7209_v5  ;;  %v7195_v28 = vadd.f32 %v7194_v10, %v7193_v21 }
0x2220   : > { %v7212_v13 = vrot.slane %v7211_v16, 1  ;;  %v7196_v22 = vrot.slane %v7195_v28, 1 }
0x2222   : > { %v7213_v18 = vadd.f32 %v7212_v13, %v7211_v16  ;;  %v7197_v57 = vadd.f32 %v7196_v22, %v7195_v28 }
0x2224   : > { %7240 = vperm.xlu1 %8615, %v7213_v18   ;;  %7225 = vperm.xlu0 %8614, %v7197_v57  }
0x2228   : > { %7248 = vperm.xlu1 %8615, %v7221_v38  }
0x2229   : > { %9434 = shalt.err (!%p9431_p7)
}
0x222a   : > { %s9435_s11 = scalar_lea.hbm %s11411_s13, 256  ;;  %s9439_s15 = scalar_lea.hbm %s11686_s9, 512 }
0x222b   : > { %p9436_p6 = scmp.ne.s32.totalorder %s11411_s13, %s9435_s11  ;;  %p9440_p1 = scmp.lt.u32.totalorder %s11411_s13, %s11686_s9 }
0x222c   : > { %p9441_p10 = scmp.lt.u32.totalorder %s9439_s15, %s9435_s11  ;;  %p9443_p0 = scmp.lt.u32.totalorder %s9435_s11, %s11411_s13 }
0x222d   : > { %p9437_p11 = pnand %p9436_p6, %p11687_p2 }
0x222e   : > { %p9442_p9 = por %p9441_p10, %p9440_p1 }
0x222f   : > { %p9438_p13 = pneg %p9437_p11 }
0x2230   : > { %p9444_p12 = por %p9443_p0, %p9442_p9 }
0x2232   : > { %p9445_p3 = pnand %p9444_p12, %p9438_p13 }
0x2234   : > { %9448 = shalt.err (!%p9445_p3)
}
0x2235   : > { %8406 = dma.vmem_to_hbm [thread:$0]  (%p11687_p2), %s7275_s7, 256, %s11411_s13, %s7256_s6   ;;  %v7233_v53 = vpop.permute.xlu1 %7232  ;;  %vm7229_vm0 = vcmp.eq.s32.totalorder %v10597_v51, 1  ;;  %vm7222_vm1 = vcmp.eq.s32.totalorder %v10597_v51, 0  ;;  %vm7237_vm2 = vcmp.eq.s32.totalorder %v10597_v51, 2  ;;  %vm7245_vm3 = vcmp.eq.s32.totalorder %v10597_v51, 3 }
0x2236   : > { %v7235_v50 = vsel %vm7229_vm0, %v7233_v53, 0.0  ;;  %s7803_s3 = sshll.u32 %s9783_s28, 4  ;;  %s1253_s22 = scalar_lea.vmem [#allocation44], %s10473_s19  ;;  %vm7253_vm4 = vcmask 24576  }
0x2237   : > { %s7287_s5 = sshll.u32 %s1253_s22, 4  ;;  %s11688_s12 = sld [smem:[#allocation96_spill]]  ;;  %s11443_s5 = int_to_ptr.vmem [resolvable:$true] %s7287_s5 }
0x2238   : > { %s7261_s13 = scalar_lea.sflag [#allocation45], %s10473_s19  ;;  %s9449_s28 = scalar_lea.vmem %s11443_s5, 16 }
0x2239   : > { %p9450_p4 = scmp.ne.s32.totalorder %s11443_s5, %s9449_s28  ;;  %s9621_s7 = smov [#allocation44]  }
0x223a   : > { %s9453_s6 = sshll.u32 %s9621_s7, 4  ;;  %s9454_s6 = int_to_ptr.vmem [resolvable:$false] %s9453_s6 }
0x223b   : > { %p9451_p5 = pnand %p9450_p4, %p11687_p2  ;;  %s9455_s10 = scalar_lea.vmem %s9454_s6, 32 }
0x223c   : > { %p9456_p7 = scmp.lt.s32.totalorder %s11443_s5, %s9454_s6  ;;  %p9457_p6 = scmp.lt.s32.totalorder %s9455_s10, %s9449_s28 }
0x223d   : > { %s11441_s24 = scalar_lea.hbm %s11688_s12, %s7803_s3  ;;  %p9452_p8 = pneg %p9451_p5 }
0x223e   : > { %p9458_p11 = por %p9457_p6, %p9456_p7 }
0x2240   : > { %p9459_p13 = pnand %p9458_p11, %p9452_p8 }
0x22a3   : > { %v7241_v4 = vpop.permute.xlu1 %7240  ;;  %v7226_v56 = vpop.permute.xlu0 %7225 }
0x22a4   : > { %v7228_v20 = vsel %vm7222_vm1, %v7226_v56, 0.0  ;;  %v7243_v6 = vsel %vm7237_vm2, %v7241_v4, 0.0 }
0x22a5   : > { %v7236_v40 = vadd.f32 %v7235_v50, %v7228_v20 }
0x22a7   : > { %v7249_v58 = vpop.permute.xlu1 %7248  ;;  %v7244_v44 = vadd.f32 %v7243_v6, %v7236_v40 }
0x22a8   : > { %v7251_v23 = vsel %vm7245_vm3, %v7249_v58, 0.0 }
0x22a9   : > { %v7252_v60 = vadd.f32 %v7251_v23, %v7244_v44 }
0x22ab   : > { %7254 = vst.msk [vmem:[%s1253_s22] sm:$0x1] %vm7253_vm4, %v7252_v60 }
0x22ac   : > { %9462 = shalt.err (!%p9459_p13)
}
0x22ad   : > { %s9463_s19 = scalar_lea.hbm %s11441_s24, 16  ;;  %s9467_s17 = scalar_lea.hbm %s11688_s12, 32 }
0x22ae   : > { %p9464_p1 = scmp.ne.s32.totalorder %s11441_s24, %s9463_s19  ;;  %p9468_p0 = scmp.lt.u32.totalorder %s11441_s24, %s11688_s12 }
0x22af   : > { %p9469_p12 = scmp.lt.u32.totalorder %s9467_s17, %s9463_s19  ;;  %p9471_p4 = scmp.lt.u32.totalorder %s9463_s19, %s11441_s24 }
0x22b0   : > { %p9465_p10 = pnand %p9464_p1, %p11687_p2 }
0x22b1   : > { %p9470_p3 = por %p9469_p12, %p9468_p0 }
0x22b2   : > { %p9466_p9 = pneg %p9465_p10 }
0x22b3   : > { %p9472_p5 = por %p9471_p4, %p9470_p3 }
0x22b5   : > { %p9473_p8 = pnand %p9472_p5, %p9466_p9 }
0x22b7   : > { %9476 = shalt.err (!%p9473_p8)
}
0x22b8   : > { %8407 = dma.vmem_to_hbm [thread:$0]  (%p11687_p2), %s11443_s5, 16, %s11441_s24, %s7261_s13  }
0x22b9 PF: > { %s11689_s29 = sld [smem:[#allocation63_spill]]  ;;  %s11690_s15 = sld [smem:[#allocation68_spill]] }
0x22ba   : > { %p11692_p6 = scmp.ge.s32.totalorder %s9575_s30, 2 }
0x22bf   : > { %s7299_s27 = sand.u32 1, %s11689_s29   ;;  %p11691_p7 = scmp.ne.s32.totalorder %s11690_s15, 0 }
0x22c0   : > { %s7300_s1 = scalar_lea.sflag [#allocation4], %s7299_s27 }
0x22c1   : > { %p8491_p11 = pnand %p11692_p6, %p11691_p7 }
0x22c3   : > { %9554 = dma.done.wait (!%p8491_p11), %s7300_s1, 256  }
0x22c4   : > { %9556 = vsyncadd (!%p8491_p11), %s7300_s1, 4294967040  ;;  %s7309_s3 = scalar_lea.sflag [#allocation45], %s7299_s27 }
0x22c5   : > { %9558 = dma.done.wait (!%p8491_p11), %s7309_s3, 16  }
0x22c6   : > { %9560 = vsyncadd (!%p8491_p11), %s7309_s3, 4294967280  ;;  %s11693_s30 = sld [smem:[#allocation66_spill]]  ;;  %s11694_s20 = sld [smem:[#allocation64_spill]] }
0x22c7   : > { %s11695_s8 = sld [smem:[#allocation67_spill]]  ;;  %s11696_s7 = smov %s9567_s4 }
0x22cc   : > { %p61_p2 = scmp.ge.s32.totalorder %s11693_s30, 4   ;;  %s11697_s4 = smov %s11694_s20 }
0x22ce   :  { %63 = sbr.rel (!%p61_p2) target bundleno = 51 (0x33), region = 311 }
0x22d5   :  { %7313 = vsyncpa [#allocation3], 1 }
0x22d6   :  { %7315 = vsyncpa [#allocation3 + $0x1], 1 }
0x22d7   :  { %7316 = vsyncpa [#allocation6], 1 }
0x22d8   :  { %7318 = vsyncpa [#allocation6 + $0x1], 1 }
0x22d9   :  { %7319 = vsyncpa [#allocation9], 1 }
0x22da   :  { %7321 = vsyncpa [#allocation9 + $0x1], 1 }
0x22db   :  { %7322 = vsyncpa [#allocation12], 1 }
0x22dc   :  { %7323 = vsyncpa [#allocation15], 1 }
0x22dd   :  { %7324 = vsyncpa [#allocation18], 1 }
0x22de   :  { %7325 = vsyncpa [#allocation21], 1 }
0x22df   :  { %7326 = vsyncpa [#allocation24], 1 }
0x22e0   :  { %7327 = vsyncpa [#allocation27], 1 }
0x22e1   :  { %7328 = vsyncpa [#allocation30], 1 }
0x22e2   :  { %7329 = vsyncpa [#allocation33], 1 }
0x22e3   :  { %7330 = vsyncpa [#allocation36], 1 }
0x22e4   :  { %7331 = vsyncpa [#allocation39], 1 }
0x22e5   :  { %7332 = vsyncpa [#allocation42], 1 }
0x22e6   :  { %7333 = vsyncpa [#allocation4], 1 }
0x22e7   :  { %7335 = vsyncpa [#allocation4 + $0x1], 1 }
0x22e8   :  { %7336 = vsyncpa [#allocation45], 1 }
0x22e9   :  { %7338 = vsyncpa [#allocation45 + $0x1], 1 }

</bundles_post_ra>
